<compile_context>
chip_gen: v6e
topology: v6e:2x2x1
jax: 0.10.0
libtpu: 0.0.40
codegen_flags: <defaults>
</compile_context>

<pallas_src>
import numpy as np
import jax
import jax.numpy as jnp
from jax import lax
from jax.experimental import pallas as pl
from jax.experimental.pallas import tpu as pltpu


# Encoder layer table: (H, W, Cin, Cout, n_tanh_after_pool, pool)
#   n_tanh_after_pool = number of tanh's between this conv's (pooled, biased)
#   output and the next conv's input (or the final z for the last layer).
LAYERS = (
    (32, 32,  3,  6, 1, True),    # conv1            -> maxpool -> tanh
    (16, 16,  6, 12, 1, True),    # encoder1 conv    -> maxpool -> tanh
    ( 8,  8, 12, 16, 2, True),    # encoder2 conv    -> tanh -> maxpool -> tanh
    ( 4,  4, 16, 10, 2, True),    # encoder3 conv    -> tanh -> maxpool -> tanh
    ( 2,  2, 10,  6, 1, False),   # encoder4 conv    -> tanh  (then flatten)
)
NL = len(LAYERS)
N_POOL = sum(1 for l in LAYERS if l[5])


# ------------------------------ fused kernel --------------------------------

def _make_encoder_kernel(B):
    """Build the whole-encoder kernel for a batch block of B images."""

    def kernel(*refs):
        x_ref = refs[0]                                 # (B, 3, 32, 32) NCHW block
        wb_refs = refs[1:1 + NL]                        # banded conv weights
        rs_refs = refs[1 + NL:1 + NL + N_POOL]          # row selectors (pooled)
        b_refs = refs[1 + NL + N_POOL:1 + 2 * NL + N_POOL]   # bias rows
        out_ref = refs[1 + 2 * NL + N_POOL]             # (B, 2, 12) final slab
        p_refs = refs[2 + 2 * NL + N_POOL:]             # padded activation slabs

        # ---- stage the NCHW input into the layer-0 padded slab ------------
        H0, W0, C0 = LAYERS[0][0], LAYERS[0][1], LAYERS[0][2]
        P0 = p_refs[0]
        P0[...] = jnp.zeros_like(P0)
        for b in range(B):
            base = b * (H0 + 4) + 2
            for c in range(C0):
                P0[base:base + H0, c * W0:(c + 1) * W0] = x_ref[b, c, :, :]

        # ---- encoder stack -------------------------------------------------
        pool_idx = 0
        for l, (H, W, Cin, Cout, ntanh, pool) in enumerate(LAYERS):
            P = p_refs[l]
            wb = wb_refs[l]
            R = B * (H + 4) - 4                          # stacked conv-output rows
            if pool:
                Hh, Wh = H // 2, W // 2
                # Conv columns for even / odd output x positions (horizontal
                # zero padding folded into the band matrices): 5 row-shifted
                # matmuls over the whole B-image stack.
                acc_e = None
                acc_o = None
                for ky in range(5):
                    a = P[ky:ky + R, :]                  # (R, Cin*W)
                    de = jnp.dot(a, wb[ky], preferred_element_type=jnp.float32)
                    do = jnp.dot(a, wb[5 + ky], preferred_element_type=jnp.float32)
                    acc_e = de if acc_e is None else acc_e + de
                    acc_o = do if acc_o is None else acc_o + do
                hmax = jnp.maximum(acc_e, acc_o)         # horizontal 2:1 max
                rs = rs_refs[pool_idx]
                pool_idx += 1
                ve = jnp.dot(rs[0], hmax, preferred_element_type=jnp.float32)
                vo = jnp.dot(rs[1], hmax, preferred_element_type=jnp.float32)
                act = jnp.maximum(ve, vo) + b_refs[l][...]   # 2x2 max-pool + bias
                for _ in range(ntanh):                   # tanh on pooled map only
                    act = jnp.tanh(act)
                Pn = p_refs[l + 1]                       # next layer's padded slab
                Pn[...] = jnp.zeros_like(Pn)
                for b in range(B):
                    Pn[b * (Hh + 4) + 2:b * (Hh + 4) + 2 + Hh, :] = \
                        act[b * Hh:(b + 1) * Hh, :]
            else:
                acc = None
                for ky in range(5):
                    d = jnp.dot(P[ky:ky + R, :], wb[ky],
                                preferred_element_type=jnp.float32)
                    acc = d if acc is None else acc + d
                act = acc + b_refs[l][...]
                for _ in range(ntanh):
                    act = jnp.tanh(act)
                for b in range(B):                        # (2, 12) per image
                    out_ref[b, :, :] = act[b * (H + 4):b * (H + 4) + H, :]

    return kernel


# --------------------- weight preprocessing (host, one-time) ----------------

def _band_matrices(w_oihw, W, out_xs):
    """Band matrices for a 5x5 'same' conv in channel-major slab layout.

    Returns (5, Cin*W, Cout*len(out_xs)); entry [ky, ci*W+xi, co*len+j] is the
    weight tap linking input (ci, xi) to output (co, out_xs[j]) for vertical
    offset ky.  Out-of-range horizontal taps stay zero (= zero padding).
    """
    w = np.asarray(w_oihw, dtype=np.float32)            # torch (Cout,Cin,5,5)
    Cout, Cin, KH, KW = w.shape
    Wo = len(out_xs)
    ci = np.arange(Cin)[:, None]
    co = np.arange(Cout)[None, :]
    mats = np.zeros((KH, Cin * W, Cout * Wo), np.float32)
    for ky in range(KH):
        for j, xo in enumerate(out_xs):
            for kx in range(KW):
                xi = xo - 2 + kx
                if 0 <= xi < W:
                    mats[ky, ci * W + xi, co * Wo + j] = w[:, :, ky, kx].T
    return mats


def _row_selectors(H, B):
    """0/1 selectors mapping stacked conv rows -> stacked pooled rows."""
    Hh = H // 2
    R = B * (H + 4) - 4
    rs = np.zeros((2, B * Hh, R), np.float32)
    for i in range(B):
        for py in range(Hh):
            rs[0, i * Hh + py, i * (H + 4) + 2 * py] = 1.0      # even conv row
            rs[1, i * Hh + py, i * (H + 4) + 2 * py + 1] = 1.0  # odd conv row
    return rs


def prepare_kernel_params(params, block_n):
    """Torch-layout conv params -> banded weights / tiled biases / selectors."""
    names = ('conv1', 'enc1', 'enc2', 'enc3', 'enc4')
    wbs, rsels, brows = [], [], []
    for l, (H, W, Cin, Cout, _ntanh, pool) in enumerate(LAYERS):
        w = params[names[l] + '_w']
        b = np.asarray(params[names[l] + '_b'], np.float32)
        if pool:
            Wh = W // 2
            wb = np.concatenate(
                [_band_matrices(w, W, list(range(0, W, 2))),    # even x columns
                 _band_matrices(w, W, list(range(1, W, 2)))],   # odd x columns
                axis=0)                                         # (10, Cin*W, Cout*Wh)
            rsels.append(jnp.asarray(_row_selectors(H, block_n)))
            brows.append(jnp.asarray(np.repeat(b, Wh)[None, :]))
        else:
            wb = _band_matrices(w, W, list(range(W)))           # (5, Cin*W, Cout*W)
            brows.append(jnp.asarray(np.repeat(b, W)[None, :]))
        wbs.append(jnp.asarray(wb))
    return {'wb': wbs, 'rsel': rsels, 'brow': brows, 'block_n': block_n}


def _pick_block_n(N, max_block=8):
    """Largest divisor of N not exceeding max_block (images per grid step)."""
    for b in range(min(N, max_block), 0, -1):
        if N % b == 0:
            return b
    return 1


# ------------------------------ model forward --------------------------------

def autoencoder_forward(x_nchw, kp):
    """Returns z exactly as the PyTorch forward does (NCHW flatten order)."""
    N, C, H, W = x_nchw.shape
    assert (C, H, W) == (3, 32, 32), "kernel is specialized to 3x32x32 inputs"
    B = kp['block_n']
    assert N % B == 0, "batch must be divisible by block_n"

    def const_spec(a):
        nd = a.ndim
        return pl.BlockSpec(tuple(a.shape), lambda n, _nd=nd: (0,) * _nd)

    inputs = [x_nchw] + list(kp['wb']) + list(kp['rsel']) + list(kp['brow'])
    in_specs = ([pl.BlockSpec((B, 3, 32, 32), lambda n: (n, 0, 0, 0))]
                + [const_spec(a) for a in inputs[1:]])
    out_specs = pl.BlockSpec((B, 2, 12), lambda n: (n, 0, 0))
    # Per-layer padded activation slabs (rows = B*(H+4), lanes = Cin*W), all VMEM.
    scratch = [pltpu.VMEM((B * (Hl + 4), Cin_l * Wl), jnp.float32)
               for (Hl, Wl, Cin_l, _Co, _nt, _p) in LAYERS]

    out = pl.pallas_call(
        _make_encoder_kernel(B),
        out_shape=jax.ShapeDtypeStruct((N, 2, 12), jnp.float32),
        grid=(N // B,),
        in_specs=in_specs,
        out_specs=out_specs,
        scratch_shapes=scratch,
        compiler_params=pltpu.CompilerParams(
            dimension_semantics=("parallel",)),
    )(*inputs)

    # Final slab element (n, h, c*2 + w) -> torch.flatten(x, 1) NCHW order.
    return out.reshape(N, 2, 6, 2).transpose(0, 2, 1, 3).reshape(N, 24)


# -------------------------- deterministic parameters -------------------------

def init_params(key):
    shapes = {'conv1': (6, 3), 'enc1': (12, 6), 'enc2': (16, 12),
              'enc3': (10, 16), 'enc4': (6, 10)}
    params = {}
    for i, (name, (cout, cin)) in enumerate(shapes.items()):
        kw, kb = jax.random.split(jax.random.fold_in(key, i))
        params[name + '_w'] = 0.1 * jax.random.normal(kw, (cout, cin, 5, 5), jnp.float32)
        params[name + '_b'] = 0.1 * jax.random.normal(kb, (cout,), jnp.float32)
    return params


# ------------------------------- pure-JAX reference --------------------------

def reference_forward(x_nchw, p):
    def conv(x, w, b):
        y = lax.conv_general_dilated(x, w, (1, 1), [(2, 2), (2, 2)],
                                     dimension_numbers=('NCHW', 'OIHW', 'NCHW'))
        return y + b.reshape(1, -1, 1, 1)

    def pool(x):
        N, C, H, W = x.shape
        return x.reshape(N, C, H // 2, 2, W // 2, 2).max(axis=(3, 5))

    x = pool(conv(x_nchw, p['conv1_w'], p['conv1_b']))
    x = pool(conv(jnp.tanh(x), p['enc1_w'], p['enc1_b']))
    x = pool(jnp.tanh(conv(jnp.tanh(x), p['enc2_w'], p['enc2_b'])))
    x = pool(jnp.tanh(conv(jnp.tanh(x), p['enc3_w'], p['enc3_b'])))
    x = jnp.tanh(conv(jnp.tanh(x), p['enc4_w'], p['enc4_b']))
    return x.reshape(x.shape[0], -1)


# ------------------------------------ main -----------------------------------

if __name__ == "__main__":
    key = jax.random.PRNGKey(0)
    pkey, xkey = jax.random.split(key)
    params = init_params(pkey)

    # Input spatial dims must be 32x32 (four 2x2 pools down to 2x2).
    x = jax.random.normal(xkey, (2, 3, 32, 32), jnp.float32)

    kparams = prepare_kernel_params(params, block_n=_pick_block_n(x.shape[0]))

    z = autoencoder_forward(x, kparams)
    z = jax.block_until_ready(z)

    assert z.shape == (2, 6 * 2 * 2), z.shape
    z_ref = reference_forward(x, params)
    err = float(jnp.max(jnp.abs(z - z_ref)))
    assert jnp.allclose(z, z_ref, atol=1e-4, rtol=1e-4), err

    print("KERNEL_OK")
</pallas_src>

<mosaic_0001>
module attributes {stable_mosaic.version = 11 : i64} {
  func.func @kernel(%arg0: i32, %arg1: memref<2x3x32x32xf32, #tpu.memory_space<vmem>>, %arg2: memref<10x96x96xf32, #tpu.memory_space<vmem>>, %arg3: memref<10x96x96xf32, #tpu.memory_space<vmem>>, %arg4: memref<10x96x64xf32, #tpu.memory_space<vmem>>, %arg5: memref<10x64x20xf32, #tpu.memory_space<vmem>>, %arg6: memref<5x20x12xf32, #tpu.memory_space<vmem>>, %arg7: memref<2x32x68xf32, #tpu.memory_space<vmem>>, %arg8: memref<2x16x36xf32, #tpu.memory_space<vmem>>, %arg9: memref<2x8x20xf32, #tpu.memory_space<vmem>>, %arg10: memref<2x4x12xf32, #tpu.memory_space<vmem>>, %arg11: memref<1x96xf32, #tpu.memory_space<vmem>>, %arg12: memref<1x96xf32, #tpu.memory_space<vmem>>, %arg13: memref<1x64xf32, #tpu.memory_space<vmem>>, %arg14: memref<1x20xf32, #tpu.memory_space<vmem>>, %arg15: memref<1x12xf32, #tpu.memory_space<vmem>>, %arg16: memref<2x2x12xf32, #tpu.memory_space<vmem>>, %arg17: memref<72x96xf32, #tpu.memory_space<vmem>>, %arg18: memref<40x96xf32, #tpu.memory_space<vmem>>, %arg19: memref<24x96xf32, #tpu.memory_space<vmem>>, %arg20: memref<16x64xf32, #tpu.memory_space<vmem>>, %arg21: memref<12x20xf32, #tpu.memory_space<vmem>>) attributes {dimension_semantics = [#tpu.dimension_semantics<parallel>], iteration_bounds = array<i64: 1>, scalar_prefetch = 0 : i64, scratch_operands = 5 : i64, tpu.core_type = #tpu.core_type<tc>, window_params = [{transform_indices = @transform_0, window_bounds = array<i64: 2, 3, 32, 32>}, {pipeline_mode = #tpu.pipeline_mode<synchronous>, transform_indices = @transform_1, window_bounds = array<i64: 10, 96, 96>}, {pipeline_mode = #tpu.pipeline_mode<synchronous>, transform_indices = @transform_2, window_bounds = array<i64: 10, 96, 96>}, {pipeline_mode = #tpu.pipeline_mode<synchronous>, transform_indices = @transform_3, window_bounds = array<i64: 10, 96, 64>}, {pipeline_mode = #tpu.pipeline_mode<synchronous>, transform_indices = @transform_4, window_bounds = array<i64: 10, 64, 20>}, {pipeline_mode = #tpu.pipeline_mode<synchronous>, transform_indices = @transform_5, window_bounds = array<i64: 5, 20, 12>}, {pipeline_mode = #tpu.pipeline_mode<synchronous>, transform_indices = @transform_6, window_bounds = array<i64: 2, 32, 68>}, {pipeline_mode = #tpu.pipeline_mode<synchronous>, transform_indices = @transform_7, window_bounds = array<i64: 2, 16, 36>}, {pipeline_mode = #tpu.pipeline_mode<synchronous>, transform_indices = @transform_8, window_bounds = array<i64: 2, 8, 20>}, {pipeline_mode = #tpu.pipeline_mode<synchronous>, transform_indices = @transform_9, window_bounds = array<i64: 2, 4, 12>}, {pipeline_mode = #tpu.pipeline_mode<synchronous>, transform_indices = @transform_10, window_bounds = array<i64: 1, 96>}, {pipeline_mode = #tpu.pipeline_mode<synchronous>, transform_indices = @transform_11, window_bounds = array<i64: 1, 96>}, {pipeline_mode = #tpu.pipeline_mode<synchronous>, transform_indices = @transform_12, window_bounds = array<i64: 1, 64>}, {pipeline_mode = #tpu.pipeline_mode<synchronous>, transform_indices = @transform_13, window_bounds = array<i64: 1, 20>}, {pipeline_mode = #tpu.pipeline_mode<synchronous>, transform_indices = @transform_14, window_bounds = array<i64: 1, 12>}, {transform_indices = @transform_15, window_bounds = array<i64: 2, 2, 12>}]} {
    %cst = arith.constant 0.000000e+00 : f32
    %0 = vector.broadcast %cst : f32 to vector<72x96xf32>
    %c0 = arith.constant 0 : index
    %c0_0 = arith.constant 0 : index
    %1 = vector.load %arg17[%c0, %c0_0] : memref<72x96xf32, #tpu.memory_space<vmem>>, vector<72x96xf32>
    tpu.vector_store %arg17[%c0, %c0_0], %0 {strides = array<i32>} : memref<72x96xf32, #tpu.memory_space<vmem>>, vector<72x96xf32>,
    %c0_1 = arith.constant 0 : index
    %c0_2 = arith.constant 0 : index
    %c0_3 = arith.constant 0 : index
    %c0_4 = arith.constant 0 : index
    %2 = vector.load %arg1[%c0_1, %c0_2, %c0_3, %c0_4] : memref<2x3x32x32xf32, #tpu.memory_space<vmem>>, vector<1x1x32x32xf32>
    %3 = vector.shape_cast %2 : vector<1x1x32x32xf32> to vector<32x32xf32>
    %c2 = arith.constant 2 : index
    %c0_5 = arith.constant 0 : index
    %4 = vector.load %arg17[%c2, %c0_5] : memref<72x96xf32, #tpu.memory_space<vmem>>, vector<32x32xf32>
    tpu.vector_store %arg17[%c2, %c0_5], %3 {strides = array<i32>} : memref<72x96xf32, #tpu.memory_space<vmem>>, vector<32x32xf32>,
    %c0_6 = arith.constant 0 : index
    %c1 = arith.constant 1 : index
    %c0_7 = arith.constant 0 : index
    %c0_8 = arith.constant 0 : index
    %5 = vector.load %arg1[%c0_6, %c1, %c0_7, %c0_8] : memref<2x3x32x32xf32, #tpu.memory_space<vmem>>, vector<1x1x32x32xf32>
    %6 = vector.shape_cast %5 : vector<1x1x32x32xf32> to vector<32x32xf32>
    %c2_9 = arith.constant 2 : index
    %c32 = arith.constant 32 : index
    %7 = vector.load %arg17[%c2_9, %c32] : memref<72x96xf32, #tpu.memory_space<vmem>>, vector<32x32xf32>
    tpu.vector_store %arg17[%c2_9, %c32], %6 {strides = array<i32>} : memref<72x96xf32, #tpu.memory_space<vmem>>, vector<32x32xf32>,
    %c0_10 = arith.constant 0 : index
    %c2_11 = arith.constant 2 : index
    %c0_12 = arith.constant 0 : index
    %c0_13 = arith.constant 0 : index
    %8 = vector.load %arg1[%c0_10, %c2_11, %c0_12, %c0_13] : memref<2x3x32x32xf32, #tpu.memory_space<vmem>>, vector<1x1x32x32xf32>
    %9 = vector.shape_cast %8 : vector<1x1x32x32xf32> to vector<32x32xf32>
    %c2_14 = arith.constant 2 : index
    %c64 = arith.constant 64 : index
    %10 = vector.load %arg17[%c2_14, %c64] : memref<72x96xf32, #tpu.memory_space<vmem>>, vector<32x32xf32>
    tpu.vector_store %arg17[%c2_14, %c64], %9 {strides = array<i32>} : memref<72x96xf32, #tpu.memory_space<vmem>>, vector<32x32xf32>,
    %c1_15 = arith.constant 1 : index
    %c0_16 = arith.constant 0 : index
    %c0_17 = arith.constant 0 : index
    %c0_18 = arith.constant 0 : index
    %11 = vector.load %arg1[%c1_15, %c0_16, %c0_17, %c0_18] : memref<2x3x32x32xf32, #tpu.memory_space<vmem>>, vector<1x1x32x32xf32>
    %12 = vector.shape_cast %11 : vector<1x1x32x32xf32> to vector<32x32xf32>
    %c38 = arith.constant 38 : index
    %c0_19 = arith.constant 0 : index
    %13 = vector.load %arg17[%c38, %c0_19] : memref<72x96xf32, #tpu.memory_space<vmem>>, vector<32x32xf32>
    tpu.vector_store %arg17[%c38, %c0_19], %12 {strides = array<i32>} : memref<72x96xf32, #tpu.memory_space<vmem>>, vector<32x32xf32>,
    %c1_20 = arith.constant 1 : index
    %c1_21 = arith.constant 1 : index
    %c0_22 = arith.constant 0 : index
    %c0_23 = arith.constant 0 : index
    %14 = vector.load %arg1[%c1_20, %c1_21, %c0_22, %c0_23] : memref<2x3x32x32xf32, #tpu.memory_space<vmem>>, vector<1x1x32x32xf32>
    %15 = vector.shape_cast %14 : vector<1x1x32x32xf32> to vector<32x32xf32>
    %c38_24 = arith.constant 38 : index
    %c32_25 = arith.constant 32 : index
    %16 = vector.load %arg17[%c38_24, %c32_25] : memref<72x96xf32, #tpu.memory_space<vmem>>, vector<32x32xf32>
    tpu.vector_store %arg17[%c38_24, %c32_25], %15 {strides = array<i32>} : memref<72x96xf32, #tpu.memory_space<vmem>>, vector<32x32xf32>,
    %c1_26 = arith.constant 1 : index
    %c2_27 = arith.constant 2 : index
    %c0_28 = arith.constant 0 : index
    %c0_29 = arith.constant 0 : index
    %17 = vector.load %arg1[%c1_26, %c2_27, %c0_28, %c0_29] : memref<2x3x32x32xf32, #tpu.memory_space<vmem>>, vector<1x1x32x32xf32>
    %18 = vector.shape_cast %17 : vector<1x1x32x32xf32> to vector<32x32xf32>
    %c38_30 = arith.constant 38 : index
    %c64_31 = arith.constant 64 : index
    %19 = vector.load %arg17[%c38_30, %c64_31] : memref<72x96xf32, #tpu.memory_space<vmem>>, vector<32x32xf32>
    tpu.vector_store %arg17[%c38_30, %c64_31], %18 {strides = array<i32>} : memref<72x96xf32, #tpu.memory_space<vmem>>, vector<32x32xf32>,
    %c0_32 = arith.constant 0 : index
    %c0_33 = arith.constant 0 : index
    %20 = vector.load %arg17[%c0_32, %c0_33] : memref<72x96xf32, #tpu.memory_space<vmem>>, vector<68x96xf32>
    %c0_34 = arith.constant 0 : index
    %c0_35 = arith.constant 0 : index
    %c0_36 = arith.constant 0 : index
    %21 = vector.load %arg2[%c0_34, %c0_35, %c0_36] : memref<10x96x96xf32, #tpu.memory_space<vmem>>, vector<1x96x96xf32>
    %22 = vector.shape_cast %21 : vector<1x96x96xf32> to vector<96x96xf32>
    %cst_37 = arith.constant dense<0.000000e+00> : vector<68x96xf32>
    %23 = tpu.matmul %20, %22, %cst_37 {dimension_numbers = #tpu.dot_dimension_numbers<[1], [0], [0], [1], [0, 0, 1, 1], [], []>} : vector<68x96xf32>, vector<96x96xf32>, vector<68x96xf32> -> vector<68x96xf32>
    %c5 = arith.constant 5 : index
    %c0_38 = arith.constant 0 : index
    %c0_39 = arith.constant 0 : index
    %24 = vector.load %arg2[%c5, %c0_38, %c0_39] : memref<10x96x96xf32, #tpu.memory_space<vmem>>, vector<1x96x96xf32>
    %25 = vector.shape_cast %24 : vector<1x96x96xf32> to vector<96x96xf32>
    %cst_40 = arith.constant dense<0.000000e+00> : vector<68x96xf32>
    %26 = tpu.matmul %20, %25, %cst_40 {dimension_numbers = #tpu.dot_dimension_numbers<[1], [0], [0], [1], [0, 0, 1, 1], [], []>} : vector<68x96xf32>, vector<96x96xf32>, vector<68x96xf32> -> vector<68x96xf32>
    %c1_41 = arith.constant 1 : index
    %c0_42 = arith.constant 0 : index
    %27 = vector.load %arg17[%c1_41, %c0_42] : memref<72x96xf32, #tpu.memory_space<vmem>>, vector<68x96xf32>
    %c1_43 = arith.constant 1 : index
    %c0_44 = arith.constant 0 : index
    %c0_45 = arith.constant 0 : index
    %28 = vector.load %arg2[%c1_43, %c0_44, %c0_45] : memref<10x96x96xf32, #tpu.memory_space<vmem>>, vector<1x96x96xf32>
    %29 = vector.shape_cast %28 : vector<1x96x96xf32> to vector<96x96xf32>
    %cst_46 = arith.constant dense<0.000000e+00> : vector<68x96xf32>
    %30 = tpu.matmul %27, %29, %cst_46 {dimension_numbers = #tpu.dot_dimension_numbers<[1], [0], [0], [1], [0, 0, 1, 1], [], []>} : vector<68x96xf32>, vector<96x96xf32>, vector<68x96xf32> -> vector<68x96xf32>
    %c6 = arith.constant 6 : index
    %c0_47 = arith.constant 0 : index
    %c0_48 = arith.constant 0 : index
    %31 = vector.load %arg2[%c6, %c0_47, %c0_48] : memref<10x96x96xf32, #tpu.memory_space<vmem>>, vector<1x96x96xf32>
    %32 = vector.shape_cast %31 : vector<1x96x96xf32> to vector<96x96xf32>
    %cst_49 = arith.constant dense<0.000000e+00> : vector<68x96xf32>
    %33 = tpu.matmul %27, %32, %cst_49 {dimension_numbers = #tpu.dot_dimension_numbers<[1], [0], [0], [1], [0, 0, 1, 1], [], []>} : vector<68x96xf32>, vector<96x96xf32>, vector<68x96xf32> -> vector<68x96xf32>
    %34 = arith.addf %23, %30 : vector<68x96xf32>
    %35 = arith.addf %26, %33 : vector<68x96xf32>
    %c2_50 = arith.constant 2 : index
    %c0_51 = arith.constant 0 : index
    %36 = vector.load %arg17[%c2_50, %c0_51] : memref<72x96xf32, #tpu.memory_space<vmem>>, vector<68x96xf32>
    %c2_52 = arith.constant 2 : index
    %c0_53 = arith.constant 0 : index
    %c0_54 = arith.constant 0 : index
    %37 = vector.load %arg2[%c2_52, %c0_53, %c0_54] : memref<10x96x96xf32, #tpu.memory_space<vmem>>, vector<1x96x96xf32>
    %38 = vector.shape_cast %37 : vector<1x96x96xf32> to vector<96x96xf32>
    %cst_55 = arith.constant dense<0.000000e+00> : vector<68x96xf32>
    %39 = tpu.matmul %36, %38, %cst_55 {dimension_numbers = #tpu.dot_dimension_numbers<[1], [0], [0], [1], [0, 0, 1, 1], [], []>} : vector<68x96xf32>, vector<96x96xf32>, vector<68x96xf32> -> vector<68x96xf32>
    %c7 = arith.constant 7 : index
    %c0_56 = arith.constant 0 : index
    %c0_57 = arith.constant 0 : index
    %40 = vector.load %arg2[%c7, %c0_56, %c0_57] : memref<10x96x96xf32, #tpu.memory_space<vmem>>, vector<1x96x96xf32>
    %41 = vector.shape_cast %40 : vector<1x96x96xf32> to vector<96x96xf32>
    %cst_58 = arith.constant dense<0.000000e+00> : vector<68x96xf32>
    %42 = tpu.matmul %36, %41, %cst_58 {dimension_numbers = #tpu.dot_dimension_numbers<[1], [0], [0], [1], [0, 0, 1, 1], [], []>} : vector<68x96xf32>, vector<96x96xf32>, vector<68x96xf32> -> vector<68x96xf32>
    %43 = arith.addf %34, %39 : vector<68x96xf32>
    %44 = arith.addf %35, %42 : vector<68x96xf32>
    %c3 = arith.constant 3 : index
    %c0_59 = arith.constant 0 : index
    %45 = vector.load %arg17[%c3, %c0_59] : memref<72x96xf32, #tpu.memory_space<vmem>>, vector<68x96xf32>
    %c3_60 = arith.constant 3 : index
    %c0_61 = arith.constant 0 : index
    %c0_62 = arith.constant 0 : index
    %46 = vector.load %arg2[%c3_60, %c0_61, %c0_62] : memref<10x96x96xf32, #tpu.memory_space<vmem>>, vector<1x96x96xf32>
    %47 = vector.shape_cast %46 : vector<1x96x96xf32> to vector<96x96xf32>
    %cst_63 = arith.constant dense<0.000000e+00> : vector<68x96xf32>
    %48 = tpu.matmul %45, %47, %cst_63 {dimension_numbers = #tpu.dot_dimension_numbers<[1], [0], [0], [1], [0, 0, 1, 1], [], []>} : vector<68x96xf32>, vector<96x96xf32>, vector<68x96xf32> -> vector<68x96xf32>
    %c8 = arith.constant 8 : index
    %c0_64 = arith.constant 0 : index
    %c0_65 = arith.constant 0 : index
    %49 = vector.load %arg2[%c8, %c0_64, %c0_65] : memref<10x96x96xf32, #tpu.memory_space<vmem>>, vector<1x96x96xf32>
    %50 = vector.shape_cast %49 : vector<1x96x96xf32> to vector<96x96xf32>
    %cst_66 = arith.constant dense<0.000000e+00> : vector<68x96xf32>
    %51 = tpu.matmul %45, %50, %cst_66 {dimension_numbers = #tpu.dot_dimension_numbers<[1], [0], [0], [1], [0, 0, 1, 1], [], []>} : vector<68x96xf32>, vector<96x96xf32>, vector<68x96xf32> -> vector<68x96xf32>
    %52 = arith.addf %43, %48 : vector<68x96xf32>
    %53 = arith.addf %44, %51 : vector<68x96xf32>
    %c4 = arith.constant 4 : index
    %c0_67 = arith.constant 0 : index
    %54 = vector.load %arg17[%c4, %c0_67] : memref<72x96xf32, #tpu.memory_space<vmem>>, vector<68x96xf32>
    %c4_68 = arith.constant 4 : index
    %c0_69 = arith.constant 0 : index
    %c0_70 = arith.constant 0 : index
    %55 = vector.load %arg2[%c4_68, %c0_69, %c0_70] : memref<10x96x96xf32, #tpu.memory_space<vmem>>, vector<1x96x96xf32>
    %56 = vector.shape_cast %55 : vector<1x96x96xf32> to vector<96x96xf32>
    %cst_71 = arith.constant dense<0.000000e+00> : vector<68x96xf32>
    %57 = tpu.matmul %54, %56, %cst_71 {dimension_numbers = #tpu.dot_dimension_numbers<[1], [0], [0], [1], [0, 0, 1, 1], [], []>} : vector<68x96xf32>, vector<96x96xf32>, vector<68x96xf32> -> vector<68x96xf32>
    %c9 = arith.constant 9 : index
    %c0_72 = arith.constant 0 : index
    %c0_73 = arith.constant 0 : index
    %58 = vector.load %arg2[%c9, %c0_72, %c0_73] : memref<10x96x96xf32, #tpu.memory_space<vmem>>, vector<1x96x96xf32>
    %59 = vector.shape_cast %58 : vector<1x96x96xf32> to vector<96x96xf32>
    %cst_74 = arith.constant dense<0.000000e+00> : vector<68x96xf32>
    %60 = tpu.matmul %54, %59, %cst_74 {dimension_numbers = #tpu.dot_dimension_numbers<[1], [0], [0], [1], [0, 0, 1, 1], [], []>} : vector<68x96xf32>, vector<96x96xf32>, vector<68x96xf32> -> vector<68x96xf32>
    %61 = arith.addf %52, %57 : vector<68x96xf32>
    %62 = arith.addf %53, %60 : vector<68x96xf32>
    %63 = arith.maximumf %61, %62 : vector<68x96xf32>
    %c0_75 = arith.constant 0 : index
    %c0_76 = arith.constant 0 : index
    %c0_77 = arith.constant 0 : index
    %64 = vector.load %arg7[%c0_75, %c0_76, %c0_77] : memref<2x32x68xf32, #tpu.memory_space<vmem>>, vector<1x32x68xf32>
    %65 = vector.shape_cast %64 : vector<1x32x68xf32> to vector<32x68xf32>
    %cst_78 = arith.constant dense<0.000000e+00> : vector<32x96xf32>
    %66 = tpu.matmul %65, %63, %cst_78 {dimension_numbers = #tpu.dot_dimension_numbers<[1], [0], [0], [1], [0, 0, 1, 1], [], []>} : vector<32x68xf32>, vector<68x96xf32>, vector<32x96xf32> -> vector<32x96xf32>
    %c1_79 = arith.constant 1 : index
    %c0_80 = arith.constant 0 : index
    %c0_81 = arith.constant 0 : index
    %67 = vector.load %arg7[%c1_79, %c0_80, %c0_81] : memref<2x32x68xf32, #tpu.memory_space<vmem>>, vector<1x32x68xf32>
    %68 = vector.shape_cast %67 : vector<1x32x68xf32> to vector<32x68xf32>
    %cst_82 = arith.constant dense<0.000000e+00> : vector<32x96xf32>
    %69 = tpu.matmul %68, %63, %cst_82 {dimension_numbers = #tpu.dot_dimension_numbers<[1], [0], [0], [1], [0, 0, 1, 1], [], []>} : vector<32x68xf32>, vector<68x96xf32>, vector<32x96xf32> -> vector<32x96xf32>
    %70 = arith.maximumf %66, %69 : vector<32x96xf32>
    %c0_83 = arith.constant 0 : index
    %c0_84 = arith.constant 0 : index
    %71 = vector.load %arg11[%c0_83, %c0_84] : memref<1x96xf32, #tpu.memory_space<vmem>>, vector<1x96xf32>
    %72 = vector.broadcast %71 : vector<1x96xf32> to vector<32x96xf32>
    %73 = arith.addf %70, %72 : vector<32x96xf32>
    %74 = math.tanh %73 : vector<32x96xf32>
    %cst_85 = arith.constant 0.000000e+00 : f32
    %75 = vector.broadcast %cst_85 : f32 to vector<40x96xf32>
    %c0_86 = arith.constant 0 : index
    %c0_87 = arith.constant 0 : index
    %76 = vector.load %arg18[%c0_86, %c0_87] : memref<40x96xf32, #tpu.memory_space<vmem>>, vector<40x96xf32>
    tpu.vector_store %arg18[%c0_86, %c0_87], %75 {strides = array<i32>} : memref<40x96xf32, #tpu.memory_space<vmem>>, vector<40x96xf32>,
    %77 = vector.extract_strided_slice %74 {offsets = [0, 0], sizes = [16, 96], strides = [1, 1]} : vector<32x96xf32> to vector<16x96xf32>
    %c2_88 = arith.constant 2 : index
    %c0_89 = arith.constant 0 : index
    %78 = vector.load %arg18[%c2_88, %c0_89] : memref<40x96xf32, #tpu.memory_space<vmem>>, vector<16x96xf32>
    tpu.vector_store %arg18[%c2_88, %c0_89], %77 {strides = array<i32>} : memref<40x96xf32, #tpu.memory_space<vmem>>, vector<16x96xf32>,
    %79 = vector.extract_strided_slice %74 {offsets = [16, 0], sizes = [16, 96], strides = [1, 1]} : vector<32x96xf32> to vector<16x96xf32>
    %c22 = arith.constant 22 : index
    %c0_90 = arith.constant 0 : index
    %80 = vector.load %arg18[%c22, %c0_90] : memref<40x96xf32, #tpu.memory_space<vmem>>, vector<16x96xf32>
    tpu.vector_store %arg18[%c22, %c0_90], %79 {strides = array<i32>} : memref<40x96xf32, #tpu.memory_space<vmem>>, vector<16x96xf32>,
    %c0_91 = arith.constant 0 : index
    %c0_92 = arith.constant 0 : index
    %81 = vector.load %arg18[%c0_91, %c0_92] : memref<40x96xf32, #tpu.memory_space<vmem>>, vector<36x96xf32>
    %c0_93 = arith.constant 0 : index
    %c0_94 = arith.constant 0 : index
    %c0_95 = arith.constant 0 : index
    %82 = vector.load %arg3[%c0_93, %c0_94, %c0_95] : memref<10x96x96xf32, #tpu.memory_space<vmem>>, vector<1x96x96xf32>
    %83 = vector.shape_cast %82 : vector<1x96x96xf32> to vector<96x96xf32>
    %cst_96 = arith.constant dense<0.000000e+00> : vector<36x96xf32>
    %84 = tpu.matmul %81, %83, %cst_96 {dimension_numbers = #tpu.dot_dimension_numbers<[1], [0], [0], [1], [0, 0, 1, 1], [], []>} : vector<36x96xf32>, vector<96x96xf32>, vector<36x96xf32> -> vector<36x96xf32>
    %c5_97 = arith.constant 5 : index
    %c0_98 = arith.constant 0 : index
    %c0_99 = arith.constant 0 : index
    %85 = vector.load %arg3[%c5_97, %c0_98, %c0_99] : memref<10x96x96xf32, #tpu.memory_space<vmem>>, vector<1x96x96xf32>
    %86 = vector.shape_cast %85 : vector<1x96x96xf32> to vector<96x96xf32>
    %cst_100 = arith.constant dense<0.000000e+00> : vector<36x96xf32>
    %87 = tpu.matmul %81, %86, %cst_100 {dimension_numbers = #tpu.dot_dimension_numbers<[1], [0], [0], [1], [0, 0, 1, 1], [], []>} : vector<36x96xf32>, vector<96x96xf32>, vector<36x96xf32> -> vector<36x96xf32>
    %c1_101 = arith.constant 1 : index
    %c0_102 = arith.constant 0 : index
    %88 = vector.load %arg18[%c1_101, %c0_102] : memref<40x96xf32, #tpu.memory_space<vmem>>, vector<36x96xf32>
    %c1_103 = arith.constant 1 : index
    %c0_104 = arith.constant 0 : index
    %c0_105 = arith.constant 0 : index
    %89 = vector.load %arg3[%c1_103, %c0_104, %c0_105] : memref<10x96x96xf32, #tpu.memory_space<vmem>>, vector<1x96x96xf32>
    %90 = vector.shape_cast %89 : vector<1x96x96xf32> to vector<96x96xf32>
    %cst_106 = arith.constant dense<0.000000e+00> : vector<36x96xf32>
    %91 = tpu.matmul %88, %90, %cst_106 {dimension_numbers = #tpu.dot_dimension_numbers<[1], [0], [0], [1], [0, 0, 1, 1], [], []>} : vector<36x96xf32>, vector<96x96xf32>, vector<36x96xf32> -> vector<36x96xf32>
    %c6_107 = arith.constant 6 : index
    %c0_108 = arith.constant 0 : index
    %c0_109 = arith.constant 0 : index
    %92 = vector.load %arg3[%c6_107, %c0_108, %c0_109] : memref<10x96x96xf32, #tpu.memory_space<vmem>>, vector<1x96x96xf32>
    %93 = vector.shape_cast %92 : vector<1x96x96xf32> to vector<96x96xf32>
    %cst_110 = arith.constant dense<0.000000e+00> : vector<36x96xf32>
    %94 = tpu.matmul %88, %93, %cst_110 {dimension_numbers = #tpu.dot_dimension_numbers<[1], [0], [0], [1], [0, 0, 1, 1], [], []>} : vector<36x96xf32>, vector<96x96xf32>, vector<36x96xf32> -> vector<36x96xf32>
    %95 = arith.addf %84, %91 : vector<36x96xf32>
    %96 = arith.addf %87, %94 : vector<36x96xf32>
    %c2_111 = arith.constant 2 : index
    %c0_112 = arith.constant 0 : index
    %97 = vector.load %arg18[%c2_111, %c0_112] : memref<40x96xf32, #tpu.memory_space<vmem>>, vector<36x96xf32>
    %c2_113 = arith.constant 2 : index
    %c0_114 = arith.constant 0 : index
    %c0_115 = arith.constant 0 : index
    %98 = vector.load %arg3[%c2_113, %c0_114, %c0_115] : memref<10x96x96xf32, #tpu.memory_space<vmem>>, vector<1x96x96xf32>
    %99 = vector.shape_cast %98 : vector<1x96x96xf32> to vector<96x96xf32>
    %cst_116 = arith.constant dense<0.000000e+00> : vector<36x96xf32>
    %100 = tpu.matmul %97, %99, %cst_116 {dimension_numbers = #tpu.dot_dimension_numbers<[1], [0], [0], [1], [0, 0, 1, 1], [], []>} : vector<36x96xf32>, vector<96x96xf32>, vector<36x96xf32> -> vector<36x96xf32>
    %c7_117 = arith.constant 7 : index
    %c0_118 = arith.constant 0 : index
    %c0_119 = arith.constant 0 : index
    %101 = vector.load %arg3[%c7_117, %c0_118, %c0_119] : memref<10x96x96xf32, #tpu.memory_space<vmem>>, vector<1x96x96xf32>
    %102 = vector.shape_cast %101 : vector<1x96x96xf32> to vector<96x96xf32>
    %cst_120 = arith.constant dense<0.000000e+00> : vector<36x96xf32>
    %103 = tpu.matmul %97, %102, %cst_120 {dimension_numbers = #tpu.dot_dimension_numbers<[1], [0], [0], [1], [0, 0, 1, 1], [], []>} : vector<36x96xf32>, vector<96x96xf32>, vector<36x96xf32> -> vector<36x96xf32>
    %104 = arith.addf %95, %100 : vector<36x96xf32>
    %105 = arith.addf %96, %103 : vector<36x96xf32>
    %c3_121 = arith.constant 3 : index
    %c0_122 = arith.constant 0 : index
    %106 = vector.load %arg18[%c3_121, %c0_122] : memref<40x96xf32, #tpu.memory_space<vmem>>, vector<36x96xf32>
    %c3_123 = arith.constant 3 : index
    %c0_124 = arith.constant 0 : index
    %c0_125 = arith.constant 0 : index
    %107 = vector.load %arg3[%c3_123, %c0_124, %c0_125] : memref<10x96x96xf32, #tpu.memory_space<vmem>>, vector<1x96x96xf32>
    %108 = vector.shape_cast %107 : vector<1x96x96xf32> to vector<96x96xf32>
    %cst_126 = arith.constant dense<0.000000e+00> : vector<36x96xf32>
    %109 = tpu.matmul %106, %108, %cst_126 {dimension_numbers = #tpu.dot_dimension_numbers<[1], [0], [0], [1], [0, 0, 1, 1], [], []>} : vector<36x96xf32>, vector<96x96xf32>, vector<36x96xf32> -> vector<36x96xf32>
    %c8_127 = arith.constant 8 : index
    %c0_128 = arith.constant 0 : index
    %c0_129 = arith.constant 0 : index
    %110 = vector.load %arg3[%c8_127, %c0_128, %c0_129] : memref<10x96x96xf32, #tpu.memory_space<vmem>>, vector<1x96x96xf32>
    %111 = vector.shape_cast %110 : vector<1x96x96xf32> to vector<96x96xf32>
    %cst_130 = arith.constant dense<0.000000e+00> : vector<36x96xf32>
    %112 = tpu.matmul %106, %111, %cst_130 {dimension_numbers = #tpu.dot_dimension_numbers<[1], [0], [0], [1], [0, 0, 1, 1], [], []>} : vector<36x96xf32>, vector<96x96xf32>, vector<36x96xf32> -> vector<36x96xf32>
    %113 = arith.addf %104, %109 : vector<36x96xf32>
    %114 = arith.addf %105, %112 : vector<36x96xf32>
    %c4_131 = arith.constant 4 : index
    %c0_132 = arith.constant 0 : index
    %115 = vector.load %arg18[%c4_131, %c0_132] : memref<40x96xf32, #tpu.memory_space<vmem>>, vector<36x96xf32>
    %c4_133 = arith.constant 4 : index
    %c0_134 = arith.constant 0 : index
    %c0_135 = arith.constant 0 : index
    %116 = vector.load %arg3[%c4_133, %c0_134, %c0_135] : memref<10x96x96xf32, #tpu.memory_space<vmem>>, vector<1x96x96xf32>
    %117 = vector.shape_cast %116 : vector<1x96x96xf32> to vector<96x96xf32>
    %cst_136 = arith.constant dense<0.000000e+00> : vector<36x96xf32>
    %118 = tpu.matmul %115, %117, %cst_136 {dimension_numbers = #tpu.dot_dimension_numbers<[1], [0], [0], [1], [0, 0, 1, 1], [], []>} : vector<36x96xf32>, vector<96x96xf32>, vector<36x96xf32> -> vector<36x96xf32>
    %c9_137 = arith.constant 9 : index
    %c0_138 = arith.constant 0 : index
    %c0_139 = arith.constant 0 : index
    %119 = vector.load %arg3[%c9_137, %c0_138, %c0_139] : memref<10x96x96xf32, #tpu.memory_space<vmem>>, vector<1x96x96xf32>
    %120 = vector.shape_cast %119 : vector<1x96x96xf32> to vector<96x96xf32>
    %cst_140 = arith.constant dense<0.000000e+00> : vector<36x96xf32>
    %121 = tpu.matmul %115, %120, %cst_140 {dimension_numbers = #tpu.dot_dimension_numbers<[1], [0], [0], [1], [0, 0, 1, 1], [], []>} : vector<36x96xf32>, vector<96x96xf32>, vector<36x96xf32> -> vector<36x96xf32>
    %122 = arith.addf %113, %118 : vector<36x96xf32>
    %123 = arith.addf %114, %121 : vector<36x96xf32>
    %124 = arith.maximumf %122, %123 : vector<36x96xf32>
    %c0_141 = arith.constant 0 : index
    %c0_142 = arith.constant 0 : index
    %c0_143 = arith.constant 0 : index
    %125 = vector.load %arg8[%c0_141, %c0_142, %c0_143] : memref<2x16x36xf32, #tpu.memory_space<vmem>>, vector<1x16x36xf32>
    %126 = vector.shape_cast %125 : vector<1x16x36xf32> to vector<16x36xf32>
    %cst_144 = arith.constant dense<0.000000e+00> : vector<16x96xf32>
    %127 = tpu.matmul %126, %124, %cst_144 {dimension_numbers = #tpu.dot_dimension_numbers<[1], [0], [0], [1], [0, 0, 1, 1], [], []>} : vector<16x36xf32>, vector<36x96xf32>, vector<16x96xf32> -> vector<16x96xf32>
    %c1_145 = arith.constant 1 : index
    %c0_146 = arith.constant 0 : index
    %c0_147 = arith.constant 0 : index
    %128 = vector.load %arg8[%c1_145, %c0_146, %c0_147] : memref<2x16x36xf32, #tpu.memory_space<vmem>>, vector<1x16x36xf32>
    %129 = vector.shape_cast %128 : vector<1x16x36xf32> to vector<16x36xf32>
    %cst_148 = arith.constant dense<0.000000e+00> : vector<16x96xf32>
    %130 = tpu.matmul %129, %124, %cst_148 {dimension_numbers = #tpu.dot_dimension_numbers<[1], [0], [0], [1], [0, 0, 1, 1], [], []>} : vector<16x36xf32>, vector<36x96xf32>, vector<16x96xf32> -> vector<16x96xf32>
    %131 = arith.maximumf %127, %130 : vector<16x96xf32>
    %c0_149 = arith.constant 0 : index
    %c0_150 = arith.constant 0 : index
    %132 = vector.load %arg12[%c0_149, %c0_150] : memref<1x96xf32, #tpu.memory_space<vmem>>, vector<1x96xf32>
    %133 = vector.broadcast %132 : vector<1x96xf32> to vector<16x96xf32>
    %134 = arith.addf %131, %133 : vector<16x96xf32>
    %135 = math.tanh %134 : vector<16x96xf32>
    %cst_151 = arith.constant 0.000000e+00 : f32
    %136 = vector.broadcast %cst_151 : f32 to vector<24x96xf32>
    %c0_152 = arith.constant 0 : index
    %c0_153 = arith.constant 0 : index
    %137 = vector.load %arg19[%c0_152, %c0_153] : memref<24x96xf32, #tpu.memory_space<vmem>>, vector<24x96xf32>
    tpu.vector_store %arg19[%c0_152, %c0_153], %136 {strides = array<i32>} : memref<24x96xf32, #tpu.memory_space<vmem>>, vector<24x96xf32>,
    %138 = vector.extract_strided_slice %135 {offsets = [0, 0], sizes = [8, 96], strides = [1, 1]} : vector<16x96xf32> to vector<8x96xf32>
    %c2_154 = arith.constant 2 : index
    %c0_155 = arith.constant 0 : index
    %139 = vector.load %arg19[%c2_154, %c0_155] : memref<24x96xf32, #tpu.memory_space<vmem>>, vector<8x96xf32>
    tpu.vector_store %arg19[%c2_154, %c0_155], %138 {strides = array<i32>} : memref<24x96xf32, #tpu.memory_space<vmem>>, vector<8x96xf32>,
    %140 = vector.extract_strided_slice %135 {offsets = [8, 0], sizes = [8, 96], strides = [1, 1]} : vector<16x96xf32> to vector<8x96xf32>
    %c14 = arith.constant 14 : index
    %c0_156 = arith.constant 0 : index
    %141 = vector.load %arg19[%c14, %c0_156] : memref<24x96xf32, #tpu.memory_space<vmem>>, vector<8x96xf32>
    tpu.vector_store %arg19[%c14, %c0_156], %140 {strides = array<i32>} : memref<24x96xf32, #tpu.memory_space<vmem>>, vector<8x96xf32>,
    %c0_157 = arith.constant 0 : index
    %c0_158 = arith.constant 0 : index
    %142 = vector.load %arg19[%c0_157, %c0_158] : memref<24x96xf32, #tpu.memory_space<vmem>>, vector<20x96xf32>
    %c0_159 = arith.constant 0 : index
    %c0_160 = arith.constant 0 : index
    %c0_161 = arith.constant 0 : index
    %143 = vector.load %arg4[%c0_159, %c0_160, %c0_161] : memref<10x96x64xf32, #tpu.memory_space<vmem>>, vector<1x96x64xf32>
    %144 = vector.shape_cast %143 : vector<1x96x64xf32> to vector<96x64xf32>
    %cst_162 = arith.constant dense<0.000000e+00> : vector<20x64xf32>
    %145 = tpu.matmul %142, %144, %cst_162 {dimension_numbers = #tpu.dot_dimension_numbers<[1], [0], [0], [1], [0, 0, 1, 1], [], []>} : vector<20x96xf32>, vector<96x64xf32>, vector<20x64xf32> -> vector<20x64xf32>
    %c5_163 = arith.constant 5 : index
    %c0_164 = arith.constant 0 : index
    %c0_165 = arith.constant 0 : index
    %146 = vector.load %arg4[%c5_163, %c0_164, %c0_165] : memref<10x96x64xf32, #tpu.memory_space<vmem>>, vector<1x96x64xf32>
    %147 = vector.shape_cast %146 : vector<1x96x64xf32> to vector<96x64xf32>
    %cst_166 = arith.constant dense<0.000000e+00> : vector<20x64xf32>
    %148 = tpu.matmul %142, %147, %cst_166 {dimension_numbers = #tpu.dot_dimension_numbers<[1], [0], [0], [1], [0, 0, 1, 1], [], []>} : vector<20x96xf32>, vector<96x64xf32>, vector<20x64xf32> -> vector<20x64xf32>
    %c1_167 = arith.constant 1 : index
    %c0_168 = arith.constant 0 : index
    %149 = vector.load %arg19[%c1_167, %c0_168] : memref<24x96xf32, #tpu.memory_space<vmem>>, vector<20x96xf32>
    %c1_169 = arith.constant 1 : index
    %c0_170 = arith.constant 0 : index
    %c0_171 = arith.constant 0 : index
    %150 = vector.load %arg4[%c1_169, %c0_170, %c0_171] : memref<10x96x64xf32, #tpu.memory_space<vmem>>, vector<1x96x64xf32>
    %151 = vector.shape_cast %150 : vector<1x96x64xf32> to vector<96x64xf32>
    %cst_172 = arith.constant dense<0.000000e+00> : vector<20x64xf32>
    %152 = tpu.matmul %149, %151, %cst_172 {dimension_numbers = #tpu.dot_dimension_numbers<[1], [0], [0], [1], [0, 0, 1, 1], [], []>} : vector<20x96xf32>, vector<96x64xf32>, vector<20x64xf32> -> vector<20x64xf32>
    %c6_173 = arith.constant 6 : index
    %c0_174 = arith.constant 0 : index
    %c0_175 = arith.constant 0 : index
    %153 = vector.load %arg4[%c6_173, %c0_174, %c0_175] : memref<10x96x64xf32, #tpu.memory_space<vmem>>, vector<1x96x64xf32>
    %154 = vector.shape_cast %153 : vector<1x96x64xf32> to vector<96x64xf32>
    %cst_176 = arith.constant dense<0.000000e+00> : vector<20x64xf32>
    %155 = tpu.matmul %149, %154, %cst_176 {dimension_numbers = #tpu.dot_dimension_numbers<[1], [0], [0], [1], [0, 0, 1, 1], [], []>} : vector<20x96xf32>, vector<96x64xf32>, vector<20x64xf32> -> vector<20x64xf32>
    %156 = arith.addf %145, %152 : vector<20x64xf32>
    %157 = arith.addf %148, %155 : vector<20x64xf32>
    %c2_177 = arith.constant 2 : index
    %c0_178 = arith.constant 0 : index
    %158 = vector.load %arg19[%c2_177, %c0_178] : memref<24x96xf32, #tpu.memory_space<vmem>>, vector<20x96xf32>
    %c2_179 = arith.constant 2 : index
    %c0_180 = arith.constant 0 : index
    %c0_181 = arith.constant 0 : index
    %159 = vector.load %arg4[%c2_179, %c0_180, %c0_181] : memref<10x96x64xf32, #tpu.memory_space<vmem>>, vector<1x96x64xf32>
    %160 = vector.shape_cast %159 : vector<1x96x64xf32> to vector<96x64xf32>
    %cst_182 = arith.constant dense<0.000000e+00> : vector<20x64xf32>
    %161 = tpu.matmul %158, %160, %cst_182 {dimension_numbers = #tpu.dot_dimension_numbers<[1], [0], [0], [1], [0, 0, 1, 1], [], []>} : vector<20x96xf32>, vector<96x64xf32>, vector<20x64xf32> -> vector<20x64xf32>
    %c7_183 = arith.constant 7 : index
    %c0_184 = arith.constant 0 : index
    %c0_185 = arith.constant 0 : index
    %162 = vector.load %arg4[%c7_183, %c0_184, %c0_185] : memref<10x96x64xf32, #tpu.memory_space<vmem>>, vector<1x96x64xf32>
    %163 = vector.shape_cast %162 : vector<1x96x64xf32> to vector<96x64xf32>
    %cst_186 = arith.constant dense<0.000000e+00> : vector<20x64xf32>
    %164 = tpu.matmul %158, %163, %cst_186 {dimension_numbers = #tpu.dot_dimension_numbers<[1], [0], [0], [1], [0, 0, 1, 1], [], []>} : vector<20x96xf32>, vector<96x64xf32>, vector<20x64xf32> -> vector<20x64xf32>
    %165 = arith.addf %156, %161 : vector<20x64xf32>
    %166 = arith.addf %157, %164 : vector<20x64xf32>
    %c3_187 = arith.constant 3 : index
    %c0_188 = arith.constant 0 : index
    %167 = vector.load %arg19[%c3_187, %c0_188] : memref<24x96xf32, #tpu.memory_space<vmem>>, vector<20x96xf32>
    %c3_189 = arith.constant 3 : index
    %c0_190 = arith.constant 0 : index
    %c0_191 = arith.constant 0 : index
    %168 = vector.load %arg4[%c3_189, %c0_190, %c0_191] : memref<10x96x64xf32, #tpu.memory_space<vmem>>, vector<1x96x64xf32>
    %169 = vector.shape_cast %168 : vector<1x96x64xf32> to vector<96x64xf32>
    %cst_192 = arith.constant dense<0.000000e+00> : vector<20x64xf32>
    %170 = tpu.matmul %167, %169, %cst_192 {dimension_numbers = #tpu.dot_dimension_numbers<[1], [0], [0], [1], [0, 0, 1, 1], [], []>} : vector<20x96xf32>, vector<96x64xf32>, vector<20x64xf32> -> vector<20x64xf32>
    %c8_193 = arith.constant 8 : index
    %c0_194 = arith.constant 0 : index
    %c0_195 = arith.constant 0 : index
    %171 = vector.load %arg4[%c8_193, %c0_194, %c0_195] : memref<10x96x64xf32, #tpu.memory_space<vmem>>, vector<1x96x64xf32>
    %172 = vector.shape_cast %171 : vector<1x96x64xf32> to vector<96x64xf32>
    %cst_196 = arith.constant dense<0.000000e+00> : vector<20x64xf32>
    %173 = tpu.matmul %167, %172, %cst_196 {dimension_numbers = #tpu.dot_dimension_numbers<[1], [0], [0], [1], [0, 0, 1, 1], [], []>} : vector<20x96xf32>, vector<96x64xf32>, vector<20x64xf32> -> vector<20x64xf32>
    %174 = arith.addf %165, %170 : vector<20x64xf32>
    %175 = arith.addf %166, %173 : vector<20x64xf32>
    %c4_197 = arith.constant 4 : index
    %c0_198 = arith.constant 0 : index
    %176 = vector.load %arg19[%c4_197, %c0_198] : memref<24x96xf32, #tpu.memory_space<vmem>>, vector<20x96xf32>
    %c4_199 = arith.constant 4 : index
    %c0_200 = arith.constant 0 : index
    %c0_201 = arith.constant 0 : index
    %177 = vector.load %arg4[%c4_199, %c0_200, %c0_201] : memref<10x96x64xf32, #tpu.memory_space<vmem>>, vector<1x96x64xf32>
    %178 = vector.shape_cast %177 : vector<1x96x64xf32> to vector<96x64xf32>
    %cst_202 = arith.constant dense<0.000000e+00> : vector<20x64xf32>
    %179 = tpu.matmul %176, %178, %cst_202 {dimension_numbers = #tpu.dot_dimension_numbers<[1], [0], [0], [1], [0, 0, 1, 1], [], []>} : vector<20x96xf32>, vector<96x64xf32>, vector<20x64xf32> -> vector<20x64xf32>
    %c9_203 = arith.constant 9 : index
    %c0_204 = arith.constant 0 : index
    %c0_205 = arith.constant 0 : index
    %180 = vector.load %arg4[%c9_203, %c0_204, %c0_205] : memref<10x96x64xf32, #tpu.memory_space<vmem>>, vector<1x96x64xf32>
    %181 = vector.shape_cast %180 : vector<1x96x64xf32> to vector<96x64xf32>
    %cst_206 = arith.constant dense<0.000000e+00> : vector<20x64xf32>
    %182 = tpu.matmul %176, %181, %cst_206 {dimension_numbers = #tpu.dot_dimension_numbers<[1], [0], [0], [1], [0, 0, 1, 1], [], []>} : vector<20x96xf32>, vector<96x64xf32>, vector<20x64xf32> -> vector<20x64xf32>
    %183 = arith.addf %174, %179 : vector<20x64xf32>
    %184 = arith.addf %175, %182 : vector<20x64xf32>
    %185 = arith.maximumf %183, %184 : vector<20x64xf32>
    %c0_207 = arith.constant 0 : index
    %c0_208 = arith.constant 0 : index
    %c0_209 = arith.constant 0 : index
    %186 = vector.load %arg9[%c0_207, %c0_208, %c0_209] : memref<2x8x20xf32, #tpu.memory_space<vmem>>, vector<1x8x20xf32>
    %187 = vector.shape_cast %186 : vector<1x8x20xf32> to vector<8x20xf32>
    %cst_210 = arith.constant dense<0.000000e+00> : vector<8x64xf32>
    %188 = tpu.matmul %187, %185, %cst_210 {dimension_numbers = #tpu.dot_dimension_numbers<[1], [0], [0], [1], [0, 0, 1, 1], [], []>} : vector<8x20xf32>, vector<20x64xf32>, vector<8x64xf32> -> vector<8x64xf32>
    %c1_211 = arith.constant 1 : index
    %c0_212 = arith.constant 0 : index
    %c0_213 = arith.constant 0 : index
    %189 = vector.load %arg9[%c1_211, %c0_212, %c0_213] : memref<2x8x20xf32, #tpu.memory_space<vmem>>, vector<1x8x20xf32>
    %190 = vector.shape_cast %189 : vector<1x8x20xf32> to vector<8x20xf32>
    %cst_214 = arith.constant dense<0.000000e+00> : vector<8x64xf32>
    %191 = tpu.matmul %190, %185, %cst_214 {dimension_numbers = #tpu.dot_dimension_numbers<[1], [0], [0], [1], [0, 0, 1, 1], [], []>} : vector<8x20xf32>, vector<20x64xf32>, vector<8x64xf32> -> vector<8x64xf32>
    %192 = arith.maximumf %188, %191 : vector<8x64xf32>
    %c0_215 = arith.constant 0 : index
    %c0_216 = arith.constant 0 : index
    %193 = vector.load %arg13[%c0_215, %c0_216] : memref<1x64xf32, #tpu.memory_space<vmem>>, vector<1x64xf32>
    %194 = vector.broadcast %193 : vector<1x64xf32> to vector<8x64xf32>
    %195 = arith.addf %192, %194 : vector<8x64xf32>
    %196 = math.tanh %195 : vector<8x64xf32>
    %197 = math.tanh %196 : vector<8x64xf32>
    %cst_217 = arith.constant 0.000000e+00 : f32
    %198 = vector.broadcast %cst_217 : f32 to vector<16x64xf32>
    %c0_218 = arith.constant 0 : index
    %c0_219 = arith.constant 0 : index
    %199 = vector.load %arg20[%c0_218, %c0_219] : memref<16x64xf32, #tpu.memory_space<vmem>>, vector<16x64xf32>
    tpu.vector_store %arg20[%c0_218, %c0_219], %198 {strides = array<i32>} : memref<16x64xf32, #tpu.memory_space<vmem>>, vector<16x64xf32>,
    %200 = vector.extract_strided_slice %197 {offsets = [0, 0], sizes = [4, 64], strides = [1, 1]} : vector<8x64xf32> to vector<4x64xf32>
    %c2_220 = arith.constant 2 : index
    %c0_221 = arith.constant 0 : index
    %201 = vector.load %arg20[%c2_220, %c0_221] : memref<16x64xf32, #tpu.memory_space<vmem>>, vector<4x64xf32>
    tpu.vector_store %arg20[%c2_220, %c0_221], %200 {strides = array<i32>} : memref<16x64xf32, #tpu.memory_space<vmem>>, vector<4x64xf32>,
    %202 = vector.extract_strided_slice %197 {offsets = [4, 0], sizes = [4, 64], strides = [1, 1]} : vector<8x64xf32> to vector<4x64xf32>
    %c10 = arith.constant 10 : index
    %c0_222 = arith.constant 0 : index
    %203 = vector.load %arg20[%c10, %c0_222] : memref<16x64xf32, #tpu.memory_space<vmem>>, vector<4x64xf32>
    tpu.vector_store %arg20[%c10, %c0_222], %202 {strides = array<i32>} : memref<16x64xf32, #tpu.memory_space<vmem>>, vector<4x64xf32>,
    %c0_223 = arith.constant 0 : index
    %c0_224 = arith.constant 0 : index
    %204 = vector.load %arg20[%c0_223, %c0_224] : memref<16x64xf32, #tpu.memory_space<vmem>>, vector<12x64xf32>
    %c0_225 = arith.constant 0 : index
    %c0_226 = arith.constant 0 : index
    %c0_227 = arith.constant 0 : index
    %205 = vector.load %arg5[%c0_225, %c0_226, %c0_227] : memref<10x64x20xf32, #tpu.memory_space<vmem>>, vector<1x64x20xf32>
    %206 = vector.shape_cast %205 : vector<1x64x20xf32> to vector<64x20xf32>
    %cst_228 = arith.constant dense<0.000000e+00> : vector<12x20xf32>
    %207 = tpu.matmul %204, %206, %cst_228 {dimension_numbers = #tpu.dot_dimension_numbers<[1], [0], [0], [1], [0, 0, 1, 1], [], []>} : vector<12x64xf32>, vector<64x20xf32>, vector<12x20xf32> -> vector<12x20xf32>
    %c5_229 = arith.constant 5 : index
    %c0_230 = arith.constant 0 : index
    %c0_231 = arith.constant 0 : index
    %208 = vector.load %arg5[%c5_229, %c0_230, %c0_231] : memref<10x64x20xf32, #tpu.memory_space<vmem>>, vector<1x64x20xf32>
    %209 = vector.shape_cast %208 : vector<1x64x20xf32> to vector<64x20xf32>
    %cst_232 = arith.constant dense<0.000000e+00> : vector<12x20xf32>
    %210 = tpu.matmul %204, %209, %cst_232 {dimension_numbers = #tpu.dot_dimension_numbers<[1], [0], [0], [1], [0, 0, 1, 1], [], []>} : vector<12x64xf32>, vector<64x20xf32>, vector<12x20xf32> -> vector<12x20xf32>
    %c1_233 = arith.constant 1 : index
    %c0_234 = arith.constant 0 : index
    %211 = vector.load %arg20[%c1_233, %c0_234] : memref<16x64xf32, #tpu.memory_space<vmem>>, vector<12x64xf32>
    %c1_235 = arith.constant 1 : index
    %c0_236 = arith.constant 0 : index
    %c0_237 = arith.constant 0 : index
    %212 = vector.load %arg5[%c1_235, %c0_236, %c0_237] : memref<10x64x20xf32, #tpu.memory_space<vmem>>, vector<1x64x20xf32>
    %213 = vector.shape_cast %212 : vector<1x64x20xf32> to vector<64x20xf32>
    %cst_238 = arith.constant dense<0.000000e+00> : vector<12x20xf32>
    %214 = tpu.matmul %211, %213, %cst_238 {dimension_numbers = #tpu.dot_dimension_numbers<[1], [0], [0], [1], [0, 0, 1, 1], [], []>} : vector<12x64xf32>, vector<64x20xf32>, vector<12x20xf32> -> vector<12x20xf32>
    %c6_239 = arith.constant 6 : index
    %c0_240 = arith.constant 0 : index
    %c0_241 = arith.constant 0 : index
    %215 = vector.load %arg5[%c6_239, %c0_240, %c0_241] : memref<10x64x20xf32, #tpu.memory_space<vmem>>, vector<1x64x20xf32>
    %216 = vector.shape_cast %215 : vector<1x64x20xf32> to vector<64x20xf32>
    %cst_242 = arith.constant dense<0.000000e+00> : vector<12x20xf32>
    %217 = tpu.matmul %211, %216, %cst_242 {dimension_numbers = #tpu.dot_dimension_numbers<[1], [0], [0], [1], [0, 0, 1, 1], [], []>} : vector<12x64xf32>, vector<64x20xf32>, vector<12x20xf32> -> vector<12x20xf32>
    %218 = arith.addf %207, %214 : vector<12x20xf32>
    %219 = arith.addf %210, %217 : vector<12x20xf32>
    %c2_243 = arith.constant 2 : index
    %c0_244 = arith.constant 0 : index
    %220 = vector.load %arg20[%c2_243, %c0_244] : memref<16x64xf32, #tpu.memory_space<vmem>>, vector<12x64xf32>
    %c2_245 = arith.constant 2 : index
    %c0_246 = arith.constant 0 : index
    %c0_247 = arith.constant 0 : index
    %221 = vector.load %arg5[%c2_245, %c0_246, %c0_247] : memref<10x64x20xf32, #tpu.memory_space<vmem>>, vector<1x64x20xf32>
    %222 = vector.shape_cast %221 : vector<1x64x20xf32> to vector<64x20xf32>
    %cst_248 = arith.constant dense<0.000000e+00> : vector<12x20xf32>
    %223 = tpu.matmul %220, %222, %cst_248 {dimension_numbers = #tpu.dot_dimension_numbers<[1], [0], [0], [1], [0, 0, 1, 1], [], []>} : vector<12x64xf32>, vector<64x20xf32>, vector<12x20xf32> -> vector<12x20xf32>
    %c7_249 = arith.constant 7 : index
    %c0_250 = arith.constant 0 : index
    %c0_251 = arith.constant 0 : index
    %224 = vector.load %arg5[%c7_249, %c0_250, %c0_251] : memref<10x64x20xf32, #tpu.memory_space<vmem>>, vector<1x64x20xf32>
    %225 = vector.shape_cast %224 : vector<1x64x20xf32> to vector<64x20xf32>
    %cst_252 = arith.constant dense<0.000000e+00> : vector<12x20xf32>
    %226 = tpu.matmul %220, %225, %cst_252 {dimension_numbers = #tpu.dot_dimension_numbers<[1], [0], [0], [1], [0, 0, 1, 1], [], []>} : vector<12x64xf32>, vector<64x20xf32>, vector<12x20xf32> -> vector<12x20xf32>
    %227 = arith.addf %218, %223 : vector<12x20xf32>
    %228 = arith.addf %219, %226 : vector<12x20xf32>
    %c3_253 = arith.constant 3 : index
    %c0_254 = arith.constant 0 : index
    %229 = vector.load %arg20[%c3_253, %c0_254] : memref<16x64xf32, #tpu.memory_space<vmem>>, vector<12x64xf32>
    %c3_255 = arith.constant 3 : index
    %c0_256 = arith.constant 0 : index
    %c0_257 = arith.constant 0 : index
    %230 = vector.load %arg5[%c3_255, %c0_256, %c0_257] : memref<10x64x20xf32, #tpu.memory_space<vmem>>, vector<1x64x20xf32>
    %231 = vector.shape_cast %230 : vector<1x64x20xf32> to vector<64x20xf32>
    %cst_258 = arith.constant dense<0.000000e+00> : vector<12x20xf32>
    %232 = tpu.matmul %229, %231, %cst_258 {dimension_numbers = #tpu.dot_dimension_numbers<[1], [0], [0], [1], [0, 0, 1, 1], [], []>} : vector<12x64xf32>, vector<64x20xf32>, vector<12x20xf32> -> vector<12x20xf32>
    %c8_259 = arith.constant 8 : index
    %c0_260 = arith.constant 0 : index
    %c0_261 = arith.constant 0 : index
    %233 = vector.load %arg5[%c8_259, %c0_260, %c0_261] : memref<10x64x20xf32, #tpu.memory_space<vmem>>, vector<1x64x20xf32>
    %234 = vector.shape_cast %233 : vector<1x64x20xf32> to vector<64x20xf32>
    %cst_262 = arith.constant dense<0.000000e+00> : vector<12x20xf32>
    %235 = tpu.matmul %229, %234, %cst_262 {dimension_numbers = #tpu.dot_dimension_numbers<[1], [0], [0], [1], [0, 0, 1, 1], [], []>} : vector<12x64xf32>, vector<64x20xf32>, vector<12x20xf32> -> vector<12x20xf32>
    %236 = arith.addf %227, %232 : vector<12x20xf32>
    %237 = arith.addf %228, %235 : vector<12x20xf32>
    %c4_263 = arith.constant 4 : index
    %c0_264 = arith.constant 0 : index
    %238 = vector.load %arg20[%c4_263, %c0_264] : memref<16x64xf32, #tpu.memory_space<vmem>>, vector<12x64xf32>
    %c4_265 = arith.constant 4 : index
    %c0_266 = arith.constant 0 : index
    %c0_267 = arith.constant 0 : index
    %239 = vector.load %arg5[%c4_265, %c0_266, %c0_267] : memref<10x64x20xf32, #tpu.memory_space<vmem>>, vector<1x64x20xf32>
    %240 = vector.shape_cast %239 : vector<1x64x20xf32> to vector<64x20xf32>
    %cst_268 = arith.constant dense<0.000000e+00> : vector<12x20xf32>
    %241 = tpu.matmul %238, %240, %cst_268 {dimension_numbers = #tpu.dot_dimension_numbers<[1], [0], [0], [1], [0, 0, 1, 1], [], []>} : vector<12x64xf32>, vector<64x20xf32>, vector<12x20xf32> -> vector<12x20xf32>
    %c9_269 = arith.constant 9 : index
    %c0_270 = arith.constant 0 : index
    %c0_271 = arith.constant 0 : index
    %242 = vector.load %arg5[%c9_269, %c0_270, %c0_271] : memref<10x64x20xf32, #tpu.memory_space<vmem>>, vector<1x64x20xf32>
    %243 = vector.shape_cast %242 : vector<1x64x20xf32> to vector<64x20xf32>
    %cst_272 = arith.constant dense<0.000000e+00> : vector<12x20xf32>
    %244 = tpu.matmul %238, %243, %cst_272 {dimension_numbers = #tpu.dot_dimension_numbers<[1], [0], [0], [1], [0, 0, 1, 1], [], []>} : vector<12x64xf32>, vector<64x20xf32>, vector<12x20xf32> -> vector<12x20xf32>
    %245 = arith.addf %236, %241 : vector<12x20xf32>
    %246 = arith.addf %237, %244 : vector<12x20xf32>
    %247 = arith.maximumf %245, %246 : vector<12x20xf32>
    %c0_273 = arith.constant 0 : index
    %c0_274 = arith.constant 0 : index
    %c0_275 = arith.constant 0 : index
    %248 = vector.load %arg10[%c0_273, %c0_274, %c0_275] : memref<2x4x12xf32, #tpu.memory_space<vmem>>, vector<1x4x12xf32>
    %249 = vector.shape_cast %248 : vector<1x4x12xf32> to vector<4x12xf32>
    %cst_276 = arith.constant dense<0.000000e+00> : vector<4x20xf32>
    %250 = tpu.matmul %249, %247, %cst_276 {dimension_numbers = #tpu.dot_dimension_numbers<[1], [0], [0], [1], [0, 0, 1, 1], [], []>} : vector<4x12xf32>, vector<12x20xf32>, vector<4x20xf32> -> vector<4x20xf32>
    %c1_277 = arith.constant 1 : index
    %c0_278 = arith.constant 0 : index
    %c0_279 = arith.constant 0 : index
    %251 = vector.load %arg10[%c1_277, %c0_278, %c0_279] : memref<2x4x12xf32, #tpu.memory_space<vmem>>, vector<1x4x12xf32>
    %252 = vector.shape_cast %251 : vector<1x4x12xf32> to vector<4x12xf32>
    %cst_280 = arith.constant dense<0.000000e+00> : vector<4x20xf32>
    %253 = tpu.matmul %252, %247, %cst_280 {dimension_numbers = #tpu.dot_dimension_numbers<[1], [0], [0], [1], [0, 0, 1, 1], [], []>} : vector<4x12xf32>, vector<12x20xf32>, vector<4x20xf32> -> vector<4x20xf32>
    %254 = arith.maximumf %250, %253 : vector<4x20xf32>
    %c0_281 = arith.constant 0 : index
    %c0_282 = arith.constant 0 : index
    %255 = vector.load %arg14[%c0_281, %c0_282] : memref<1x20xf32, #tpu.memory_space<vmem>>, vector<1x20xf32>
    %256 = vector.broadcast %255 : vector<1x20xf32> to vector<4x20xf32>
    %257 = arith.addf %254, %256 : vector<4x20xf32>
    %258 = math.tanh %257 : vector<4x20xf32>
    %259 = math.tanh %258 : vector<4x20xf32>
    %cst_283 = arith.constant 0.000000e+00 : f32
    %260 = vector.broadcast %cst_283 : f32 to vector<12x20xf32>
    %c0_284 = arith.constant 0 : index
    %c0_285 = arith.constant 0 : index
    %261 = vector.load %arg21[%c0_284, %c0_285] : memref<12x20xf32, #tpu.memory_space<vmem>>, vector<12x20xf32>
    tpu.vector_store %arg21[%c0_284, %c0_285], %260 {strides = array<i32>} : memref<12x20xf32, #tpu.memory_space<vmem>>, vector<12x20xf32>,
    %262 = vector.extract_strided_slice %259 {offsets = [0, 0], sizes = [2, 20], strides = [1, 1]} : vector<4x20xf32> to vector<2x20xf32>
    %c2_286 = arith.constant 2 : index
    %c0_287 = arith.constant 0 : index
    %263 = vector.load %arg21[%c2_286, %c0_287] : memref<12x20xf32, #tpu.memory_space<vmem>>, vector<2x20xf32>
    tpu.vector_store %arg21[%c2_286, %c0_287], %262 {strides = array<i32>} : memref<12x20xf32, #tpu.memory_space<vmem>>, vector<2x20xf32>,
    %264 = vector.extract_strided_slice %259 {offsets = [2, 0], sizes = [2, 20], strides = [1, 1]} : vector<4x20xf32> to vector<2x20xf32>
    %c8_288 = arith.constant 8 : index
    %c0_289 = arith.constant 0 : index
    %265 = vector.load %arg21[%c8_288, %c0_289] : memref<12x20xf32, #tpu.memory_space<vmem>>, vector<2x20xf32>
    tpu.vector_store %arg21[%c8_288, %c0_289], %264 {strides = array<i32>} : memref<12x20xf32, #tpu.memory_space<vmem>>, vector<2x20xf32>,
    %c0_290 = arith.constant 0 : index
    %c0_291 = arith.constant 0 : index
    %266 = vector.load %arg21[%c0_290, %c0_291] : memref<12x20xf32, #tpu.memory_space<vmem>>, vector<8x20xf32>
    %c0_292 = arith.constant 0 : index
    %c0_293 = arith.constant 0 : index
    %c0_294 = arith.constant 0 : index
    %267 = vector.load %arg6[%c0_292, %c0_293, %c0_294] : memref<5x20x12xf32, #tpu.memory_space<vmem>>, vector<1x20x12xf32>
    %268 = vector.shape_cast %267 : vector<1x20x12xf32> to vector<20x12xf32>
    %cst_295 = arith.constant dense<0.000000e+00> : vector<8x12xf32>
    %269 = tpu.matmul %266, %268, %cst_295 {dimension_numbers = #tpu.dot_dimension_numbers<[1], [0], [0], [1], [0, 0, 1, 1], [], []>} : vector<8x20xf32>, vector<20x12xf32>, vector<8x12xf32> -> vector<8x12xf32>
    %c1_296 = arith.constant 1 : index
    %c0_297 = arith.constant 0 : index
    %270 = vector.load %arg21[%c1_296, %c0_297] : memref<12x20xf32, #tpu.memory_space<vmem>>, vector<8x20xf32>
    %c1_298 = arith.constant 1 : index
    %c0_299 = arith.constant 0 : index
    %c0_300 = arith.constant 0 : index
    %271 = vector.load %arg6[%c1_298, %c0_299, %c0_300] : memref<5x20x12xf32, #tpu.memory_space<vmem>>, vector<1x20x12xf32>
    %272 = vector.shape_cast %271 : vector<1x20x12xf32> to vector<20x12xf32>
    %cst_301 = arith.constant dense<0.000000e+00> : vector<8x12xf32>
    %273 = tpu.matmul %270, %272, %cst_301 {dimension_numbers = #tpu.dot_dimension_numbers<[1], [0], [0], [1], [0, 0, 1, 1], [], []>} : vector<8x20xf32>, vector<20x12xf32>, vector<8x12xf32> -> vector<8x12xf32>
    %274 = arith.addf %269, %273 : vector<8x12xf32>
    %c2_302 = arith.constant 2 : index
    %c0_303 = arith.constant 0 : index
    %275 = vector.load %arg21[%c2_302, %c0_303] : memref<12x20xf32, #tpu.memory_space<vmem>>, vector<8x20xf32>
    %c2_304 = arith.constant 2 : index
    %c0_305 = arith.constant 0 : index
    %c0_306 = arith.constant 0 : index
    %276 = vector.load %arg6[%c2_304, %c0_305, %c0_306] : memref<5x20x12xf32, #tpu.memory_space<vmem>>, vector<1x20x12xf32>
    %277 = vector.shape_cast %276 : vector<1x20x12xf32> to vector<20x12xf32>
    %cst_307 = arith.constant dense<0.000000e+00> : vector<8x12xf32>
    %278 = tpu.matmul %275, %277, %cst_307 {dimension_numbers = #tpu.dot_dimension_numbers<[1], [0], [0], [1], [0, 0, 1, 1], [], []>} : vector<8x20xf32>, vector<20x12xf32>, vector<8x12xf32> -> vector<8x12xf32>
    %279 = arith.addf %274, %278 : vector<8x12xf32>
    %c3_308 = arith.constant 3 : index
    %c0_309 = arith.constant 0 : index
    %280 = vector.load %arg21[%c3_308, %c0_309] : memref<12x20xf32, #tpu.memory_space<vmem>>, vector<8x20xf32>
    %c3_310 = arith.constant 3 : index
    %c0_311 = arith.constant 0 : index
    %c0_312 = arith.constant 0 : index
    %281 = vector.load %arg6[%c3_310, %c0_311, %c0_312] : memref<5x20x12xf32, #tpu.memory_space<vmem>>, vector<1x20x12xf32>
    %282 = vector.shape_cast %281 : vector<1x20x12xf32> to vector<20x12xf32>
    %cst_313 = arith.constant dense<0.000000e+00> : vector<8x12xf32>
    %283 = tpu.matmul %280, %282, %cst_313 {dimension_numbers = #tpu.dot_dimension_numbers<[1], [0], [0], [1], [0, 0, 1, 1], [], []>} : vector<8x20xf32>, vector<20x12xf32>, vector<8x12xf32> -> vector<8x12xf32>
    %284 = arith.addf %279, %283 : vector<8x12xf32>
    %c4_314 = arith.constant 4 : index
    %c0_315 = arith.constant 0 : index
    %285 = vector.load %arg21[%c4_314, %c0_315] : memref<12x20xf32, #tpu.memory_space<vmem>>, vector<8x20xf32>
    %c4_316 = arith.constant 4 : index
    %c0_317 = arith.constant 0 : index
    %c0_318 = arith.constant 0 : index
    %286 = vector.load %arg6[%c4_316, %c0_317, %c0_318] : memref<5x20x12xf32, #tpu.memory_space<vmem>>, vector<1x20x12xf32>
    %287 = vector.shape_cast %286 : vector<1x20x12xf32> to vector<20x12xf32>
    %cst_319 = arith.constant dense<0.000000e+00> : vector<8x12xf32>
    %288 = tpu.matmul %285, %287, %cst_319 {dimension_numbers = #tpu.dot_dimension_numbers<[1], [0], [0], [1], [0, 0, 1, 1], [], []>} : vector<8x20xf32>, vector<20x12xf32>, vector<8x12xf32> -> vector<8x12xf32>
    %289 = arith.addf %284, %288 : vector<8x12xf32>
    %c0_320 = arith.constant 0 : index
    %c0_321 = arith.constant 0 : index
    %290 = vector.load %arg15[%c0_320, %c0_321] : memref<1x12xf32, #tpu.memory_space<vmem>>, vector<1x12xf32>
    %291 = vector.broadcast %290 : vector<1x12xf32> to vector<8x12xf32>
    %292 = arith.addf %289, %291 : vector<8x12xf32>
    %293 = math.tanh %292 : vector<8x12xf32>
    %294 = vector.extract_strided_slice %293 {offsets = [0, 0], sizes = [2, 12], strides = [1, 1]} : vector<8x12xf32> to vector<2x12xf32>
    %c0_322 = arith.constant 0 : index
    %c0_323 = arith.constant 0 : index
    %c0_324 = arith.constant 0 : index
    %295 = vector.load %arg16[%c0_322, %c0_323, %c0_324] : memref<2x2x12xf32, #tpu.memory_space<vmem>>, vector<1x2x12xf32>
    %296 = vector.shape_cast %295 : vector<1x2x12xf32> to vector<2x12xf32>
    %297 = vector.shape_cast %294 : vector<2x12xf32> to vector<1x2x12xf32>
    tpu.vector_store %arg16[%c0_322, %c0_323, %c0_324], %297 {strides = array<i32>} : memref<2x2x12xf32, #tpu.memory_space<vmem>>, vector<1x2x12xf32>,
    %298 = vector.extract_strided_slice %293 {offsets = [6, 0], sizes = [2, 12], strides = [1, 1]} : vector<8x12xf32> to vector<2x12xf32>
    %c1_325 = arith.constant 1 : index
    %c0_326 = arith.constant 0 : index
    %c0_327 = arith.constant 0 : index
    %299 = vector.load %arg16[%c1_325, %c0_326, %c0_327] : memref<2x2x12xf32, #tpu.memory_space<vmem>>, vector<1x2x12xf32>
    %300 = vector.shape_cast %299 : vector<1x2x12xf32> to vector<2x12xf32>
    %301 = vector.shape_cast %298 : vector<2x12xf32> to vector<1x2x12xf32>
    tpu.vector_store %arg16[%c1_325, %c0_326, %c0_327], %301 {strides = array<i32>} : memref<2x2x12xf32, #tpu.memory_space<vmem>>, vector<1x2x12xf32>,
    return
  }
  func.func @transform_0(%arg0: i32) -> (i32, i32, i32, i32) {
    %c0_i32 = arith.constant 0 : i32
    %c0_i32_0 = arith.constant 0 : i32
    %c0_i32_1 = arith.constant 0 : i32
    %c0_i32_2 = arith.constant 0 : i32
    return %arg0, %c0_i32, %c0_i32_0, %c0_i32_1 : i32, i32, i32, i32
  }
  func.func @transform_1(%arg0: i32) -> (i32, i32, i32) {
    %c0_i32 = arith.constant 0 : i32
    %c0_i32_0 = arith.constant 0 : i32
    %c0_i32_1 = arith.constant 0 : i32
    %c0_i32_2 = arith.constant 0 : i32
    return %c0_i32, %c0_i32_0, %c0_i32_1 : i32, i32, i32
  }
  func.func @transform_2(%arg0: i32) -> (i32, i32, i32) {
    %c0_i32 = arith.constant 0 : i32
    %c0_i32_0 = arith.constant 0 : i32
    %c0_i32_1 = arith.constant 0 : i32
    %c0_i32_2 = arith.constant 0 : i32
    return %c0_i32, %c0_i32_0, %c0_i32_1 : i32, i32, i32
  }
  func.func @transform_3(%arg0: i32) -> (i32, i32, i32) {
    %c0_i32 = arith.constant 0 : i32
    %c0_i32_0 = arith.constant 0 : i32
    %c0_i32_1 = arith.constant 0 : i32
    %c0_i32_2 = arith.constant 0 : i32
    return %c0_i32, %c0_i32_0, %c0_i32_1 : i32, i32, i32
  }
  func.func @transform_4(%arg0: i32) -> (i32, i32, i32) {
    %c0_i32 = arith.constant 0 : i32
    %c0_i32_0 = arith.constant 0 : i32
    %c0_i32_1 = arith.constant 0 : i32
    %c0_i32_2 = arith.constant 0 : i32
    return %c0_i32, %c0_i32_0, %c0_i32_1 : i32, i32, i32
  }
  func.func @transform_5(%arg0: i32) -> (i32, i32, i32) {
    %c0_i32 = arith.constant 0 : i32
    %c0_i32_0 = arith.constant 0 : i32
    %c0_i32_1 = arith.constant 0 : i32
    %c0_i32_2 = arith.constant 0 : i32
    return %c0_i32, %c0_i32_0, %c0_i32_1 : i32, i32, i32
  }
  func.func @transform_6(%arg0: i32) -> (i32, i32, i32) {
    %c0_i32 = arith.constant 0 : i32
    %c0_i32_0 = arith.constant 0 : i32
    %c0_i32_1 = arith.constant 0 : i32
    %c0_i32_2 = arith.constant 0 : i32
    return %c0_i32, %c0_i32_0, %c0_i32_1 : i32, i32, i32
  }
  func.func @transform_7(%arg0: i32) -> (i32, i32, i32) {
    %c0_i32 = arith.constant 0 : i32
    %c0_i32_0 = arith.constant 0 : i32
    %c0_i32_1 = arith.constant 0 : i32
    %c0_i32_2 = arith.constant 0 : i32
    return %c0_i32, %c0_i32_0, %c0_i32_1 : i32, i32, i32
  }
  func.func @transform_8(%arg0: i32) -> (i32, i32, i32) {
    %c0_i32 = arith.constant 0 : i32
    %c0_i32_0 = arith.constant 0 : i32
    %c0_i32_1 = arith.constant 0 : i32
    %c0_i32_2 = arith.constant 0 : i32
    return %c0_i32, %c0_i32_0, %c0_i32_1 : i32, i32, i32
  }
  func.func @transform_9(%arg0: i32) -> (i32, i32, i32) {
    %c0_i32 = arith.constant 0 : i32
    %c0_i32_0 = arith.constant 0 : i32
    %c0_i32_1 = arith.constant 0 : i32
    %c0_i32_2 = arith.constant 0 : i32
    return %c0_i32, %c0_i32_0, %c0_i32_1 : i32, i32, i32
  }
  func.func @transform_10(%arg0: i32) -> (i32, i32) {
    %c0_i32 = arith.constant 0 : i32
    %c0_i32_0 = arith.constant 0 : i32
    %c0_i32_1 = arith.constant 0 : i32
    return %c0_i32, %c0_i32_0 : i32, i32
  }
  func.func @transform_11(%arg0: i32) -> (i32, i32) {
    %c0_i32 = arith.constant 0 : i32
    %c0_i32_0 = arith.constant 0 : i32
    %c0_i32_1 = arith.constant 0 : i32
    return %c0_i32, %c0_i32_0 : i32, i32
  }
  func.func @transform_12(%arg0: i32) -> (i32, i32) {
    %c0_i32 = arith.constant 0 : i32
    %c0_i32_0 = arith.constant 0 : i32
    %c0_i32_1 = arith.constant 0 : i32
    return %c0_i32, %c0_i32_0 : i32, i32
  }
  func.func @transform_13(%arg0: i32) -> (i32, i32) {
    %c0_i32 = arith.constant 0 : i32
    %c0_i32_0 = arith.constant 0 : i32
    %c0_i32_1 = arith.constant 0 : i32
    return %c0_i32, %c0_i32_0 : i32, i32
  }
  func.func @transform_14(%arg0: i32) -> (i32, i32) {
    %c0_i32 = arith.constant 0 : i32
    %c0_i32_0 = arith.constant 0 : i32
    %c0_i32_1 = arith.constant 0 : i32
    return %c0_i32, %c0_i32_0 : i32, i32
  }
  func.func @transform_15(%arg0: i32) -> (i32, i32, i32) {
    %c0_i32 = arith.constant 0 : i32
    %c0_i32_0 = arith.constant 0 : i32
    %c0_i32_1 = arith.constant 0 : i32
    return %arg0, %c0_i32, %c0_i32_0 : i32, i32, i32
  }
}

</mosaic_0001>

<bundles_post_ra>
// kernel: tpu_custom_call.1
= control target key start
LH: loop header
LB: loop body
LE: loop exit
PB: predicated region body
PF: predicated region fallthrough
CT: control target
= control target key end

     0   :  { %20 = vsyncpa [#allocation8], 0  ;;  %s11575_s0 = inlined_call_operand.hbm [shape: f32[2,3,32,32], index: 0, kind: input, shape index: {}]   ;;  %s11576_s1 = inlined_call_operand.vmem [shape: f32[10,96,96], index: 1, kind: input, shape index: {}]   ;;  %s11577_s2 = inlined_call_operand.vmem [shape: f32[10,96,96], index: 2, kind: input, shape index: {}]   ;;  %s11578_s3 = inlined_call_operand.vmem [shape: f32[10,96,64], index: 3, kind: input, shape index: {}]   ;;  %s11579_s4 = inlined_call_operand.vmem [shape: f32[10,64,20], index: 4, kind: input, shape index: {}]   ;;  %s11580_s5 = inlined_call_operand.vmem [shape: f32[5,20,12], index: 5, kind: input, shape index: {}]   ;;  %s11581_s6 = inlined_call_operand.vmem [shape: f32[2,32,68], index: 6, kind: input, shape index: {}]   ;;  %s11582_s7 = inlined_call_operand.vmem [shape: f32[2,16,36], index: 7, kind: input, shape index: {}]   ;;  %s11583_s8 = inlined_call_operand.vmem [shape: f32[2,8,20], index: 8, kind: input, shape index: {}]   ;;  %s11584_s9 = inlined_call_operand.vmem [shape: f32[2,4,12], index: 9, kind: input, shape index: {}]   ;;  %s11585_s10 = inlined_call_operand.vmem [shape: f32[1,96], index: 10, kind: input, shape index: {}]   ;;  %s11586_s11 = inlined_call_operand.vmem [shape: f32[1,96], index: 11, kind: input, shape index: {}]   ;;  %s11587_s12 = inlined_call_operand.vmem [shape: f32[1,64], index: 12, kind: input, shape index: {}]   ;;  %s11588_s13 = inlined_call_operand.vmem [shape: f32[1,20], index: 13, kind: input, shape index: {}]   ;;  %s11589_s14 = inlined_call_operand.vmem [shape: f32[1,12], index: 14, kind: input, shape index: {}]   ;;  %s11590_s15 = inlined_call_operand.hbm [shape: f32[2,2,12], index: 15, kind: output, shape index: {}]  }
   0x1   :  { %21 = vsyncpa [#allocation9], 0  ;;  %s8934_s18 = smov [#allocation7]  }
   0x2   :  { %s27_s19 = sshll.u32 %s8934_s18, 4  ;;  %s28_s19 = int_to_ptr.vmem [resolvable:$true] %s27_s19 }
   0x3   :  { %s8898_s20 = scalar_lea.vmem %s28_s19, 3072  ;;  %p8903_p1 = scmp.lt.s32.totalorder %s28_s19, %s28_s19 }
   0x4   :  { %p8899_p0 = scmp.ne.s32.totalorder %s28_s19, %s8898_s20  ;;  %p8904_p2 = scmp.lt.s32.totalorder %s8898_s20, %s8898_s20 }
   0x6   :  { %p8905_p3 = por %p8904_p2, %p8903_p1 }
   0x8   :  { %p8906_p4 = pnand %p8905_p3, %p8899_p0 }
   0xa   :  { %8909 = shalt.err (!%p8906_p4)
}
   0xb   :  { %s8935_s21 = smov 128   ;;  %s8936_s22 = smov 8  }
   0xc   :  { %33 = dma.hbm_to_vmem [thread:$0]  %s11575_s0, 3072, %s28_s19, [#allocation8], %s8935_s21, %s8935_s21, %s8936_s22  }
   0xd   :  { %8930 = dma.done.wait [#allocation8], 3072  }
   0xe   :  { %8931 = vsyncadd [#allocation8], 4294964224  ;;  %vm65_vm0 = vcmask 785408   ;;  %v8937_v0 = vmov 0.0   ;;  %vm8938_vm1 = vmmov 0   ;;  %v86_v1 = vld [vmem:[#allocation7 + $0x28] sm:$0xff] }
   0xf   :  { %7288 = vmatprep.subr.mxu0 %v8937_v0  ;;  %7339 = vmatprep.subr.mxu1 %v8937_v0  ;;  %67 = vst.msk [vmem:[#allocation2 + $0x8] sm:$0xff] %vm65_vm0, %v8937_v0  ;;  %68 = vst.msk [vmem:[#allocation2 + $0x10] sm:$0xff] %vm65_vm0, %v8937_v0  ;;  %v85_v2 = vld [vmem:[#allocation7 + $0x20] sm:$0xff]  ;;  %s8939_s0 = smov 32   ;;  %v112_v3 = vld [vmem:[#allocation7 + $0x48] sm:$0xff]  ;;  %s8940_s25 = smov 64  }
  0x10   :  { %66 = vst.msk [vmem:[#allocation2] sm:$0xff] %vm65_vm0, %v8937_v0  ;;  %69 = vst.msk [vmem:[#allocation2 + $0x18] sm:$0xff] %vm65_vm0, %v8937_v0  ;;  %7312 = vmatprep.mubr.msk.f32.mxu0 %vm8938_vm1, %v8937_v0  ;;  %7363 = vmatprep.mubr.msk.f32.mxu1 %vm8938_vm1, %v8937_v0  ;;  %v111_v4 = vld [vmem:[#allocation7 + $0x40] sm:$0xff]  ;;  %v87_v5 = vld [vmem:[#allocation7 + $0x30] sm:$0xff]  ;;  %vm79_vm2 = vcmask 261120   ;;  %vm105_vm3 = vcmask 523520  }
  0x11   :  { %70 = vst.msk [vmem:[#allocation2 + $0x20] sm:$0xff] %vm65_vm0, %v8937_v0  ;;  %71 = vst.msk [vmem:[#allocation2 + $0x28] sm:$0xff] %vm65_vm0, %v8937_v0  ;;  %95 = vrot.lane.b32.xlu1 %v86_v1, %s8939_s0  ;;  %93 = vrot.lane.b32.xlu0 %v85_v2, %s8939_s0  ;;  %v5962_v6 = vld [vmem:[%s11576_s1 + $0xb8] sm:$0xff]  ;;  %v5961_v9 = vld [vmem:[%s11576_s1 + $0xb0] sm:$0xff]  ;;  %vm131_vm4 = vcmask 785920   ;;  %vm1671_vm5 = vcmask 556032  }
  0x12   :  { %72 = vst.msk [vmem:[#allocation2 + $0x30] sm:$0xff] %vm65_vm0, %v8937_v0  ;;  %73 = vst.msk [vmem:[#allocation2 + $0x38] sm:$0xff] %vm65_vm0, %v8937_v0  ;;  %v5983_v7 = vld [vmem:[%s11576_s1 + $0x298] sm:$0xff]  ;;  %7289 = vmatpush3.msra.mxu0 %v5962_v6  ;;  %v5982_v10 = vld [vmem:[%s11576_s1 + $0x290] sm:$0xff]  ;;  %vm1684_vm6 = vcmask 1043456   ;;  %vm3069_vm7 = vcmask 293888  }
  0x13   :  { %74 = vst.msk [vmem:[#allocation2 + $0x40] sm:$0xff] %vm65_vm0, %v8937_v0  ;;  %1894 = vst.msk [vmem:[#allocation3] sm:$0xff] %vm65_vm0, %v8937_v0  ;;  %v113_v8 = vld [vmem:[#allocation7 + $0x50] sm:$0xff]  ;;  %7340 = vmatpush3.msra.mxu1 %v5983_v7  ;;  %7290 = vmatprep.subr.mxu0 %v8937_v0  ;;  %v5960_v11 = vld [vmem:[%s11576_s1 + $0xa8] sm:$0xff]  ;;  %vm4267_vm8 = vcmask 162816   ;;  %vm4430_vm9 = vcmask 523264  }
  0x14   :  { %1895 = vst.msk [vmem:[#allocation3 + $0x8] sm:$0xff] %vm65_vm0, %v8937_v0  ;;  %1896 = vst.msk [vmem:[#allocation3 + $0x10] sm:$0xff] %vm65_vm0, %v8937_v0  ;;  %7341 = vmatprep.subr.mxu1 %v8937_v0  ;;  %7291 = vmatpush3.msra.mxu0 %v5961_v9  ;;  %v5981_v12 = vld [vmem:[%s11576_s1 + $0x288] sm:$0xff]  ;;  %v76_v13 = vld [vmem:[#allocation7 + $0x8] sm:$0xff]  ;;  %vm4433_vm10 = vcmask 519168   ;;  %vm4435_vm11 = vcmask 523268  }
  0x15   :  { %1897 = vst.msk [vmem:[#allocation3 + $0x18] sm:$0xff] %vm65_vm0, %v8937_v0  ;;  %1898 = vst.msk [vmem:[#allocation3 + $0x20] sm:$0xff] %vm65_vm0, %v8937_v0  ;;  %121 = vrot.lane.b32.xlu1 %v112_v3, %s8940_s25  ;;  %119 = vrot.lane.b32.xlu0 %v111_v4, %s8940_s25  ;;  %v75_v14 = vld [vmem:[#allocation7] sm:$0xff]  ;;  %v88_v15 = vld [vmem:[#allocation7 + $0x38] sm:$0xff]  ;;  %vm5331_vm12 = vcmask 97280   ;;  %vm5495_vm13 = vcmask 158720  }
  0x16   :  { %3251 = vst.msk [vmem:[#allocation4] sm:$0xff] %vm65_vm0, %v8937_v0  ;;  %3252 = vst.msk [vmem:[#allocation4 + $0x8] sm:$0xff] %vm65_vm0, %v8937_v0  ;;  %7342 = vmatpush3.msra.mxu1 %v5982_v10  ;;  %v114_v16 = vld [vmem:[#allocation7 + $0x58] sm:$0xff]  ;;  %7292 = vmatprep.subr.mxu0 %v8937_v0  ;;  %v77_v19 = vld [vmem:[#allocation7 + $0x10] sm:$0xff]  ;;  %vm5497_vm14 = vcmask 156672   ;;  %vm5499_vm15 = vcmask 158722  }
  0x17   :  { %3253 = vst.msk [vmem:[#allocation4 + $0x10] sm:$0xff] %vm65_vm0, %v8937_v0  ;;  %7343 = vmatprep.subr.mxu1 %v8937_v0  ;;  %7293 = vmatpush3.msra.mxu0 %v5960_v11  ;;  %v5959_v17 = vld [vmem:[%s11576_s1 + $0xa0] sm:$0xff]  ;;  %v5958_v20 = vld [vmem:[%s11576_s1 + $0x98] sm:$0xff]  ;;  %v146_v23 = vld [vmem:[#allocation7 + $0x80] sm:$0xff]  ;;  %s8941_s27 = smov [#allocation10]  }
  0x18   :  { %81 = vst.msk [vmem:[#allocation2 + $0xa] sm:$0xff] %vm79_vm2, %v76_v13  ;;  %80 = vst.msk [vmem:[#allocation2 + $0x2] sm:$0xff] %vm79_vm2, %v75_v14  ;;  %7344 = vmatpush3.msra.mxu1 %v5981_v12  ;;  %v5980_v18 = vld [vmem:[%s11576_s1 + $0x280] sm:$0xff]  ;;  %7294 = vmatprep.subr.mxu0 %v8937_v0  ;;  %v5979_v21 = vld [vmem:[%s11576_s1 + $0x278] sm:$0xff] }
  0x19   :  { %97 = vrot.lane.b32.xlu0 %v87_v5, %s8939_s0  ;;  %123 = vrot.lane.b32.xlu1 %v113_v8, %s8940_s25  ;;  %82 = vst.msk [vmem:[#allocation2 + $0x12] sm:$0xff] %vm79_vm2, %v77_v19  ;;  %v78_v22 = vld [vmem:[#allocation7 + $0x18] sm:$0xff]  ;;  %v171_v24 = vld [vmem:[#allocation7 + $0xa0] sm:$0xff]  ;;  %v138_v26 = vld [vmem:[#allocation7 + $0x68] sm:$0xff] }
  0x1a   :  { %7345 = vmatprep.subr.mxu1 %v8937_v0  ;;  %7295 = vmatpush3.msra.mxu0 %v5959_v17  ;;  %83 = vst.msk [vmem:[#allocation2 + $0x1a] sm:$0xff] %vm79_vm2, %v78_v22  ;;  %v137_v25 = vld [vmem:[#allocation7 + $0x60] sm:$0xff]  ;;  %v139_v27 = vld [vmem:[#allocation7 + $0x70] sm:$0xff]  ;;  %v5957_v28 = vld [vmem:[%s11576_s1 + $0x90] sm:$0xff] }
  0x1b   :  { %7346 = vmatpush3.msra.mxu1 %v5980_v18  ;;  %7296 = vmatprep.subr.mxu0 %v8937_v0  ;;  %141 = vst.msk [vmem:[#allocation2 + $0x26] sm:$0xff] %vm79_vm2, %v137_v25  ;;  %v5978_v29 = vld [vmem:[%s11576_s1 + $0x270] sm:$0xff]  ;;  %142 = vst.msk [vmem:[#allocation2 + $0x2e] sm:$0xff] %vm79_vm2, %v138_v26  ;;  %v140_v30 = vld [vmem:[#allocation7 + $0x78] sm:$0xff] }
  0x1c   :  { %7347 = vmatprep.subr.mxu1 %v8937_v0  ;;  %7297 = vmatpush3.msra.mxu0 %v5958_v20  ;;  %143 = vst.msk [vmem:[#allocation2 + $0x36] sm:$0xff] %vm79_vm2, %v139_v27  ;;  %144 = vst.msk [vmem:[#allocation2 + $0x3e] sm:$0xff] %vm79_vm2, %v140_v30  ;;  %v147_v31 = vld [vmem:[#allocation7 + $0x88] sm:$0xff]  ;;  %v5956_v33 = vld [vmem:[%s11576_s1 + $0x88] sm:$0xff] }
  0x1d   :  { %99 = vrot.lane.b32.xlu0 %v88_v15, %s8939_s0  ;;  %125 = vrot.lane.b32.xlu1 %v114_v16, %s8940_s25  ;;  %v172_v32 = vld [vmem:[#allocation7 + $0xa8] sm:$0xff]  ;;  %v5977_v34 = vld [vmem:[%s11576_s1 + $0x268] sm:$0xff]  ;;  %v5955_v35 = vld [vmem:[%s11576_s1 + $0x80] sm:$0xff]  ;;  %5494 = vst.msk [vmem:[#allocation6] sm:$0xff] %vm4267_vm8, %v8937_v0 }
  0x1e   :  { %7348 = vmatpush3.msra.mxu1 %v5979_v21  ;;  %7298 = vmatprep.subr.mxu0 %v8937_v0  ;;  %v5976_v36 = vld [vmem:[%s11576_s1 + $0x260] sm:$0xff]  ;;  %v148_v37 = vld [vmem:[#allocation7 + $0x90] sm:$0xff]  ;;  %v5953_v43 = vld [vmem:[%s11576_s1 + $0x70] sm:$0xff]  ;;  %4431 = vst.msk [vmem:[#allocation5] sm:$0xff] %vm4430_vm9, %v8937_v0 }
  0x1f   :  { %7349 = vmatprep.subr.mxu1 %v8937_v0  ;;  %7299 = vmatpush3.msra.mxu0 %v5957_v28  ;;  %v173_v38 = vld [vmem:[#allocation7 + $0xb0] sm:$0xff]  ;;  %v149_v41 = vld [vmem:[#allocation7 + $0x98] sm:$0xff]  ;;  %v5974_v44 = vld [vmem:[%s11576_s1 + $0x250] sm:$0xff]  ;;  %4432 = vst.msk [vmem:[#allocation5 + $0x8] sm:$0xff] %vm4430_vm9, %v8937_v0 }
  0x20   :  { %7350 = vmatpush3.msra.mxu1 %v5978_v29  ;;  %7300 = vmatprep.subr.mxu0 %v8937_v0  ;;  %v5954_v39 = vld [vmem:[%s11576_s1 + $0x78] sm:$0xff]  ;;  %v174_v42 = vld [vmem:[#allocation7 + $0xb8] sm:$0xff]  ;;  %v5952_v45 = vld [vmem:[%s11576_s1 + $0x68] sm:$0xff]  ;;  %5496 = vst.msk [vmem:[#allocation6 + $0x8] sm:$0xf] %vm5495_vm13, %v8937_v0 }
  0x21   :  { %154 = vrot.lane.b32.xlu0 %v146_v23, %s8939_s0  ;;  %179 = vrot.lane.b32.xlu1 %v171_v24, %s8940_s25  ;;  %v5975_v40 = vld [vmem:[%s11576_s1 + $0x258] sm:$0xff]  ;;  %v5973_v46 = vld [vmem:[%s11576_s1 + $0x248] sm:$0xff] }
  0x22   :  { %7351 = vmatprep.subr.mxu1 %v8937_v0  ;;  %7301 = vmatpush3.msra.mxu0 %v5956_v33  ;;  %v5951_v47 = vld [vmem:[%s11576_s1 + $0x60] sm:$0xff]  ;;  %v215_v58 = vld [vmem:[%s11576_s1 + $0x58] sm:$0xff]  ;;  %v214_v63 = vld [vmem:[%s11576_s1 + $0x50] sm:$0xff] }
  0x23   :  { %7352 = vmatpush3.msra.mxu1 %v5977_v34  ;;  %7302 = vmatprep.subr.mxu0 %v8937_v0  ;;  %v5972_v48 = vld [vmem:[%s11576_s1 + $0x240] sm:$0xff]  ;;  %v5950_v59 = vld [vmem:[%s11576_s1 + $0x238] sm:$0xff]  ;;  %v5949_v1 = vld [vmem:[%s11576_s1 + $0x230] sm:$0xff] }
  0x24   :  { %7353 = vmatprep.subr.mxu1 %v8937_v0  ;;  %7303 = vmatpush3.msra.mxu0 %v5955_v35  ;;  %v213_v5 = vld [vmem:[%s11576_s1 + $0x48] sm:$0xff]  ;;  %v212_v10 = vld [vmem:[%s11576_s1 + $0x40] sm:$0xff]  ;;  %v211_v15 = vld [vmem:[%s11576_s1 + $0x38] sm:$0xff] }
  0x25   :  { %156 = vrot.lane.b32.xlu0 %v147_v31, %s8939_s0  ;;  %181 = vrot.lane.b32.xlu1 %v172_v32, %s8940_s25  ;;  %v5948_v6 = vld [vmem:[%s11576_s1 + $0x228] sm:$0xff]  ;;  %v5947_v11 = vld [vmem:[%s11576_s1 + $0x220] sm:$0xff] }
  0x26   :  { %7354 = vmatpush3.msra.mxu1 %v5976_v36  ;;  %7304 = vmatprep.subr.mxu0 %v8937_v0  ;;  %v5946_v16 = vld [vmem:[%s11576_s1 + $0x218] sm:$0xff]  ;;  %v210_v18 = vld [vmem:[%s11576_s1 + $0x30] sm:$0xff]  ;;  %v209_v20 = vld [vmem:[%s11576_s1 + $0x28] sm:$0xff] }
  0x27   :  { %7355 = vmatprep.subr.mxu1 %v8937_v0  ;;  %7305 = vmatpush3.msra.mxu0 %v5954_v39  ;;  %v5945_v19 = vld [vmem:[%s11576_s1 + $0x210] sm:$0xff]  ;;  %v5944_v21 = vld [vmem:[%s11576_s1 + $0x208] sm:$0xff]  ;;  %v208_v23 = vld [vmem:[%s11576_s1 + $0x20] sm:$0xff] }
  0x28   :  { %7356 = vmatpush3.msra.mxu1 %v5975_v40  ;;  %7306 = vmatprep.subr.mxu0 %v8937_v0  ;;  %v5943_v24 = vld [vmem:[%s11576_s1 + $0x200] sm:$0xff]  ;;  %v207_v26 = vld [vmem:[%s11576_s1 + $0x18] sm:$0xff]  ;;  %v206_v28 = vld [vmem:[%s11576_s1 + $0x10] sm:$0xff] }
  0x29   :  { %158 = vrot.lane.b32.xlu0 %v148_v37, %s8939_s0  ;;  %183 = vrot.lane.b32.xlu1 %v173_v38, %s8940_s25  ;;  %v5942_v27 = vld [vmem:[%s11576_s1 + $0x1f8] sm:$0xff]  ;;  %v5941_v29 = vld [vmem:[%s11576_s1 + $0x1f0] sm:$0xff] }
  0x2a   :  { %7357 = vmatprep.subr.mxu1 %v8937_v0  ;;  %7307 = vmatpush3.msra.mxu0 %v5953_v43  ;;  %v205_v31 = vld [vmem:[%s11576_s1 + $0x8] sm:$0xff]  ;;  %v204_v33 = vld [vmem:[%s11576_s1] sm:$0xff]  ;;  %v6022_v36 = vld [vmem:[%s11576_s1 + $0x118] sm:$0xff] }
  0x2b   :  { %7358 = vmatpush3.msra.mxu1 %v5974_v44  ;;  %7308 = vmatprep.subr.mxu0 %v8937_v0  ;;  %v5940_v32 = vld [vmem:[%s11576_s1 + $0x1e8] sm:$0xff]  ;;  %v5939_v34 = vld [vmem:[%s11576_s1 + $0x1e0] sm:$0xff]  ;;  %v6043_v37 = vld [vmem:[%s11576_s1 + $0x2f8] sm:$0xff] }
  0x2c   :  { %7359 = vmatprep.subr.mxu1 %v8937_v0  ;;  %7309 = vmatpush3.msra.mxu0 %v5952_v45  ;;  %v6021_v39 = vld [vmem:[%s11576_s1 + $0x110] sm:$0xff]  ;;  %v6041_v43 = vld [vmem:[%s11576_s1 + $0x2e8] sm:$0xff]  ;;  %v6019_v45 = vld [vmem:[%s11576_s1 + $0x100] sm:$0xff] }
  0x2d   :  { %160 = vrot.lane.b32.xlu0 %v149_v41, %s8939_s0  ;;  %185 = vrot.lane.b32.xlu1 %v174_v42, %s8940_s25  ;;  %v6042_v40 = vld [vmem:[%s11576_s1 + $0x2f0] sm:$0xff]  ;;  %v6020_v42 = vld [vmem:[%s11576_s1 + $0x108] sm:$0xff] }
  0x2e   :  { %7360 = vmatpush3.msra.mxu1 %v5973_v46  ;;  %7310 = vmatprep.subr.mxu0 %v8937_v0  ;;  %v6040_v46 = vld [vmem:[%s11576_s1 + $0x2e0] sm:$0xff] }
  0x2f   :  { %7361 = vmatprep.subr.mxu1 %v8937_v0  ;;  %7311 = vmatpush3.msra.mxu0 %v5951_v47 }
  0x30   :  { %7362 = vmatpush3.msra.mxu1 %v5972_v48  ;;  %7390 = vmatprep.subr.mxu0 %v8937_v0  ;;  %v6018_v48 = vld [vmem:[%s11576_s1 + $0xf8] sm:$0xff] }
  0x31   :  { %7441 = vmatprep.subr.mxu1 %v8937_v0 }
  0x83   :  { %v96_v49 = vpop.permute.xlu1 %95  ;;  %v94_v50 = vpop.permute.xlu0 %93 }
  0x84   :  { %107 = vst.msk [vmem:[#allocation2 + $0xa] sm:$0xff] %vm105_vm3, %v96_v49  ;;  %106 = vst.msk [vmem:[#allocation2 + $0x2] sm:$0xff] %vm105_vm3, %v94_v50  ;;  %v6039_v49 = vld [vmem:[%s11576_s1 + $0x2d8] sm:$0xff] }
  0x87   :  { %v122_v51 = vpop.permute.xlu1 %121  ;;  %v120_v52 = vpop.permute.xlu0 %119 }
  0x88   :  { %133 = vst.msk [vmem:[#allocation2 + $0xa] sm:$0xff] %vm131_vm4, %v122_v51  ;;  %132 = vst.msk [vmem:[#allocation2 + $0x2] sm:$0xff] %vm131_vm4, %v120_v52  ;;  %v6017_v51 = vld [vmem:[%s11576_s1 + $0xf0] sm:$0xff] }
  0x89   :  { %v6038_v52 = vld [vmem:[%s11576_s1 + $0x2d0] sm:$0xff] }
  0x8b   :  { %v98_v53 = vpop.permute.xlu0 %97  ;;  %v124_v54 = vpop.permute.xlu1 %123 }
  0x8c   :  { %108 = vst.msk [vmem:[#allocation2 + $0x12] sm:$0xff] %vm105_vm3, %v98_v53 }
  0x8d   :  { %134 = vst.msk [vmem:[#allocation2 + $0x12] sm:$0xff] %vm131_vm4, %v124_v54  ;;  %v6016_v54 = vld [vmem:[%s11576_s1 + $0xe8] sm:$0xff] }
  0x8f   :  { %v100_v55 = vpop.permute.xlu0 %99  ;;  %v126_v56 = vpop.permute.xlu1 %125  ;;  %v229_v57 = vld [vmem:[#allocation2 + $0x1] sm:$0xff]  ;;  %v230_v62 = vld [vmem:[#allocation2 + $0x9] sm:$0xff] }
  0x90   :  { %109 = vst.msk [vmem:[#allocation2 + $0x1a] sm:$0xff] %vm105_vm3, %v100_v55  ;;  %7313 = vmatmul.mubr.msk.f32.vlgmr.msra.gmra.mxu0 %vm65_vm0, %v229_v57  ;;  %7364 = vmatmul.mubr.msk.f32.vlgmr.msra.gmra.mxu1 %vm65_vm0, %v229_v57  ;;  %v195_v35 = vld [vmem:[#allocation2] sm:$0xff]  ;;  %v196_v38 = vld [vmem:[#allocation2 + $0x8] sm:$0xff] }
  0x91   :  { %135 = vst.msk [vmem:[#allocation2 + $0x1a] sm:$0xff] %vm131_vm4, %v126_v56  ;;  %7315 = vmatprep.mubr.msk.f32.mxu0 %vm8938_vm1, %v8937_v0  ;;  %7366 = vmatprep.mubr.msk.f32.mxu1 %vm8938_vm1, %v8937_v0  ;;  %v6037_v55 = vld [vmem:[%s11576_s1 + $0x2c8] sm:$0xff]  ;;  %v6015_v56 = vld [vmem:[%s11576_s1 + $0xe0] sm:$0xff] }
  0x92   :  { %7391 = vmatpush3.msra.mxu0 %v215_v58  ;;  %7442 = vmatpush3.msra.mxu1 %v5950_v59  ;;  %v6036_v57 = vld [vmem:[%s11576_s1 + $0x2c0] sm:$0xff]  ;;  %v6014_v59 = vld [vmem:[%s11576_s1 + $0xd8] sm:$0xff] }
  0x93   :  { %v155_v60 = vpop.permute.xlu0 %154  ;;  %v180_v61 = vpop.permute.xlu1 %179  ;;  %7392 = vmatprep.subr.mxu0 %v8937_v0  ;;  %7443 = vmatprep.subr.mxu1 %v8937_v0 }
  0x94   :  { %166 = vst.msk [vmem:[#allocation2 + $0x26] sm:$0xff] %vm105_vm3, %v155_v60  ;;  %7316 = vmatmul.mubr.msk.f32.gmra.mxu0 %vm65_vm0, %v230_v62  ;;  %7367 = vmatmul.mubr.msk.f32.gmra.mxu1 %vm65_vm0, %v230_v62  ;;  %v231_v4 = vld [vmem:[#allocation2 + $0x11] sm:$0xff] }
  0x95   :  { %191 = vst.msk [vmem:[#allocation2 + $0x26] sm:$0xff] %vm131_vm4, %v180_v61  ;;  %7318 = vmatprep.mubr.msk.f32.mxu0 %vm8938_vm1, %v8937_v0  ;;  %7369 = vmatprep.mubr.msk.f32.mxu1 %vm8938_vm1, %v8937_v0  ;;  %v197_v41 = vld [vmem:[#allocation2 + $0x10] sm:$0xff]  ;;  %v6035_v60 = vld [vmem:[%s11576_s1 + $0x2b8] sm:$0xff] }
  0x96   :  { %7393 = vmatpush3.msra.mxu0 %v214_v63  ;;  %7444 = vmatpush3.msra.mxu1 %v5949_v1  ;;  %v6013_v61 = vld [vmem:[%s11576_s1 + $0xd0] sm:$0xff]  ;;  %v6012_v1 = vld [vmem:[%s11576_s1 + $0xc8] sm:$0xff] }
  0x97   :  { %v157_v2 = vpop.permute.xlu0 %156  ;;  %v182_v3 = vpop.permute.xlu1 %181  ;;  %7394 = vmatprep.subr.mxu0 %v8937_v0  ;;  %7445 = vmatprep.subr.mxu1 %v8937_v0  ;;  %v6034_v62 = vld [vmem:[%s11576_s1 + $0x2b0] sm:$0xff] }
  0x98   :  { %167 = vst.msk [vmem:[#allocation2 + $0x2e] sm:$0xff] %vm105_vm3, %v157_v2  ;;  %7319 = vmatmul.mubr.msk.f32.gmra.mxu0 %vm65_vm0, %v231_v4  ;;  %7370 = vmatmul.mubr.msk.f32.gmra.mxu1 %vm65_vm0, %v231_v4  ;;  %v232_v9 = vld [vmem:[#allocation2 + $0x19] sm:$0xff]  ;;  %v6033_v2 = vld [vmem:[%s11576_s1 + $0x2a8] sm:$0xff] }
  0x99   :  { %192 = vst.msk [vmem:[#allocation2 + $0x2e] sm:$0xff] %vm131_vm4, %v182_v3  ;;  %7321 = vmatprep.mubr.msk.f32.mxu0 %vm8938_vm1, %v8937_v0  ;;  %7372 = vmatprep.mubr.msk.f32.mxu1 %vm8938_vm1, %v8937_v0  ;;  %v198_v44 = vld [vmem:[#allocation2 + $0x18] sm:$0xff]  ;;  %v6011_v3 = vld [vmem:[%s11576_s1 + $0xc0] sm:$0xff] }
  0x9a   :  { %7395 = vmatpush3.msra.mxu0 %v213_v5  ;;  %7446 = vmatpush3.msra.mxu1 %v5948_v6  ;;  %v6032_v4 = vld [vmem:[%s11576_s1 + $0x2a0] sm:$0xff]  ;;  %v6064_v6 = vld [vmem:[%s11576_s1 + $0x178] sm:$0xff] }
  0x9b   :  { %v159_v7 = vpop.permute.xlu0 %158  ;;  %v184_v8 = vpop.permute.xlu1 %183  ;;  %7396 = vmatprep.subr.mxu0 %v8937_v0  ;;  %7447 = vmatprep.subr.mxu1 %v8937_v0  ;;  %v758_v5 = vld [vmem:[#allocation2 + $0x2] sm:$0xff] }
  0x9c   :  { %168 = vst.msk [vmem:[#allocation2 + $0x36] sm:$0xff] %vm105_vm3, %v159_v7  ;;  %7322 = vmatmul.mubr.msk.f32.gmra.mxu0 %vm65_vm0, %v232_v9  ;;  %7373 = vmatmul.mubr.msk.f32.gmra.mxu1 %vm65_vm0, %v232_v9  ;;  %v233_v14 = vld [vmem:[#allocation2 + $0x21] sm:$0xff]  ;;  %v6085_v7 = vld [vmem:[%s11576_s1 + $0x358] sm:$0xff]  ;;  %v6063_v9 = vld [vmem:[%s11576_s1 + $0x170] sm:$0xff] }
  0x9d   :  { %193 = vst.msk [vmem:[#allocation2 + $0x36] sm:$0xff] %vm131_vm4, %v184_v8  ;;  %7324 = vmatprep.mubr.msk.f32.mxu0 %vm8938_vm1, %v8937_v0  ;;  %7375 = vmatprep.mubr.msk.f32.mxu1 %vm8938_vm1, %v8937_v0  ;;  %v199_v47 = vld [vmem:[#allocation2 + $0x20] sm:$0xff]  ;;  %v759_v8 = vld [vmem:[#allocation2 + $0xa] sm:$0xff] }
  0x9e   :  { %7397 = vmatpush3.msra.mxu0 %v212_v10  ;;  %7448 = vmatpush3.msra.mxu1 %v5947_v11  ;;  %v6084_v10 = vld [vmem:[%s11576_s1 + $0x350] sm:$0xff] }
  0x9f   :  { %v161_v12 = vpop.permute.xlu0 %160  ;;  %v186_v13 = vpop.permute.xlu1 %185  ;;  %7398 = vmatprep.subr.mxu0 %v8937_v0  ;;  %7449 = vmatprep.subr.mxu1 %v8937_v0  ;;  %v760_v11 = vld [vmem:[#allocation2 + $0x12] sm:$0xff] }
  0xa0   :  { %169 = vst.msk [vmem:[#allocation2 + $0x3e] sm:$0xff] %vm105_vm3, %v161_v12  ;;  %7325 = vmatmul.mubr.msk.f32.gmra.mxu0 %vm65_vm0, %v233_v14  ;;  %7376 = vmatmul.mubr.msk.f32.gmra.mxu1 %vm65_vm0, %v233_v14  ;;  %v234_v17 = vld [vmem:[#allocation2 + $0x29] sm:$0xff]  ;;  %v761_v14 = vld [vmem:[#allocation2 + $0x1a] sm:$0xff] }
  0xa1   :  { %194 = vst.msk [vmem:[#allocation2 + $0x3e] sm:$0xff] %vm131_vm4, %v186_v13  ;;  %7327 = vmatprep.mubr.msk.f32.mxu0 %vm8938_vm1, %v8937_v0  ;;  %7378 = vmatprep.mubr.msk.f32.mxu1 %vm8938_vm1, %v8937_v0  ;;  %v200_v50 = vld [vmem:[#allocation2 + $0x28] sm:$0xff] }
  0xa2   :  { %7399 = vmatpush3.msra.mxu0 %v211_v15  ;;  %7450 = vmatpush3.msra.mxu1 %v5946_v16  ;;  %v6062_v12 = vld [vmem:[%s11576_s1 + $0x168] sm:$0xff]  ;;  %v6061_v15 = vld [vmem:[%s11576_s1 + $0x160] sm:$0xff] }
  0xa3   :  { %7400 = vmatprep.subr.mxu0 %v8937_v0  ;;  %7451 = vmatprep.subr.mxu1 %v8937_v0  ;;  %v6083_v13 = vld [vmem:[%s11576_s1 + $0x348] sm:$0xff]  ;;  %v6082_v16 = vld [vmem:[%s11576_s1 + $0x340] sm:$0xff] }
  0xa4   :  { %7328 = vmatmul.mubr.msk.f32.gmra.mxu0 %vm65_vm0, %v234_v17  ;;  %7379 = vmatmul.mubr.msk.f32.gmra.mxu1 %vm65_vm0, %v234_v17  ;;  %v235_v22 = vld [vmem:[#allocation2 + $0x31] sm:$0xff]  ;;  %v762_v17 = vld [vmem:[#allocation2 + $0x22] sm:$0xff] }
  0xa5   :  { %7330 = vmatprep.mubr.msk.f32.mxu0 %vm8938_vm1, %v8937_v0  ;;  %7381 = vmatprep.mubr.msk.f32.mxu1 %vm8938_vm1, %v8937_v0  ;;  %v201_v53 = vld [vmem:[#allocation2 + $0x30] sm:$0xff] }
  0xa6   :  { %7401 = vmatpush3.msra.mxu0 %v210_v18  ;;  %7452 = vmatpush3.msra.mxu1 %v5945_v19  ;;  %v6060_v18 = vld [vmem:[%s11576_s1 + $0x158] sm:$0xff] }
  0xa7   :  { %7402 = vmatprep.subr.mxu0 %v8937_v0  ;;  %7453 = vmatprep.subr.mxu1 %v8937_v0  ;;  %v6081_v19 = vld [vmem:[%s11576_s1 + $0x338] sm:$0xff] }
  0xa8   :  { %7331 = vmatmul.mubr.msk.f32.gmra.mxu0 %vm65_vm0, %v235_v22  ;;  %7382 = vmatmul.mubr.msk.f32.gmra.mxu1 %vm65_vm0, %v235_v22  ;;  %v236_v25 = vld [vmem:[#allocation2 + $0x39] sm:$0xff]  ;;  %v237_v30 = vld [vmem:[#allocation2 + $0x41] sm:$0xf]  ;;  %v6080_v22 = vld [vmem:[%s11576_s1 + $0x330] sm:$0xff] }
  0xa9   :  { %7403 = vmatpush3.msra.mxu0 %v209_v20  ;;  %7454 = vmatpush3.msra.mxu1 %v5944_v21  ;;  %v202_v58 = vld [vmem:[#allocation2 + $0x38] sm:$0xff]  ;;  %v203_v63 = vld [vmem:[#allocation2 + $0x40] sm:$0xf]  ;;  %v763_v20 = vld [vmem:[#allocation2 + $0x2a] sm:$0xff] }
  0xaa   :  { %7404 = vmatprep.subr.mxu0 %v8937_v0  ;;  %7455 = vmatprep.subr.mxu1 %v8937_v0  ;;  %v6059_v21 = vld [vmem:[%s11576_s1 + $0x150] sm:$0xff] }
  0xab   :  { %7333 = vmatprep.mubr.msk.f32.mxu0 %vm8938_vm1, %v8937_v0  ;;  %7384 = vmatprep.mubr.msk.f32.mxu1 %vm8938_vm1, %v8937_v0 }
  0xac   :  { %7405 = vmatpush3.msra.mxu0 %v208_v23  ;;  %7456 = vmatpush3.msra.mxu1 %v5943_v24  ;;  %v764_v23 = vld [vmem:[#allocation2 + $0x32] sm:$0xff]  ;;  %v6058_v24 = vld [vmem:[%s11576_s1 + $0x148] sm:$0xff] }
  0xad   :  { %7334 = vmatmul.mubr.msk.f32.gmra.mxu0 %vm65_vm0, %v236_v25  ;;  %7385 = vmatmul.mubr.msk.f32.gmra.mxu1 %vm65_vm0, %v236_v25  ;;  %v6079_v25 = vld [vmem:[%s11576_s1 + $0x328] sm:$0xff] }
  0xae   :  { %7406 = vmatprep.subr.mxu0 %v8937_v0  ;;  %7457 = vmatprep.subr.mxu1 %v8937_v0 }
  0xaf   :  { %7407 = vmatpush3.msra.mxu0 %v207_v26  ;;  %7458 = vmatpush3.msra.mxu1 %v5942_v27  ;;  %v6057_v26 = vld [vmem:[%s11576_s1 + $0x140] sm:$0xff] }
  0xb0   :  { %7408 = vmatprep.subr.mxu0 %v8937_v0  ;;  %7459 = vmatprep.subr.mxu1 %v8937_v0  ;;  %v6078_v27 = vld [vmem:[%s11576_s1 + $0x320] sm:$0xff] }
  0xb1   :  { %7336 = vmatprep.mubr.msk.f32.mxu0 %vm8938_vm1, %v8937_v0  ;;  %7387 = vmatprep.mubr.msk.f32.mxu1 %vm8938_vm1, %v8937_v0 }
  0xb2   :  { %7409 = vmatpush3.msra.mxu0 %v206_v28  ;;  %7460 = vmatpush3.msra.mxu1 %v5941_v29  ;;  %v765_v28 = vld [vmem:[#allocation2 + $0x3a] sm:$0xff] }
  0xb3   :  { %7337 = vmatmul.mubr.msk.f32.gmra.mxu0 %vm65_vm0, %v237_v30  ;;  %7388 = vmatmul.mubr.msk.f32.gmra.mxu1 %vm65_vm0, %v237_v30  ;;  %v6056_v29 = vld [vmem:[%s11576_s1 + $0x138] sm:$0xff] }
  0xb4   :  { %7410 = vmatprep.subr.mxu0 %v8937_v0  ;;  %7461 = vmatprep.subr.mxu1 %v8937_v0  ;;  %v6077_v30 = vld [vmem:[%s11576_s1 + $0x318] sm:$0xff] }
  0xb5   :  { %7411 = vmatpush3.msra.mxu0 %v205_v31  ;;  %7462 = vmatpush3.msra.mxu1 %v5940_v32  ;;  %v6055_v31 = vld [vmem:[%s11576_s1 + $0x130] sm:$0xff] }
  0xb6   :  { %7412 = vmatprep.subr.mxu0 %v8937_v0  ;;  %7463 = vmatprep.subr.mxu1 %v8937_v0  ;;  %v6076_v32 = vld [vmem:[%s11576_s1 + $0x310] sm:$0xff] }
  0xb7   :  { %7413 = vmatpush3.msra.mxu0 %v204_v33  ;;  %7414 = vmatprep.mubr.msk.f32.mxu0 %vm8938_vm1, %v8937_v0  ;;  %v766_v33 = vld [vmem:[#allocation2 + $0x42] sm:$0xf] }
  0xb8   :  { %7464 = vmatpush3.msra.mxu1 %v5939_v34  ;;  %7465 = vmatprep.mubr.msk.f32.mxu1 %vm8938_vm1, %v8937_v0  ;;  %v6054_v34 = vld [vmem:[%s11576_s1 + $0x128] sm:$0xff] }
  0xb9   :  { %7415 = vmatmul.mubr.msk.f32.vlgmr.msra.gmra.mxu0 %vm65_vm0, %v195_v35  ;;  %7466 = vmatmul.mubr.msk.f32.vlgmr.msra.gmra.mxu1 %vm65_vm0, %v195_v35  ;;  %v6075_v35 = vld [vmem:[%s11576_s1 + $0x308] sm:$0xff] }
  0xba   :  { %7417 = vmatprep.mubr.msk.f32.mxu0 %vm8938_vm1, %v8937_v0  ;;  %7468 = vmatprep.mubr.msk.f32.mxu1 %vm8938_vm1, %v8937_v0 }
  0xbb   :  { %7492 = vmatprep.subr.mxu0 %v8937_v0  ;;  %7543 = vmatprep.subr.mxu1 %v8937_v0 }
  0xbc   :  { %7493 = vmatpush3.msra.mxu0 %v6022_v36  ;;  %7544 = vmatpush3.msra.mxu1 %v6043_v37  ;;  %v6053_v36 = vld [vmem:[%s11576_s1 + $0x120] sm:$0xff] }
  0xbd   :  { %7418 = vmatmul.mubr.msk.f32.gmra.mxu0 %vm65_vm0, %v196_v38  ;;  %7469 = vmatmul.mubr.msk.f32.gmra.mxu1 %vm65_vm0, %v196_v38  ;;  %v6074_v37 = vld [vmem:[%s11576_s1 + $0x300] sm:$0xff] }
  0xbe   :  { %7420 = vmatprep.mubr.msk.f32.mxu0 %vm8938_vm1, %v8937_v0  ;;  %7471 = vmatprep.mubr.msk.f32.mxu1 %vm8938_vm1, %v8937_v0  ;;  %v1058_v38 = vld [vmem:[#allocation2 + $0x3] sm:$0xff] }
  0xbf   :  { %7494 = vmatprep.subr.mxu0 %v8937_v0  ;;  %7545 = vmatprep.subr.mxu1 %v8937_v0 }
  0xc0   :  { %7495 = vmatpush3.msra.mxu0 %v6021_v39  ;;  %7546 = vmatpush3.msra.mxu1 %v6042_v40  ;;  %v6106_v39 = vld [vmem:[%s11576_s1 + $0x1d8] sm:$0xff] }
  0xc1   :  { %7421 = vmatmul.mubr.msk.f32.gmra.mxu0 %vm65_vm0, %v197_v41  ;;  %7472 = vmatmul.mubr.msk.f32.gmra.mxu1 %vm65_vm0, %v197_v41  ;;  %v6127_v40 = vld [vmem:[%s11576_s1 + $0x3b8] sm:$0xff]  ;;  %v1059_v41 = vld [vmem:[#allocation2 + $0xb] sm:$0xff] }
  0xc2   :  { %7423 = vmatprep.mubr.msk.f32.mxu0 %vm8938_vm1, %v8937_v0  ;;  %7474 = vmatprep.mubr.msk.f32.mxu1 %vm8938_vm1, %v8937_v0 }
  0xc3   :  { %7496 = vmatprep.subr.mxu0 %v8937_v0  ;;  %7547 = vmatprep.subr.mxu1 %v8937_v0 }
  0xc4   :  { %7497 = vmatpush3.msra.mxu0 %v6020_v42  ;;  %7548 = vmatpush3.msra.mxu1 %v6041_v43  ;;  %v6105_v42 = vld [vmem:[%s11576_s1 + $0x1d0] sm:$0xff] }
  0xc5   :  { %7424 = vmatmul.mubr.msk.f32.gmra.mxu0 %vm65_vm0, %v198_v44  ;;  %7475 = vmatmul.mubr.msk.f32.gmra.mxu1 %vm65_vm0, %v198_v44  ;;  %v6126_v43 = vld [vmem:[%s11576_s1 + $0x3b0] sm:$0xff] }
  0xc6   :  { %7426 = vmatprep.mubr.msk.f32.mxu0 %vm8938_vm1, %v8937_v0  ;;  %7477 = vmatprep.mubr.msk.f32.mxu1 %vm8938_vm1, %v8937_v0  ;;  %v1060_v44 = vld [vmem:[#allocation2 + $0x13] sm:$0xff] }
  0xc7   :  { %7498 = vmatprep.subr.mxu0 %v8937_v0  ;;  %7549 = vmatprep.subr.mxu1 %v8937_v0 }
  0xc8   :  { %7499 = vmatpush3.msra.mxu0 %v6019_v45  ;;  %7550 = vmatpush3.msra.mxu1 %v6040_v46  ;;  %v6104_v45 = vld [vmem:[%s11576_s1 + $0x1c8] sm:$0xff] }
  0xc9   :  { %7427 = vmatmul.mubr.msk.f32.gmra.mxu0 %vm65_vm0, %v199_v47  ;;  %7478 = vmatmul.mubr.msk.f32.gmra.mxu1 %vm65_vm0, %v199_v47  ;;  %v6125_v46 = vld [vmem:[%s11576_s1 + $0x3a8] sm:$0xff]  ;;  %v1061_v47 = vld [vmem:[#allocation2 + $0x1b] sm:$0xff] }
  0xca   :  { %7429 = vmatprep.mubr.msk.f32.mxu0 %vm8938_vm1, %v8937_v0  ;;  %7480 = vmatprep.mubr.msk.f32.mxu1 %vm8938_vm1, %v8937_v0 }
  0xcb   :  { %7500 = vmatprep.subr.mxu0 %v8937_v0  ;;  %7551 = vmatprep.subr.mxu1 %v8937_v0 }
  0xcc   :  { %7501 = vmatpush3.msra.mxu0 %v6018_v48  ;;  %7552 = vmatpush3.msra.mxu1 %v6039_v49  ;;  %v6103_v48 = vld [vmem:[%s11576_s1 + $0x1c0] sm:$0xff] }
  0xcd   :  { %7430 = vmatmul.mubr.msk.f32.gmra.mxu0 %vm65_vm0, %v200_v50  ;;  %7481 = vmatmul.mubr.msk.f32.gmra.mxu1 %vm65_vm0, %v200_v50  ;;  %v6124_v49 = vld [vmem:[%s11576_s1 + $0x3a0] sm:$0xff] }
  0xce   :  { %7502 = vmatprep.subr.mxu0 %v8937_v0  ;;  %7553 = vmatprep.subr.mxu1 %v8937_v0  ;;  %v1062_v50 = vld [vmem:[#allocation2 + $0x23] sm:$0xff] }
  0xcf   :  { %7432 = vmatprep.mubr.msk.f32.mxu0 %vm8938_vm1, %v8937_v0  ;;  %7483 = vmatprep.mubr.msk.f32.mxu1 %vm8938_vm1, %v8937_v0 }
  0xd0   :  { %7503 = vmatpush3.msra.mxu0 %v6017_v51  ;;  %7554 = vmatpush3.msra.mxu1 %v6038_v52  ;;  %v6102_v51 = vld [vmem:[%s11576_s1 + $0x1b8] sm:$0xff] }
  0xd1   :  { %7433 = vmatmul.mubr.msk.f32.gmra.mxu0 %vm65_vm0, %v201_v53  ;;  %7484 = vmatmul.mubr.msk.f32.gmra.mxu1 %vm65_vm0, %v201_v53  ;;  %v6123_v52 = vld [vmem:[%s11576_s1 + $0x398] sm:$0xff]  ;;  %v1063_v53 = vld [vmem:[#allocation2 + $0x2b] sm:$0xff] }
  0xd2   :  { %7504 = vmatprep.subr.mxu0 %v8937_v0  ;;  %7555 = vmatprep.subr.mxu1 %v8937_v0 }
  0xd3   :  { %7505 = vmatpush3.msra.mxu0 %v6016_v54  ;;  %7556 = vmatpush3.msra.mxu1 %v6037_v55  ;;  %v6101_v54 = vld [vmem:[%s11576_s1 + $0x1b0] sm:$0xff] }
  0xd4   :  { %7506 = vmatprep.subr.mxu0 %v8937_v0  ;;  %7557 = vmatprep.subr.mxu1 %v8937_v0  ;;  %v6122_v55 = vld [vmem:[%s11576_s1 + $0x390] sm:$0xff] }
  0xd5   :  { %7435 = vmatprep.mubr.msk.f32.mxu0 %vm8938_vm1, %v8937_v0  ;;  %7486 = vmatprep.mubr.msk.f32.mxu1 %vm8938_vm1, %v8937_v0 }
  0xd6   :  { %7507 = vmatpush3.msra.mxu0 %v6015_v56  ;;  %7558 = vmatpush3.msra.mxu1 %v6036_v57  ;;  %v1064_v56 = vld [vmem:[#allocation2 + $0x33] sm:$0xff]  ;;  %v6100_v57 = vld [vmem:[%s11576_s1 + $0x1a8] sm:$0xff] }
  0xd7   :  { %7436 = vmatmul.mubr.msk.f32.gmra.mxu0 %vm65_vm0, %v202_v58  ;;  %7487 = vmatmul.mubr.msk.f32.gmra.mxu1 %vm65_vm0, %v202_v58  ;;  %v6121_v58 = vld [vmem:[%s11576_s1 + $0x388] sm:$0xff] }
  0xd8   :  { %7508 = vmatprep.subr.mxu0 %v8937_v0  ;;  %7559 = vmatprep.subr.mxu1 %v8937_v0 }
  0xd9   :  { %7509 = vmatpush3.msra.mxu0 %v6014_v59  ;;  %7560 = vmatpush3.msra.mxu1 %v6035_v60  ;;  %v6099_v59 = vld [vmem:[%s11576_s1 + $0x1a0] sm:$0xff] }
  0xda   :  { %7510 = vmatprep.subr.mxu0 %v8937_v0  ;;  %7561 = vmatprep.subr.mxu1 %v8937_v0  ;;  %v6120_v60 = vld [vmem:[%s11576_s1 + $0x380] sm:$0xff] }
  0xdb   :  { %7438 = vmatprep.mubr.msk.f32.mxu0 %vm8938_vm1, %v8937_v0  ;;  %7489 = vmatprep.mubr.msk.f32.mxu1 %vm8938_vm1, %v8937_v0 }
  0xdc   :  { %7511 = vmatpush3.msra.mxu0 %v6013_v61  ;;  %7562 = vmatpush3.msra.mxu1 %v6034_v62  ;;  %v1065_v61 = vld [vmem:[#allocation2 + $0x3b] sm:$0xff] }
  0xdd   :  { %7439 = vmatmul.mubr.msk.f32.gmra.mxu0 %vm65_vm0, %v203_v63  ;;  %7490 = vmatmul.mubr.msk.f32.gmra.mxu1 %vm65_vm0, %v203_v63  ;;  %v6098_v62 = vld [vmem:[%s11576_s1 + $0x198] sm:$0xff] }
  0xde   :  { %7512 = vmatprep.subr.mxu0 %v8937_v0  ;;  %7563 = vmatprep.subr.mxu1 %v8937_v0  ;;  %v6119_v63 = vld [vmem:[%s11576_s1 + $0x378] sm:$0xff] }
  0xdf   :  { %7513 = vmatpush3.msra.mxu0 %v6012_v1  ;;  %7564 = vmatpush3.msra.mxu1 %v6033_v2  ;;  %v6097_v1 = vld [vmem:[%s11576_s1 + $0x190] sm:$0xff] }
  0xe0   :  { %7514 = vmatprep.subr.mxu0 %v8937_v0  ;;  %7565 = vmatprep.subr.mxu1 %v8937_v0  ;;  %v6118_v2 = vld [vmem:[%s11576_s1 + $0x370] sm:$0xff] }
  0xe1   :  { %7515 = vmatpush3.msra.mxu0 %v6011_v3  ;;  %7516 = vmatprep.mubr.msk.f32.mxu0 %vm8938_vm1, %v8937_v0  ;;  %v1066_v3 = vld [vmem:[#allocation2 + $0x43] sm:$0xf] }
  0xe2   :  { %7566 = vmatpush3.msra.mxu1 %v6032_v4  ;;  %7567 = vmatprep.mubr.msk.f32.mxu1 %vm8938_vm1, %v8937_v0  ;;  %v6096_v4 = vld [vmem:[%s11576_s1 + $0x188] sm:$0xff] }
  0xe3   :  { %7517 = vmatmul.mubr.msk.f32.vlgmr.msra.gmra.mxu0 %vm65_vm0, %v758_v5  ;;  %7568 = vmatmul.mubr.msk.f32.vlgmr.msra.gmra.mxu1 %vm65_vm0, %v758_v5  ;;  %v6117_v5 = vld [vmem:[%s11576_s1 + $0x368] sm:$0xff] }
  0xe4   :  { %7519 = vmatprep.mubr.msk.f32.mxu0 %vm8938_vm1, %v8937_v0  ;;  %7570 = vmatprep.mubr.msk.f32.mxu1 %vm8938_vm1, %v8937_v0 }
  0xe5   :  { %7594 = vmatprep.subr.mxu0 %v8937_v0  ;;  %7645 = vmatprep.subr.mxu1 %v8937_v0 }
  0xe6   :  { %7595 = vmatpush3.msra.mxu0 %v6064_v6  ;;  %7646 = vmatpush3.msra.mxu1 %v6085_v7  ;;  %v6095_v6 = vld [vmem:[%s11576_s1 + $0x180] sm:$0xff] }
  0xe7   :  { %7520 = vmatmul.mubr.msk.f32.gmra.mxu0 %vm65_vm0, %v759_v8  ;;  %7571 = vmatmul.mubr.msk.f32.gmra.mxu1 %vm65_vm0, %v759_v8  ;;  %v6116_v7 = vld [vmem:[%s11576_s1 + $0x360] sm:$0xff] }
  0xe8   :  { %7522 = vmatprep.mubr.msk.f32.mxu0 %vm8938_vm1, %v8937_v0  ;;  %7573 = vmatprep.mubr.msk.f32.mxu1 %vm8938_vm1, %v8937_v0  ;;  %v1358_v8 = vld [vmem:[#allocation2 + $0x4] sm:$0xff] }
  0xe9   :  { %7596 = vmatprep.subr.mxu0 %v8937_v0  ;;  %7647 = vmatprep.subr.mxu1 %v8937_v0 }
  0xea   :  { %7597 = vmatpush3.msra.mxu0 %v6063_v9  ;;  %7648 = vmatpush3.msra.mxu1 %v6084_v10  ;;  %v1359_v9 = vld [vmem:[#allocation2 + $0xc] sm:$0xff]  ;;  %v1360_v10 = vld [vmem:[#allocation2 + $0x14] sm:$0xff] }
  0xeb   :  { %7523 = vmatmul.mubr.msk.f32.gmra.mxu0 %vm65_vm0, %v760_v11  ;;  %7574 = vmatmul.mubr.msk.f32.gmra.mxu1 %vm65_vm0, %v760_v11  ;;  %v1361_v11 = vld [vmem:[#allocation2 + $0x1c] sm:$0xff] }
  0xec   :  { %7525 = vmatprep.mubr.msk.f32.mxu0 %vm8938_vm1, %v8937_v0  ;;  %7576 = vmatprep.mubr.msk.f32.mxu1 %vm8938_vm1, %v8937_v0 }
  0xed   :  { %7598 = vmatprep.subr.mxu0 %v8937_v0  ;;  %7649 = vmatprep.subr.mxu1 %v8937_v0 }
  0xee   :  { %7599 = vmatpush3.msra.mxu0 %v6062_v12  ;;  %7650 = vmatpush3.msra.mxu1 %v6083_v13  ;;  %v1362_v12 = vld [vmem:[#allocation2 + $0x24] sm:$0xff]  ;;  %v1363_v13 = vld [vmem:[#allocation2 + $0x2c] sm:$0xff] }
  0xef   :  { %7526 = vmatmul.mubr.msk.f32.gmra.mxu0 %vm65_vm0, %v761_v14  ;;  %7577 = vmatmul.mubr.msk.f32.gmra.mxu1 %vm65_vm0, %v761_v14  ;;  %v1364_v14 = vld [vmem:[#allocation2 + $0x34] sm:$0xff] }
  0xf0   :  { %7528 = vmatprep.mubr.msk.f32.mxu0 %vm8938_vm1, %v8937_v0  ;;  %7579 = vmatprep.mubr.msk.f32.mxu1 %vm8938_vm1, %v8937_v0 }
  0xf1   :  { %7600 = vmatprep.subr.mxu0 %v8937_v0  ;;  %7651 = vmatprep.subr.mxu1 %v8937_v0 }
  0xf2   :  { %7601 = vmatpush3.msra.mxu0 %v6061_v15  ;;  %7652 = vmatpush3.msra.mxu1 %v6082_v16 }
  0xf3   :  { %7529 = vmatmul.mubr.msk.f32.gmra.mxu0 %vm65_vm0, %v762_v17  ;;  %7580 = vmatmul.mubr.msk.f32.gmra.mxu1 %vm65_vm0, %v762_v17  ;;  %v1365_v17 = vld [vmem:[#allocation2 + $0x3c] sm:$0xff] }
  0xf4   :  { %7531 = vmatprep.mubr.msk.f32.mxu0 %vm8938_vm1, %v8937_v0  ;;  %7582 = vmatprep.mubr.msk.f32.mxu1 %vm8938_vm1, %v8937_v0 }
  0xf5   :  { %7602 = vmatprep.subr.mxu0 %v8937_v0  ;;  %7653 = vmatprep.subr.mxu1 %v8937_v0 }
  0xf6   :  { %7603 = vmatpush3.msra.mxu0 %v6060_v18  ;;  %7654 = vmatpush3.msra.mxu1 %v6081_v19 }
  0xf7   :  { %7532 = vmatmul.mubr.msk.f32.gmra.mxu0 %vm65_vm0, %v763_v20  ;;  %7583 = vmatmul.mubr.msk.f32.gmra.mxu1 %vm65_vm0, %v763_v20 }
  0xf8   :  { %7604 = vmatprep.subr.mxu0 %v8937_v0  ;;  %7655 = vmatprep.subr.mxu1 %v8937_v0 }
  0xf9   :  { %7534 = vmatprep.mubr.msk.f32.mxu0 %vm8938_vm1, %v8937_v0  ;;  %7585 = vmatprep.mubr.msk.f32.mxu1 %vm8938_vm1, %v8937_v0 }
  0xfa   :  { %7605 = vmatpush3.msra.mxu0 %v6059_v21  ;;  %7656 = vmatpush3.msra.mxu1 %v6080_v22  ;;  %v1366_v22 = vld [vmem:[#allocation2 + $0x44] sm:$0xf] }
  0xfb   :  { %7535 = vmatmul.mubr.msk.f32.gmra.mxu0 %vm65_vm0, %v764_v23  ;;  %7586 = vmatmul.mubr.msk.f32.gmra.mxu1 %vm65_vm0, %v764_v23 }
  0xfc   :  { %7606 = vmatprep.subr.mxu0 %v8937_v0  ;;  %7657 = vmatprep.subr.mxu1 %v8937_v0 }
  0xfd   :  { %7607 = vmatpush3.msra.mxu0 %v6058_v24  ;;  %7658 = vmatpush3.msra.mxu1 %v6079_v25 }
  0xfe   :  { %7608 = vmatprep.subr.mxu0 %v8937_v0  ;;  %7659 = vmatprep.subr.mxu1 %v8937_v0 }
  0xff   :  { %7537 = vmatprep.mubr.msk.f32.mxu0 %vm8938_vm1, %v8937_v0  ;;  %7588 = vmatprep.mubr.msk.f32.mxu1 %vm8938_vm1, %v8937_v0 }
 0x100   :  { %7609 = vmatpush3.msra.mxu0 %v6057_v26  ;;  %7660 = vmatpush3.msra.mxu1 %v6078_v27 }
 0x101   :  { %7538 = vmatmul.mubr.msk.f32.gmra.mxu0 %vm65_vm0, %v765_v28  ;;  %7589 = vmatmul.mubr.msk.f32.gmra.mxu1 %vm65_vm0, %v765_v28 }
 0x102   :  { %7610 = vmatprep.subr.mxu0 %v8937_v0  ;;  %7661 = vmatprep.subr.mxu1 %v8937_v0 }
 0x103   :  { %7611 = vmatpush3.msra.mxu0 %v6056_v29  ;;  %7662 = vmatpush3.msra.mxu1 %v6077_v30 }
 0x104   :  { %7612 = vmatprep.subr.mxu0 %v8937_v0  ;;  %7663 = vmatprep.subr.mxu1 %v8937_v0 }
 0x105   :  { %7540 = vmatprep.mubr.msk.f32.mxu0 %vm8938_vm1, %v8937_v0  ;;  %7591 = vmatprep.mubr.msk.f32.mxu1 %vm8938_vm1, %v8937_v0 }
 0x106   :  { %7613 = vmatpush3.msra.mxu0 %v6055_v31  ;;  %7664 = vmatpush3.msra.mxu1 %v6076_v32 }
 0x107   :  { %7541 = vmatmul.mubr.msk.f32.gmra.mxu0 %vm65_vm0, %v766_v33  ;;  %7592 = vmatmul.mubr.msk.f32.gmra.mxu1 %vm65_vm0, %v766_v33 }
 0x108   :  { %7614 = vmatprep.subr.mxu0 %v8937_v0  ;;  %7665 = vmatprep.subr.mxu1 %v8937_v0 }
 0x109   :  { %7615 = vmatpush3.msra.mxu0 %v6054_v34  ;;  %7666 = vmatpush3.msra.mxu1 %v6075_v35 }
 0x10a   :  { %7616 = vmatprep.subr.mxu0 %v8937_v0  ;;  %7667 = vmatprep.subr.mxu1 %v8937_v0 }
 0x10b   :  { %7617 = vmatpush3.msra.mxu0 %v6053_v36  ;;  %7618 = vmatprep.mubr.msk.f32.mxu0 %vm8938_vm1, %v8937_v0 }
 0x10c   :  { %7668 = vmatpush3.msra.mxu1 %v6074_v37  ;;  %7669 = vmatprep.mubr.msk.f32.mxu1 %vm8938_vm1, %v8937_v0 }
 0x10d   :  { %7619 = vmatmul.mubr.msk.f32.vlgmr.msra.gmra.mxu0 %vm65_vm0, %v1058_v38  ;;  %7670 = vmatmul.mubr.msk.f32.vlgmr.msra.gmra.mxu1 %vm65_vm0, %v1058_v38 }
 0x10e   :  { %7621 = vmatprep.mubr.msk.f32.mxu0 %vm8938_vm1, %v8937_v0  ;;  %7672 = vmatprep.mubr.msk.f32.mxu1 %vm8938_vm1, %v8937_v0 }
 0x10f   :  { %7696 = vmatprep.subr.mxu0 %v8937_v0  ;;  %7747 = vmatprep.subr.mxu1 %v8937_v0 }
 0x110   :  { %7697 = vmatpush3.msra.mxu0 %v6106_v39  ;;  %7748 = vmatpush3.msra.mxu1 %v6127_v40 }
 0x111   :  { %7622 = vmatmul.mubr.msk.f32.gmra.mxu0 %vm65_vm0, %v1059_v41  ;;  %7673 = vmatmul.mubr.msk.f32.gmra.mxu1 %vm65_vm0, %v1059_v41 }
 0x112   :  { %7624 = vmatprep.mubr.msk.f32.mxu0 %vm8938_vm1, %v8937_v0  ;;  %7675 = vmatprep.mubr.msk.f32.mxu1 %vm8938_vm1, %v8937_v0 }
 0x113   :  { %7698 = vmatprep.subr.mxu0 %v8937_v0  ;;  %7749 = vmatprep.subr.mxu1 %v8937_v0 }
 0x114   :  { %7699 = vmatpush3.msra.mxu0 %v6105_v42  ;;  %7750 = vmatpush3.msra.mxu1 %v6126_v43 }
 0x115   :  { %7625 = vmatmul.mubr.msk.f32.gmra.mxu0 %vm65_vm0, %v1060_v44  ;;  %7676 = vmatmul.mubr.msk.f32.gmra.mxu1 %vm65_vm0, %v1060_v44 }
 0x116   :  { %7627 = vmatprep.mubr.msk.f32.mxu0 %vm8938_vm1, %v8937_v0  ;;  %7678 = vmatprep.mubr.msk.f32.mxu1 %vm8938_vm1, %v8937_v0 }
 0x117   :  { %7700 = vmatprep.subr.mxu0 %v8937_v0  ;;  %7751 = vmatprep.subr.mxu1 %v8937_v0 }
 0x118   :  { %7701 = vmatpush3.msra.mxu0 %v6104_v45  ;;  %7752 = vmatpush3.msra.mxu1 %v6125_v46 }
 0x119   :  { %7628 = vmatmul.mubr.msk.f32.gmra.mxu0 %vm65_vm0, %v1061_v47  ;;  %7679 = vmatmul.mubr.msk.f32.gmra.mxu1 %vm65_vm0, %v1061_v47 }
 0x11a   :  { %7630 = vmatprep.mubr.msk.f32.mxu0 %vm8938_vm1, %v8937_v0  ;;  %7681 = vmatprep.mubr.msk.f32.mxu1 %vm8938_vm1, %v8937_v0 }
 0x11b   :  { %7702 = vmatprep.subr.mxu0 %v8937_v0  ;;  %7753 = vmatprep.subr.mxu1 %v8937_v0 }
 0x11c   :  { %7703 = vmatpush3.msra.mxu0 %v6103_v48  ;;  %7754 = vmatpush3.msra.mxu1 %v6124_v49 }
 0x11d   :  { %7631 = vmatmul.mubr.msk.f32.gmra.mxu0 %vm65_vm0, %v1062_v50  ;;  %7682 = vmatmul.mubr.msk.f32.gmra.mxu1 %vm65_vm0, %v1062_v50 }
 0x11e   :  { %7633 = vmatprep.mubr.msk.f32.mxu0 %vm8938_vm1, %v8937_v0  ;;  %7684 = vmatprep.mubr.msk.f32.mxu1 %vm8938_vm1, %v8937_v0 }
 0x11f   :  { %7704 = vmatprep.subr.mxu0 %v8937_v0  ;;  %7755 = vmatprep.subr.mxu1 %v8937_v0 }
 0x120   :  { %7705 = vmatpush3.msra.mxu0 %v6102_v51  ;;  %7756 = vmatpush3.msra.mxu1 %v6123_v52 }
 0x121   :  { %7634 = vmatmul.mubr.msk.f32.gmra.mxu0 %vm65_vm0, %v1063_v53  ;;  %7685 = vmatmul.mubr.msk.f32.gmra.mxu1 %vm65_vm0, %v1063_v53 }
 0x122   :  { %7706 = vmatprep.subr.mxu0 %v8937_v0  ;;  %7757 = vmatprep.subr.mxu1 %v8937_v0 }
 0x123   :  { %7636 = vmatprep.mubr.msk.f32.mxu0 %vm8938_vm1, %v8937_v0  ;;  %7687 = vmatprep.mubr.msk.f32.mxu1 %vm8938_vm1, %v8937_v0 }
 0x124   :  { %7707 = vmatpush3.msra.mxu0 %v6101_v54  ;;  %7758 = vmatpush3.msra.mxu1 %v6122_v55 }
 0x125   :  { %7637 = vmatmul.mubr.msk.f32.gmra.mxu0 %vm65_vm0, %v1064_v56  ;;  %7688 = vmatmul.mubr.msk.f32.gmra.mxu1 %vm65_vm0, %v1064_v56 }
 0x126   :  { %7708 = vmatprep.subr.mxu0 %v8937_v0  ;;  %7759 = vmatprep.subr.mxu1 %v8937_v0 }
 0x127   :  { %7709 = vmatpush3.msra.mxu0 %v6100_v57  ;;  %7760 = vmatpush3.msra.mxu1 %v6121_v58 }
 0x128   :  { %7710 = vmatprep.subr.mxu0 %v8937_v0  ;;  %7761 = vmatprep.subr.mxu1 %v8937_v0 }
 0x129   :  { %7639 = vmatprep.mubr.msk.f32.mxu0 %vm8938_vm1, %v8937_v0  ;;  %7690 = vmatprep.mubr.msk.f32.mxu1 %vm8938_vm1, %v8937_v0 }
 0x12a   :  { %7711 = vmatpush3.msra.mxu0 %v6099_v59  ;;  %7762 = vmatpush3.msra.mxu1 %v6120_v60 }
 0x12b   :  { %7640 = vmatmul.mubr.msk.f32.gmra.mxu0 %vm65_vm0, %v1065_v61  ;;  %7691 = vmatmul.mubr.msk.f32.gmra.mxu1 %vm65_vm0, %v1065_v61 }
 0x12c   :  { %7712 = vmatprep.subr.mxu0 %v8937_v0  ;;  %7763 = vmatprep.subr.mxu1 %v8937_v0 }
 0x12d   :  { %7713 = vmatpush3.msra.mxu0 %v6098_v62  ;;  %7764 = vmatpush3.msra.mxu1 %v6119_v63 }
 0x12e   :  { %7714 = vmatprep.subr.mxu0 %v8937_v0  ;;  %7765 = vmatprep.subr.mxu1 %v8937_v0 }
 0x12f   :  { %7642 = vmatprep.mubr.msk.f32.mxu0 %vm8938_vm1, %v8937_v0  ;;  %7693 = vmatprep.mubr.msk.f32.mxu1 %vm8938_vm1, %v8937_v0 }
 0x130   :  { %7715 = vmatpush3.msra.mxu0 %v6097_v1  ;;  %7766 = vmatpush3.msra.mxu1 %v6118_v2 }
 0x131   :  { %7643 = vmatmul.mubr.msk.f32.gmra.mxu0 %vm65_vm0, %v1066_v3  ;;  %7694 = vmatmul.mubr.msk.f32.gmra.mxu1 %vm65_vm0, %v1066_v3 }
 0x132   :  { %7716 = vmatprep.subr.mxu0 %v8937_v0  ;;  %7767 = vmatprep.subr.mxu1 %v8937_v0 }
 0x133   :  { %7717 = vmatpush3.msra.mxu0 %v6096_v4  ;;  %7768 = vmatpush3.msra.mxu1 %v6117_v5 }
 0x134   :  { %7718 = vmatprep.subr.mxu0 %v8937_v0  ;;  %7769 = vmatprep.subr.mxu1 %v8937_v0 }
 0x135   :  { %7719 = vmatpush3.msra.mxu0 %v6095_v6  ;;  %7720 = vmatprep.mubr.msk.f32.mxu0 %vm8938_vm1, %v8937_v0 }
 0x136   :  { %7770 = vmatpush3.msra.mxu1 %v6116_v7  ;;  %7771 = vmatprep.mubr.msk.f32.mxu1 %vm8938_vm1, %v8937_v0 }
 0x137   :  { %7721 = vmatmul.mubr.msk.f32.vlgmr.msra.gmra.mxu0 %vm65_vm0, %v1358_v8  ;;  %7772 = vmatmul.mubr.msk.f32.vlgmr.msra.gmra.mxu1 %vm65_vm0, %v1358_v8 }
 0x138   :  { %7723 = vmatprep.mubr.msk.f32.mxu0 %vm8938_vm1, %v8937_v0  ;;  %7774 = vmatprep.mubr.msk.f32.mxu1 %vm8938_vm1, %v8937_v0 }
 0x13b   :  { %7724 = vmatmul.mubr.msk.f32.gmra.mxu0 %vm65_vm0, %v1359_v9  ;;  %7775 = vmatmul.mubr.msk.f32.gmra.mxu1 %vm65_vm0, %v1359_v9 }
 0x13c   :  { %7726 = vmatprep.mubr.msk.f32.mxu0 %vm8938_vm1, %v8937_v0  ;;  %7777 = vmatprep.mubr.msk.f32.mxu1 %vm8938_vm1, %v8937_v0 }
 0x13f   :  { %7727 = vmatmul.mubr.msk.f32.gmra.mxu0 %vm65_vm0, %v1360_v10  ;;  %7778 = vmatmul.mubr.msk.f32.gmra.mxu1 %vm65_vm0, %v1360_v10 }
 0x140   :  { %7729 = vmatprep.mubr.msk.f32.mxu0 %vm8938_vm1, %v8937_v0  ;;  %7780 = vmatprep.mubr.msk.f32.mxu1 %vm8938_vm1, %v8937_v0 }
 0x143   :  { %7730 = vmatmul.mubr.msk.f32.gmra.mxu0 %vm65_vm0, %v1361_v11  ;;  %7781 = vmatmul.mubr.msk.f32.gmra.mxu1 %vm65_vm0, %v1361_v11 }
 0x144   :  { %7732 = vmatprep.mubr.msk.f32.mxu0 %vm8938_vm1, %v8937_v0  ;;  %7783 = vmatprep.mubr.msk.f32.mxu1 %vm8938_vm1, %v8937_v0 }
 0x147   :  { %7733 = vmatmul.mubr.msk.f32.gmra.mxu0 %vm65_vm0, %v1362_v12  ;;  %7784 = vmatmul.mubr.msk.f32.gmra.mxu1 %vm65_vm0, %v1362_v12 }
 0x148   :  { %7735 = vmatprep.mubr.msk.f32.mxu0 %vm8938_vm1, %v8937_v0  ;;  %7786 = vmatprep.mubr.msk.f32.mxu1 %vm8938_vm1, %v8937_v0 }
 0x14b   :  { %7736 = vmatmul.mubr.msk.f32.gmra.mxu0 %vm65_vm0, %v1363_v13  ;;  %7787 = vmatmul.mubr.msk.f32.gmra.mxu1 %vm65_vm0, %v1363_v13 }
 0x14c   :  { %7738 = vmatprep.mubr.msk.f32.mxu0 %vm8938_vm1, %v8937_v0  ;;  %7789 = vmatprep.mubr.msk.f32.mxu1 %vm8938_vm1, %v8937_v0 }
 0x14f   :  { %7739 = vmatmul.mubr.msk.f32.gmra.mxu0 %vm65_vm0, %v1364_v14  ;;  %7790 = vmatmul.mubr.msk.f32.gmra.mxu1 %vm65_vm0, %v1364_v14 }
 0x150   :  { %7741 = vmatprep.mubr.msk.f32.mxu0 %vm8938_vm1, %v8937_v0  ;;  %7792 = vmatprep.mubr.msk.f32.mxu1 %vm8938_vm1, %v8937_v0  ;;  %v344_v15 = vpop.f32.mrf.mxu0  ;;  %v467_v16 = vpop.f32.mrf.mxu1 }
 0x152   :  { %v7314_v18 = vpop.f32.mrf.mxu0  ;;  %v7365_v19 = vpop.f32.mrf.mxu1 }
 0x153   :  { %7742 = vmatmul.mubr.msk.f32.gmra.mxu0 %vm65_vm0, %v1365_v17  ;;  %7793 = vmatmul.mubr.msk.f32.gmra.mxu1 %vm65_vm0, %v1365_v17 }
 0x154   :  { %7744 = vmatprep.mubr.msk.f32.mxu0 %vm8938_vm1, %v8937_v0  ;;  %7795 = vmatprep.mubr.msk.f32.mxu1 %vm8938_vm1, %v8937_v0  ;;  %v349_v20 = vpop.f32.mrf.mxu0  ;;  %v472_v21 = vpop.f32.mrf.mxu1 }
 0x156   :  { %v7317_v23 = vpop.f32.mrf.mxu0  ;;  %v7368_v24 = vpop.f32.mrf.mxu1 }
 0x157   :  { %7745 = vmatmul.mubr.msk.f32.gmra.mxu0 %vm65_vm0, %v1366_v22  ;;  %7796 = vmatmul.mubr.msk.f32.gmra.mxu1 %vm65_vm0, %v1366_v22 }
 0x158   :  { %v354_v25 = vpop.f32.mrf.mxu0  ;;  %v477_v26 = vpop.f32.mrf.mxu1 }
 0x15a   :  { %v7320_v27 = vpop.f32.mrf.mxu0  ;;  %v7371_v28 = vpop.f32.mrf.mxu1 }
 0x15c   :  { %v359_v29 = vpop.f32.mrf.mxu0  ;;  %v482_v30 = vpop.f32.mrf.mxu1 }
 0x15e   :  { %v7323_v31 = vpop.f32.mrf.mxu0  ;;  %v7374_v32 = vpop.f32.mrf.mxu1 }
 0x160   :  { %v364_v33 = vpop.f32.mrf.mxu0  ;;  %v487_v34 = vpop.f32.mrf.mxu1 }
 0x162   :  { %v7326_v35 = vpop.f32.mrf.mxu0  ;;  %v7377_v36 = vpop.f32.mrf.mxu1 }
 0x164   :  { %v369_v37 = vpop.f32.mrf.mxu0  ;;  %v492_v38 = vpop.f32.mrf.mxu1 }
 0x166   :  { %v7329_v39 = vpop.f32.mrf.mxu0  ;;  %v7380_v40 = vpop.f32.mrf.mxu1 }
 0x168   :  { %v374_v41 = vpop.f32.mrf.mxu0  ;;  %v497_v42 = vpop.f32.mrf.mxu1 }
 0x16a   :  { %v7332_v43 = vpop.f32.mrf.mxu0  ;;  %v7383_v44 = vpop.f32.mrf.mxu1 }
 0x16d   :  { %v379_v45 = vpop.f32.mrf.mxu0  ;;  %v502_v46 = vpop.f32.mrf.mxu1 }
 0x16f   :  { %v7335_v47 = vpop.f32.mrf.mxu0  ;;  %v7386_v48 = vpop.f32.mrf.mxu1 }
 0x173   :  { %v384_v49 = vpop.f32.mrf.mxu0  ;;  %v507_v50 = vpop.f32.mrf.mxu1 }
 0x175   :  { %v7338_v51 = vpop.f32.mrf.mxu0  ;;  %v7389_v52 = vpop.f32.mrf.mxu1 }
 0x179   :  { %v604_v53 = vpop.f32.mrf.mxu0  ;;  %v714_v54 = vpop.f32.mrf.mxu1 }
 0x17a   :  { %v605_v55 = vadd.f32 %v604_v53, %v344_v15  ;;  %v715_v56 = vadd.f32 %v714_v54, %v467_v16 }
 0x17b   :  { %v7416_v57 = vpop.f32.mrf.mxu0  ;;  %v7467_v58 = vpop.f32.mrf.mxu1 }
 0x17d   :  { %v609_v59 = vpop.f32.mrf.mxu0  ;;  %v719_v60 = vpop.f32.mrf.mxu1 }
 0x17e   :  { %v610_v61 = vadd.f32 %v609_v59, %v349_v20  ;;  %v720_v62 = vadd.f32 %v719_v60, %v472_v21 }
 0x17f   :  { %v7419_v63 = vpop.f32.mrf.mxu0  ;;  %v7470_v1 = vpop.f32.mrf.mxu1 }
 0x181   :  { %v614_v2 = vpop.f32.mrf.mxu0  ;;  %v724_v3 = vpop.f32.mrf.mxu1 }
 0x182   :  { %v615_v4 = vadd.f32 %v614_v2, %v354_v25  ;;  %v725_v5 = vadd.f32 %v724_v3, %v477_v26 }
 0x183   :  { %v7422_v6 = vpop.f32.mrf.mxu0  ;;  %v7473_v7 = vpop.f32.mrf.mxu1 }
 0x185   :  { %v619_v8 = vpop.f32.mrf.mxu0  ;;  %v729_v9 = vpop.f32.mrf.mxu1 }
 0x186   :  { %v620_v10 = vadd.f32 %v619_v8, %v359_v29  ;;  %v730_v11 = vadd.f32 %v729_v9, %v482_v30 }
 0x187   :  { %v7425_v12 = vpop.f32.mrf.mxu0  ;;  %v7476_v13 = vpop.f32.mrf.mxu1 }
 0x189   :  { %v624_v14 = vpop.f32.mrf.mxu0  ;;  %v734_v15 = vpop.f32.mrf.mxu1 }
 0x18a   :  { %v625_v16 = vadd.f32 %v624_v14, %v364_v33  ;;  %v735_v17 = vadd.f32 %v734_v15, %v487_v34 }
 0x18b   :  { %v7428_v18 = vpop.f32.mrf.mxu0  ;;  %v7479_v19 = vpop.f32.mrf.mxu1 }
 0x18d   :  { %v629_v20 = vpop.f32.mrf.mxu0  ;;  %v739_v21 = vpop.f32.mrf.mxu1 }
 0x18e   :  { %v630_v22 = vadd.f32 %v629_v20, %v369_v37  ;;  %v740_v23 = vadd.f32 %v739_v21, %v492_v38 }
 0x18f   :  { %v7431_v24 = vpop.f32.mrf.mxu0  ;;  %v7482_v25 = vpop.f32.mrf.mxu1 }
 0x191   :  { %v634_v26 = vpop.f32.mrf.mxu0  ;;  %v744_v27 = vpop.f32.mrf.mxu1 }
 0x192   :  { %v635_v28 = vadd.f32 %v634_v26, %v374_v41  ;;  %v745_v31 = vadd.f32 %v744_v27, %v497_v42 }
 0x193   :  { %v7434_v29 = vpop.f32.mrf.mxu0  ;;  %v7485_v30 = vpop.f32.mrf.mxu1 }
 0x197   :  { %v639_v32 = vpop.f32.mrf.mxu0  ;;  %v749_v35 = vpop.f32.mrf.mxu1 }
 0x198   :  { %v640_v36 = vadd.f32 %v639_v32, %v379_v45  ;;  %v750_v39 = vadd.f32 %v749_v35, %v502_v46 }
 0x199   :  { %v7437_v33 = vpop.f32.mrf.mxu0  ;;  %v7488_v34 = vpop.f32.mrf.mxu1 }
 0x19d   :  { %v644_v40 = vpop.f32.mrf.mxu0  ;;  %v754_v43 = vpop.f32.mrf.mxu1 }
 0x19e   :  { %v645_v44 = vadd.f32 %v644_v40, %v384_v49  ;;  %v755_v47 = vadd.f32 %v754_v43, %v507_v50  ;;  %v1667_v49 = vld [vmem:[%s11581_s6] sm:$0xff] }
 0x19f   :  { %v7440_v37 = vpop.f32.mrf.mxu0  ;;  %v7491_v38 = vpop.f32.mrf.mxu1  ;;  %v6142_v50 = vld [vmem:[%s11581_s6 + $0x20] sm:$0xff]  ;;  %7816 = vmatprep.mubr.msk.f32.mxu0 %vm1671_vm5, %v1667_v49 }
 0x1a0   :  { %7840 = vmatprep.mubr.msk.f32.mxu1 %vm1671_vm5, %v6142_v50 }
 0x1a3   :  { %v873_v48 = vpop.f32.mrf.mxu0  ;;  %v996_v51 = vpop.f32.mrf.mxu1 }
 0x1a4   :  { %v1040_v52 = vadd.f32 %v873_v48, %v605_v55  ;;  %v1049_v53 = vadd.f32 %v996_v51, %v715_v56 }
 0x1a5   :  { %v7518_v41 = vpop.f32.mrf.mxu0  ;;  %v7569_v42 = vpop.f32.mrf.mxu1 }
 0x1a7   :  { %v878_v54 = vpop.f32.mrf.mxu0  ;;  %v1001_v57 = vpop.f32.mrf.mxu1 }
 0x1a8   :  { %v1041_v58 = vadd.f32 %v878_v54, %v610_v61  ;;  %v1050_v59 = vadd.f32 %v1001_v57, %v720_v62 }
 0x1a9   :  { %v7521_v45 = vpop.f32.mrf.mxu0  ;;  %v7572_v46 = vpop.f32.mrf.mxu1 }
 0x1ab   :  { %v883_v60 = vpop.f32.mrf.mxu0  ;;  %v1006_v63 = vpop.f32.mrf.mxu1 }
 0x1ac   :  { %v1042_v1 = vadd.f32 %v883_v60, %v615_v4  ;;  %v1051_v2 = vadd.f32 %v1006_v63, %v725_v5 }
 0x1ad   :  { %v7524_v55 = vpop.f32.mrf.mxu0  ;;  %v7575_v56 = vpop.f32.mrf.mxu1 }
 0x1af   :  { %v888_v61 = vpop.f32.mrf.mxu0  ;;  %v1011_v62 = vpop.f32.mrf.mxu1 }
 0x1b0   :  { %v1043_v3 = vadd.f32 %v888_v61, %v620_v10  ;;  %v1052_v4 = vadd.f32 %v1011_v62, %v730_v11 }
 0x1b1   :  { %v7527_v5 = vpop.f32.mrf.mxu0  ;;  %v7578_v6 = vpop.f32.mrf.mxu1 }
 0x1b3   :  { %v893_v7 = vpop.f32.mrf.mxu0  ;;  %v1016_v8 = vpop.f32.mrf.mxu1 }
 0x1b4   :  { %v1044_v9 = vadd.f32 %v893_v7, %v625_v16  ;;  %v1053_v12 = vadd.f32 %v1016_v8, %v735_v17 }
 0x1b5   :  { %v7530_v13 = vpop.f32.mrf.mxu0  ;;  %v7581_v14 = vpop.f32.mrf.mxu1 }
 0x1b7   :  { %v898_v15 = vpop.f32.mrf.mxu0  ;;  %v1021_v18 = vpop.f32.mrf.mxu1 }
 0x1b8   :  { %v9858_v19 = vadd.f32 %v898_v15, %v630_v22  ;;  %v9860_v20 = vadd.f32 %v1021_v18, %v740_v23 }
 0x1b9   :  { %v7533_v21 = vpop.f32.mrf.mxu0  ;;  %v7584_v24 = vpop.f32.mrf.mxu1 }
 0x1bb   :  { %v903_v25 = vpop.f32.mrf.mxu0  ;;  %v1026_v26 = vpop.f32.mrf.mxu1 }
 0x1bc   :  { %v9862_v10 = vadd.f32 %v903_v25, %v635_v28  ;;  %v9864_v11 = vadd.f32 %v1026_v26, %v745_v31 }
 0x1bd   :  { %v7536_v27 = vpop.f32.mrf.mxu0  ;;  %v7587_v29 = vpop.f32.mrf.mxu1 }
 0x1c1   :  { %v908_v16 = vpop.f32.mrf.mxu0  ;;  %v1031_v17 = vpop.f32.mrf.mxu1 }
 0x1c2   :  { %v9866_v30 = vadd.f32 %v908_v16, %v640_v36  ;;  %v9868_v32 = vadd.f32 %v1031_v17, %v750_v39 }
 0x1c3   :  { %v7539_v22 = vpop.f32.mrf.mxu0  ;;  %v7590_v35 = vpop.f32.mrf.mxu1 }
 0x1c7   :  { %v913_v23 = vpop.f32.mrf.mxu0  ;;  %v1036_v33 = vpop.f32.mrf.mxu1 }
 0x1c8   :  { %v9870_v34 = vadd.f32 %v913_v23, %v645_v44  ;;  %v9872_v40 = vadd.f32 %v1036_v33, %v755_v47 }
 0x1c9   :  { %v7542_v28 = vpop.f32.mrf.mxu0  ;;  %v7593_v43 = vpop.f32.mrf.mxu1 }
 0x1cd   :  { %v1173_v31 = vpop.f32.mrf.mxu0  ;;  %v1296_v37 = vpop.f32.mrf.mxu1 }
 0x1ce   :  { %v1340_v38 = vadd.f32 %v1173_v31, %v1040_v52  ;;  %v1349_v48 = vadd.f32 %v1296_v37, %v1049_v53 }
 0x1cf   :  { %v7620_v51 = vpop.f32.mrf.mxu0  ;;  %v7671_v41 = vpop.f32.mrf.mxu1 }
 0x1d1   :  { %v1178_v36 = vpop.f32.mrf.mxu0  ;;  %v1301_v42 = vpop.f32.mrf.mxu1 }
 0x1d2   :  { %v1341_v39 = vadd.f32 %v1178_v36, %v1041_v58  ;;  %v1350_v54 = vadd.f32 %v1301_v42, %v1050_v59 }
 0x1d3   :  { %v7623_v57 = vpop.f32.mrf.mxu0  ;;  %v7674_v45 = vpop.f32.mrf.mxu1 }
 0x1d5   :  { %v1183_v46 = vpop.f32.mrf.mxu0  ;;  %v1306_v60 = vpop.f32.mrf.mxu1 }
 0x1d6   :  { %v1342_v44 = vadd.f32 %v1183_v46, %v1042_v1  ;;  %v1351_v63 = vadd.f32 %v1306_v60, %v1051_v2 }
 0x1d7   :  { %v7626_v47 = vpop.f32.mrf.mxu0  ;;  %v7677_v49 = vpop.f32.mrf.mxu1 }
 0x1d9   :  { %v1188_v50 = vpop.f32.mrf.mxu0  ;;  %v1311_v55 = vpop.f32.mrf.mxu1 }
 0x1da   :  { %v1343_v56 = vadd.f32 %v1188_v50, %v1043_v3  ;;  %v1352_v61 = vadd.f32 %v1311_v55, %v1052_v4 }
 0x1db   :  { %v7629_v52 = vpop.f32.mrf.mxu0  ;;  %v7680_v53 = vpop.f32.mrf.mxu1 }
 0x1dd   :  { %v1193_v62 = vpop.f32.mrf.mxu0  ;;  %v1316_v5 = vpop.f32.mrf.mxu1 }
 0x1de   :  { %v1344_v6 = vadd.f32 %v1193_v62, %v1044_v9  ;;  %v1353_v7 = vadd.f32 %v1316_v5, %v1053_v12 }
 0x1df   :  { %v7632_v58 = vpop.f32.mrf.mxu0  ;;  %v7683_v59 = vpop.f32.mrf.mxu1 }
 0x1e1   :  { %v1198_v8 = vpop.f32.mrf.mxu0  ;;  %v1321_v13 = vpop.f32.mrf.mxu1 }
 0x1e3   :  { %v7635_v14 = vpop.f32.mrf.mxu0  ;;  %v7686_v15 = vpop.f32.mrf.mxu1 }
 0x1e5   :  { %v1203_v1 = vpop.f32.mrf.mxu0  ;;  %v1326_v2 = vpop.f32.mrf.mxu1 }
 0x1e7   :  { %v7638_v18 = vpop.f32.mrf.mxu0  ;;  %v7689_v21 = vpop.f32.mrf.mxu1 }
 0x1eb   :  { %v1208_v24 = vpop.f32.mrf.mxu0  ;;  %v1331_v25 = vpop.f32.mrf.mxu1 }
 0x1ed   :  { %v7641_v3 = vpop.f32.mrf.mxu0  ;;  %v7692_v4 = vpop.f32.mrf.mxu1 }
 0x1f1   :  { %v9874_v26 = vpop.f32.mrf.mxu0  ;;  %v9876_v27 = vpop.f32.mrf.mxu1 }
 0x1f3   :  { %v7644_v9 = vpop.f32.mrf.mxu0  ;;  %v7695_v12 = vpop.f32.mrf.mxu1 }
 0x1f4   :  { %v1346_v9 = vadd.f32 %v1203_v1, %v9862_v10  ;;  %v1355_v12 = vadd.f32 %v1326_v2, %v9864_v11  ;;  %v1348_v11 = vadd.f32 %v9874_v26, %v9870_v34  ;;  %v1357_v1 = vadd.f32 %v9876_v27, %v9872_v40  ;;  %v1668_v34 = vld [vmem:[%s11581_s6 + $0x8] sm:$0xff]  ;;  %v1669_v26 = vld [vmem:[%s11581_s6 + $0x10] sm:$0xff] }
 0x1f5   :  { %v6143_v40 = vld [vmem:[%s11581_s6 + $0x28] sm:$0xff]  ;;  %v6144_v27 = vld [vmem:[%s11581_s6 + $0x30] sm:$0xff] }
 0x1f7   :  { %v1473_v29 = vpop.f32.mrf.mxu0  ;;  %v1596_v16 = vpop.f32.mrf.mxu1 }
 0x1f8   :  { %v1640_v17 = vadd.f32 %v1473_v29, %v1340_v38  ;;  %v1649_v22 = vadd.f32 %v1596_v16, %v1349_v48 }
 0x1f9   :  { %v7722_v35 = vpop.f32.mrf.mxu0  ;;  %v7773_v23 = vpop.f32.mrf.mxu1 }
 0x1fa   :  { %v9878_v33 = vmax.f32 %v1640_v17, %v1649_v22 }
 0x1fb   :  { %v1478_v28 = vpop.f32.mrf.mxu0  ;;  %v1601_v43 = vpop.f32.mrf.mxu1 }
 0x1fc   :  { %v1641_v31 = vadd.f32 %v1478_v28, %v1341_v39  ;;  %v1650_v37 = vadd.f32 %v1601_v43, %v1350_v54 }
 0x1fd   :  { %v7725_v51 = vpop.f32.mrf.mxu0  ;;  %v7776_v41 = vpop.f32.mrf.mxu1 }
 0x1fe   :  { %v9880_v36 = vmax.f32 %v1641_v31, %v1650_v37 }
 0x1ff   :  { %v1483_v42 = vpop.f32.mrf.mxu0  ;;  %v1606_v57 = vpop.f32.mrf.mxu1 }
 0x200   :  { %v1642_v45 = vadd.f32 %v1483_v42, %v1342_v44  ;;  %v1651_v46 = vadd.f32 %v1606_v57, %v1351_v63  ;;  %v1345_v44 = vadd.f32 %v1198_v8, %v9858_v19  ;;  %v1354_v63 = vadd.f32 %v1321_v13, %v9860_v20  ;;  %v6145_v42 = vld [vmem:[%s11581_s6 + $0x38] sm:$0xff] }
 0x201   :  { %v7728_v60 = vpop.f32.mrf.mxu0  ;;  %v7779_v47 = vpop.f32.mrf.mxu1  ;;  %v1347_v20 = vadd.f32 %v1208_v24, %v9866_v30  ;;  %v1356_v8 = vadd.f32 %v1331_v25, %v9868_v32  ;;  %v6192_v57 = vld [vmem:[%s11577_s2 + $0x298] sm:$0xff] }
 0x202   :  { %v9882_v38 = vmax.f32 %v1642_v45, %v1651_v46  ;;  %v6174_v45 = vld [vmem:[%s11577_s2 + $0xb0] sm:$0xff]  ;;  %v6173_v60 = vld [vmem:[%s11577_s2 + $0xa8] sm:$0xff] }
 0x203   :  { %v1488_v48 = vpop.f32.mrf.mxu0  ;;  %v1611_v49 = vpop.f32.mrf.mxu1  ;;  %v6191_v46 = vld [vmem:[%s11577_s2 + $0x290] sm:$0xff]  ;;  %v6190_v47 = vld [vmem:[%s11577_s2 + $0x288] sm:$0xff] }
 0x204   :  { %v1643_v50 = vadd.f32 %v1488_v48, %v1343_v56  ;;  %v1652_v55 = vadd.f32 %v1611_v49, %v1352_v61  ;;  %v6189_v48 = vld [vmem:[%s11577_s2 + $0x280] sm:$0xff]  ;;  %v6171_v49 = vld [vmem:[%s11577_s2 + $0x98] sm:$0xff] }
 0x205   :  { %v7731_v52 = vpop.f32.mrf.mxu0  ;;  %v7782_v53 = vpop.f32.mrf.mxu1 }
 0x206   :  { %v9884_v39 = vmax.f32 %v1643_v50, %v1652_v55  ;;  %v6188_v50 = vld [vmem:[%s11577_s2 + $0x278] sm:$0xff]  ;;  %v6170_v55 = vld [vmem:[%s11577_s2 + $0x90] sm:$0xff]  ;;  %v6169_v53 = vld [vmem:[%s11577_s2 + $0x88] sm:$0xff] }
 0x207   :  { %v1493_v54 = vpop.f32.mrf.mxu0  ;;  %v1616_v62 = vpop.f32.mrf.mxu1  ;;  %v6187_v52 = vld [vmem:[%s11577_s2 + $0x270] sm:$0xff] }
 0x208   :  { %v1644_v5 = vadd.f32 %v1493_v54, %v1344_v6  ;;  %v1653_v58 = vadd.f32 %v1616_v62, %v1353_v7  ;;  %v6168_v54 = vld [vmem:[%s11577_s2 + $0x80] sm:$0xff] }
 0x209   :  { %v7734_v59 = vpop.f32.mrf.mxu0  ;;  %v7785_v14 = vpop.f32.mrf.mxu1  ;;  %v6185_v62 = vld [vmem:[%s11577_s2 + $0x260] sm:$0xff] }
 0x20a   :  { %v1662_v15 = vmax.f32 %v1644_v5, %v1653_v58  ;;  %v6167_v5 = vld [vmem:[%s11577_s2 + $0x78] sm:$0xff]  ;;  %v6166_v59 = vld [vmem:[%s11577_s2 + $0x70] sm:$0xff] }
 0x20b   :  { %v1498_v18 = vpop.f32.mrf.mxu0  ;;  %v1621_v21 = vpop.f32.mrf.mxu1  ;;  %v6184_v58 = vld [vmem:[%s11577_s2 + $0x258] sm:$0xff]  ;;  %v6183_v14 = vld [vmem:[%s11577_s2 + $0x250] sm:$0xff] }
 0x20c   :  { %v1645_v3 = vadd.f32 %v1498_v18, %v1345_v44  ;;  %v1654_v56 = vadd.f32 %v1621_v21, %v1354_v63  ;;  %v6165_v44 = vld [vmem:[%s11577_s2 + $0x68] sm:$0xff]  ;;  %v6181_v18 = vld [vmem:[%s11577_s2 + $0x240] sm:$0xff] }
 0x20d   :  { %v7737_v61 = vpop.f32.mrf.mxu0  ;;  %v7788_v4 = vpop.f32.mrf.mxu1  ;;  %v6182_v63 = vld [vmem:[%s11577_s2 + $0x248] sm:$0xff] }
 0x20e   :  { %v1663_v29 = vmax.f32 %v1645_v3, %v1654_v56  ;;  %v6151_v56 = vld [vmem:[%s11585_s10] ss:$0 sm:$0xff]  ;;  %s5927_s10 = sshll.u32 %s8941_s27, 4  ;;  %s5928_s10 = int_to_ptr.vmem [resolvable:$true] %s5927_s10 }
 0x20f   :  { %v1503_v6 = vpop.f32.mrf.mxu0  ;;  %v1626_v7 = vpop.f32.mrf.mxu1  ;;  %p8915_p6 = scmp.lt.s32.totalorder %s5928_s10, %s5928_s10 }
 0x210   :  { %v1646_v16 = vadd.f32 %v1503_v6, %v1346_v9  ;;  %v1655_v17 = vadd.f32 %v1626_v7, %v1355_v12 }
 0x211   :  { %v7740_v22 = vpop.f32.mrf.mxu0  ;;  %v7791_v19 = vpop.f32.mrf.mxu1 }
 0x212   :  { %v1664_v13 = vmax.f32 %v1646_v16, %v1655_v17 }
 0x213   :  { %v1508_v35 = vpop.f32.mrf.mxu0  ;;  %v1631_v23 = vpop.f32.mrf.mxu1 }
 0x214   :  { %v1647_v28 = vadd.f32 %v1508_v35, %v1347_v20  ;;  %v1656_v43 = vadd.f32 %v1631_v23, %v1356_v8 }
 0x215   :  { %v7743_v31 = vpop.f32.mrf.mxu0  ;;  %v7794_v10 = vpop.f32.mrf.mxu1 }
 0x216   :  { %v1665_v2 = vmax.f32 %v1647_v28, %v1656_v43  ;;  %v1919_v31 = vld [vmem:[%s11577_s2 + $0x58] sm:$0xff] }
 0x217   :  { %v1513_v37 = vpop.f32.mrf.mxu0  ;;  %v1636_v51 = vpop.f32.mrf.mxu1  ;;  %v6163_v10 = vld [vmem:[%s11577_s2 + $0x238] sm:$0xff] }
 0x218   :  { %v1648_v41 = vadd.f32 %v1513_v37, %v1348_v11  ;;  %v1657_v30 = vadd.f32 %v1636_v51, %v1357_v1  ;;  %v1918_v1 = vld [vmem:[%s11577_s2 + $0x50] sm:$0xff]  ;;  %v1917_v37 = vld [vmem:[%s11577_s2 + $0x48] sm:$0xff] }
 0x219   :  { %v7746_v24 = vpop.f32.mrf.mxu0  ;;  %v7797_v32 = vpop.f32.mrf.mxu1  ;;  %v6161_v51 = vld [vmem:[%s11577_s2 + $0x228] sm:$0xff] }
 0x21a   :  { %v1666_v25 = vmax.f32 %v1648_v41, %v1657_v30  ;;  %v1916_v30 = vld [vmem:[%s11577_s2 + $0x40] sm:$0xff]  ;;  %v1915_v32 = vld [vmem:[%s11577_s2 + $0x38] sm:$0xff] }
 0x21b   :  { %v6160_v24 = vld [vmem:[%s11577_s2 + $0x220] sm:$0xff] }
 0x21c   :  { %7798 = vmatprep.subr.msk.mxu0 %vm1684_vm6, %v1666_v25  ;;  %7822 = vmatprep.subr.msk.mxu1 %vm1684_vm6, %v1666_v25 }
 0x21d   :  { %7799 = vmatpush3.msk.msra.mxu0 %vm1684_vm6, %v1666_v25  ;;  %7823 = vmatpush3.msk.msra.mxu1 %vm1684_vm6, %v1666_v25  ;;  %v6159_v25 = vld [vmem:[%s11577_s2 + $0x218] sm:$0xff] }
 0x21e   :  { %7800 = vmatprep.subr.mxu0 %v1665_v2  ;;  %7824 = vmatprep.subr.mxu1 %v1665_v2 }
 0x21f   :  { %7801 = vmatpush3.msra.mxu0 %v1665_v2  ;;  %7825 = vmatpush3.msra.mxu1 %v1665_v2  ;;  %v6162_v2 = vld [vmem:[%s11577_s2 + $0x230] sm:$0xff] }
 0x220   :  { %7802 = vmatprep.subr.mxu0 %v1664_v13  ;;  %7826 = vmatprep.subr.mxu1 %v1664_v13 }
 0x221   :  { %7803 = vmatpush3.msra.mxu0 %v1664_v13  ;;  %7827 = vmatpush3.msra.mxu1 %v1664_v13 }
 0x222   :  { %7804 = vmatprep.subr.mxu0 %v1663_v29  ;;  %7828 = vmatprep.subr.mxu1 %v1663_v29 }
 0x223   :  { %7805 = vmatpush3.msra.mxu0 %v1663_v29  ;;  %7829 = vmatpush3.msra.mxu1 %v1663_v29 }
 0x224   :  { %7806 = vmatprep.subr.mxu0 %v1662_v15  ;;  %7830 = vmatprep.subr.mxu1 %v1662_v15 }
 0x225   :  { %7807 = vmatpush3.msra.mxu0 %v1662_v15  ;;  %7831 = vmatpush3.msra.mxu1 %v1662_v15  ;;  %v6164_v15 = vld [vmem:[%s11577_s2 + $0x60] sm:$0xff] }
 0x226   :  { %7808 = vmatprep.subr.mxu0 %v9884_v39  ;;  %7832 = vmatprep.subr.mxu1 %v9884_v39 }
 0x227   :  { %7809 = vmatpush3.msra.mxu0 %v9884_v39  ;;  %7833 = vmatpush3.msra.mxu1 %v9884_v39  ;;  %v6186_v39 = vld [vmem:[%s11577_s2 + $0x268] sm:$0xff] }
 0x228   :  { %7810 = vmatprep.subr.mxu0 %v9882_v38  ;;  %7834 = vmatprep.subr.mxu1 %v9882_v38 }
 0x229   :  { %7811 = vmatpush3.msra.mxu0 %v9882_v38  ;;  %7835 = vmatpush3.msra.mxu1 %v9882_v38  ;;  %v6172_v38 = vld [vmem:[%s11577_s2 + $0xa0] sm:$0xff] }
 0x22a   :  { %7812 = vmatprep.subr.mxu0 %v9880_v36  ;;  %7836 = vmatprep.subr.mxu1 %v9880_v36 }
 0x22b   :  { %7813 = vmatpush3.msra.mxu0 %v9880_v36  ;;  %7837 = vmatpush3.msra.mxu1 %v9880_v36  ;;  %v1670_v36 = vld [vmem:[%s11581_s6 + $0x18] sm:$0xff] }
 0x22c   :  { %7814 = vmatprep.subr.mxu0 %v9878_v33  ;;  %7838 = vmatprep.subr.mxu1 %v9878_v33 }
 0x22d   :  { %7815 = vmatpush3.msra.mxu0 %v9878_v33  ;;  %7839 = vmatpush3.msra.mxu1 %v9878_v33  ;;  %v6175_v33 = vld [vmem:[%s11577_s2 + $0xb8] sm:$0xff] }
 0x22e   :  { %7817 = vmatmul.mubr.msk.f32.vlgmr.msra.gmra.mxu0 %vm1671_vm5, %v1668_v34  ;;  %7841 = vmatmul.mubr.msk.f32.vlgmr.msra.gmra.mxu1 %vm1671_vm5, %v6143_v40  ;;  %v1914_v40 = vld [vmem:[%s11577_s2 + $0x30] sm:$0xff] }
 0x22f   :  { %7819 = vmatprep.mubr.msk.f32.mxu0 %vm1671_vm5, %v1669_v26  ;;  %7843 = vmatprep.mubr.msk.f32.mxu1 %vm1671_vm5, %v6144_v27  ;;  %v6158_v26 = vld [vmem:[%s11577_s2 + $0x210] sm:$0xff]  ;;  %v1913_v27 = vld [vmem:[%s11577_s2 + $0x28] sm:$0xff] }
 0x230   :  { %7846 = vmatprep.subr.mxu0 %v8937_v0  ;;  %7885 = vmatprep.subr.mxu1 %v8937_v0 }
 0x231   :  { %7847 = vmatpush3.msra.mxu0 %v6175_v33  ;;  %7886 = vmatpush3.msra.mxu1 %v6192_v57  ;;  %v1912_v33 = vld [vmem:[%s11577_s2 + $0x20] sm:$0xff] }
 0x232   :  { %7820 = vmatmul.mubr.msk.f32.gmra.mxu0 %vm1671_vm5, %v1670_v36  ;;  %7844 = vmatmul.mubr.msk.f32.gmra.mxu1 %vm1671_vm5, %v6145_v42  ;;  %v6157_v36 = vld [vmem:[%s11577_s2 + $0x208] sm:$0xff]  ;;  %v6156_v57 = vld [vmem:[%s11577_s2 + $0x200] sm:$0xff] }
 0x233   :  { %7870 = vmatprep.mubr.msk.f32.mxu0 %vm8938_vm1, %v8937_v0  ;;  %7909 = vmatprep.mubr.msk.f32.mxu1 %vm8938_vm1, %v8937_v0 }
 0x234   :  { %7848 = vmatprep.subr.mxu0 %v8937_v0  ;;  %7887 = vmatprep.subr.mxu1 %v8937_v0 }
 0x235   :  { %7849 = vmatpush3.msra.mxu0 %v6174_v45  ;;  %7888 = vmatpush3.msra.mxu1 %v6191_v46  ;;  %v1911_v45 = vld [vmem:[%s11577_s2 + $0x18] sm:$0xff] }
 0x236   :  { %7850 = vmatprep.subr.mxu0 %v8937_v0  ;;  %7889 = vmatprep.subr.mxu1 %v8937_v0  ;;  %v6155_v46 = vld [vmem:[%s11577_s2 + $0x1f8] sm:$0xff] }
 0x237   :  { %7851 = vmatpush3.msra.mxu0 %v6173_v60  ;;  %7890 = vmatpush3.msra.mxu1 %v6190_v47  ;;  %v1910_v47 = vld [vmem:[%s11577_s2 + $0x10] sm:$0xff] }
 0x238   :  { %7852 = vmatprep.subr.mxu0 %v8937_v0  ;;  %7891 = vmatprep.subr.mxu1 %v8937_v0 }
 0x239   :  { %7853 = vmatpush3.msra.mxu0 %v6172_v38  ;;  %7892 = vmatpush3.msra.mxu1 %v6189_v48  ;;  %v6154_v38 = vld [vmem:[%s11577_s2 + $0x1f0] sm:$0xff]  ;;  %v1909_v48 = vld [vmem:[%s11577_s2 + $0x8] sm:$0xff] }
 0x23a   :  { %7854 = vmatprep.subr.mxu0 %v8937_v0  ;;  %7893 = vmatprep.subr.mxu1 %v8937_v0 }
 0x23b   :  { %7855 = vmatpush3.msra.mxu0 %v6171_v49  ;;  %7894 = vmatpush3.msra.mxu1 %v6188_v50  ;;  %v6153_v49 = vld [vmem:[%s11577_s2 + $0x1e8] sm:$0xff]  ;;  %v1908_v50 = vld [vmem:[%s11577_s2] sm:$0xff] }
 0x23c   :  { %7856 = vmatprep.subr.mxu0 %v8937_v0  ;;  %7895 = vmatprep.subr.mxu1 %v8937_v0 }
 0x23d   :  { %7857 = vmatpush3.msra.mxu0 %v6170_v55  ;;  %7896 = vmatpush3.msra.mxu1 %v6187_v52  ;;  %v6152_v55 = vld [vmem:[%s11577_s2 + $0x1e0] sm:$0xff] }
 0x23e   :  { %7858 = vmatprep.subr.mxu0 %v8937_v0  ;;  %7897 = vmatprep.subr.mxu1 %v8937_v0 }
 0x23f   :  { %7859 = vmatpush3.msra.mxu0 %v6169_v53  ;;  %7898 = vmatpush3.msra.mxu1 %v6186_v39  ;;  %v6219_v53 = vld [vmem:[%s11577_s2 + $0x118] sm:$0xff] }
 0x240   :  { %7860 = vmatprep.subr.mxu0 %v8937_v0  ;;  %7899 = vmatprep.subr.mxu1 %v8937_v0  ;;  %v6236_v39 = vld [vmem:[%s11577_s2 + $0x2f8] sm:$0xff] }
 0x241   :  { %7861 = vmatpush3.msra.mxu0 %v6168_v54  ;;  %7900 = vmatpush3.msra.mxu1 %v6185_v62  ;;  %v6218_v54 = vld [vmem:[%s11577_s2 + $0x110] sm:$0xff] }
 0x242   :  { %7862 = vmatprep.subr.mxu0 %v8937_v0  ;;  %7901 = vmatprep.subr.mxu1 %v8937_v0  ;;  %v6235_v62 = vld [vmem:[%s11577_s2 + $0x2f0] sm:$0xff] }
 0x243   :  { %7863 = vmatpush3.msra.mxu0 %v6167_v5  ;;  %7902 = vmatpush3.msra.mxu1 %v6184_v58  ;;  %v6217_v58 = vld [vmem:[%s11577_s2 + $0x108] sm:$0xff] }
 0x244   :  { %7864 = vmatprep.subr.mxu0 %v8937_v0  ;;  %7903 = vmatprep.subr.mxu1 %v8937_v0 }
 0x245   :  { %7865 = vmatpush3.msra.mxu0 %v6166_v59  ;;  %7904 = vmatpush3.msra.mxu1 %v6183_v14  ;;  %v6234_v59 = vld [vmem:[%s11577_s2 + $0x2e8] sm:$0xff]  ;;  %v6216_v14 = vld [vmem:[%s11577_s2 + $0x100] sm:$0xff] }
 0x246   :  { %7866 = vmatprep.subr.mxu0 %v8937_v0  ;;  %7905 = vmatprep.subr.mxu1 %v8937_v0 }
 0x247   :  { %7867 = vmatpush3.msra.mxu0 %v6165_v44  ;;  %7906 = vmatpush3.msra.mxu1 %v6182_v63  ;;  %v6233_v44 = vld [vmem:[%s11577_s2 + $0x2e0] sm:$0xff] }
 0x248   :  { %7868 = vmatprep.subr.mxu0 %v8937_v0  ;;  %7907 = vmatprep.subr.mxu1 %v8937_v0 }
 0x249   :  { %7869 = vmatpush3.msra.mxu0 %v6164_v15  ;;  %7908 = vmatpush3.msra.mxu1 %v6181_v18  ;;  %v6215_v15 = vld [vmem:[%s11577_s2 + $0xf8] sm:$0xff] }
 0x24a   :  { %7924 = vmatprep.subr.mxu0 %v8937_v0  ;;  %7963 = vmatprep.subr.mxu1 %v8937_v0  ;;  %v6232_v18 = vld [vmem:[%s11577_s2 + $0x2d8] sm:$0xff] }
 0x2ee   :  { %v7818_v21 = vpop.f32.mrf.mxu0  ;;  %v7842_v3 = vpop.f32.mrf.mxu1 }
 0x2ef   :  { %v1876_v61 = vmax.f32 %v7818_v21, %v7842_v3  ;;  %v6214_v21 = vld [vmem:[%s11577_s2 + $0xf0] sm:$0xff] }
 0x2f0   :  { %v1754_v4 = vpop.f32.mrf.mxu0  ;;  %v1856_v9 = vpop.f32.mrf.mxu1  ;;  %v6231_v3 = vld [vmem:[%s11577_s2 + $0x2d0] sm:$0xff] }
 0x2f1   :  { %v1887_v12 = vadd.f32 %v6151_v56, %v1876_v61  ;;  %v1875_v29 = vmax.f32 %v1754_v4, %v1856_v9  ;;  %v6213_v61 = vld [vmem:[%s11577_s2 + $0xe8] sm:$0xff]  ;;  %v6212_v9 = vld [vmem:[%s11577_s2 + $0xe0] sm:$0xff] }
 0x2f2   :  { %v7821_v6 = vpop.f32.mrf.mxu0  ;;  %v7845_v7 = vpop.f32.mrf.mxu1  ;;  %v6230_v4 = vld [vmem:[%s11577_s2 + $0x2c8] sm:$0xff] }
 0x2f3   :  { %8868 = vtanh.f32 %v1887_v12  ;;  %v1886_v16 = vadd.f32 %v6151_v56, %v1875_v29  ;;  %v1878_v17 = vmax.f32 %v7821_v6, %v7845_v7  ;;  %v6229_v12 = vld [vmem:[%s11577_s2 + $0x2c0] sm:$0xff]  ;;  %v6211_v6 = vld [vmem:[%s11577_s2 + $0xd8] sm:$0xff] }
 0x2f4   :  { %v1764_v22 = vpop.f32.mrf.mxu0  ;;  %v1866_v19 = vpop.f32.mrf.mxu1  ;;  %v6228_v7 = vld [vmem:[%s11577_s2 + $0x2b8] sm:$0xff] }
 0x2f5   :  { %8870 = vtanh.f32 %v1886_v16  ;;  %v1889_v20 = vadd.f32 %v6151_v56, %v1878_v17  ;;  %v1877_v8 = vmax.f32 %v1764_v22, %v1866_v19  ;;  %v6210_v16 = vld [vmem:[%s11577_s2 + $0xd0] sm:$0xff]  ;;  %v6209_v22 = vld [vmem:[%s11577_s2 + $0xc8] sm:$0xff] }
 0x2f6   :  { %v6227_v17 = vld [vmem:[%s11577_s2 + $0x2b0] sm:$0xff]  ;;  %v6226_v19 = vld [vmem:[%s11577_s2 + $0x2a8] sm:$0xff] }
 0x2f7   :  { %8872 = vtanh.f32 %v1889_v20  ;;  %v1888_v13 = vadd.f32 %v6151_v56, %v1877_v8  ;;  %v6208_v20 = vld [vmem:[%s11577_s2 + $0xc0] sm:$0xff] }
 0x2f8   :  { %v6225_v8 = vld [vmem:[%s11577_s2 + $0x2a0] sm:$0xff] }
 0x2f9   :  { %8874 = vtanh.f32 %v1888_v13 }
 0x300   :  { %v8869_v35 = vpop.eup %8868 }
 0x301   :  { %1900 = vst.msk [vmem:[#allocation3 + $0xa] sm:$0xff] %vm65_vm0, %v8869_v35  ;;  %v6253_v35 = vld [vmem:[%s11577_s2 + $0x178] sm:$0xff] }
 0x302   :  { %v8871_v23 = vpop.eup %8870 }
 0x303   :  { %1899 = vst.msk [vmem:[#allocation3 + $0x2] sm:$0xff] %vm65_vm0, %v8871_v23  ;;  %v6270_v23 = vld [vmem:[%s11577_s2 + $0x358] sm:$0xff] }
 0x304   :  { %v8873_v28 = vpop.eup %8872 }
 0x305   :  { %1902 = vst.msk [vmem:[#allocation3 + $0x1e] sm:$0xff] %vm65_vm0, %v8873_v28  ;;  %v6252_v28 = vld [vmem:[%s11577_s2 + $0x170] sm:$0xff] }
 0x306   :  { %v8875_v43 = vpop.eup %8874 }
 0x307   :  { %1901 = vst.msk [vmem:[#allocation3 + $0x16] sm:$0xff] %vm65_vm0, %v8875_v43  ;;  %v6269_v43 = vld [vmem:[%s11577_s2 + $0x350] sm:$0xff] }
 0x30a   :  { %v1933_v11 = vld [vmem:[#allocation3 + $0x1] sm:$0xff]  ;;  %v1934_v41 = vld [vmem:[#allocation3 + $0x9] sm:$0xff] }
 0x30b   :  { %7871 = vmatmul.mubr.msk.f32.vlgmr.msra.gmra.mxu0 %vm65_vm0, %v1933_v11  ;;  %7910 = vmatmul.mubr.msk.f32.vlgmr.msra.gmra.mxu1 %vm65_vm0, %v1933_v11  ;;  %v1903_v52 = vld [vmem:[#allocation3] sm:$0xff]  ;;  %v1904_v5 = vld [vmem:[#allocation3 + $0x8] sm:$0xff] }
 0x30c   :  { %7925 = vmatpush3.msra.mxu0 %v1919_v31  ;;  %7964 = vmatpush3.msra.mxu1 %v6163_v10  ;;  %v1937_v60 = vld [vmem:[#allocation3 + $0x21] sm:$0xf]  ;;  %v2355_v31 = vld [vmem:[#allocation3 + $0xa] sm:$0xff] }
 0x30d   :  { %7926 = vmatprep.subr.mxu0 %v8937_v0  ;;  %7965 = vmatprep.subr.mxu1 %v8937_v0  ;;  %v1907_v29 = vld [vmem:[#allocation3 + $0x20] sm:$0xf] }
 0x30e   :  { %7927 = vmatpush3.msra.mxu0 %v1918_v1  ;;  %7966 = vmatpush3.msra.mxu1 %v6162_v2  ;;  %v1935_v34 = vld [vmem:[#allocation3 + $0x11] sm:$0xff]  ;;  %v1936_v42 = vld [vmem:[#allocation3 + $0x19] sm:$0xff]  ;;  %v2354_v13 = vld [vmem:[#allocation3 + $0x2] sm:$0xff] }
 0x30f   :  { %7873 = vmatprep.mubr.msk.f32.mxu0 %vm8938_vm1, %v8937_v0  ;;  %7912 = vmatprep.mubr.msk.f32.mxu1 %vm8938_vm1, %v8937_v0  ;;  %v1905_v63 = vld [vmem:[#allocation3 + $0x10] sm:$0xff]  ;;  %v1906_v56 = vld [vmem:[#allocation3 + $0x18] sm:$0xff]  ;;  %v6251_v10 = vld [vmem:[%s11577_s2 + $0x168] sm:$0xff] }
 0x310   :  { %7928 = vmatprep.subr.mxu0 %v8937_v0  ;;  %7967 = vmatprep.subr.mxu1 %v8937_v0  ;;  %v6268_v11 = vld [vmem:[%s11577_s2 + $0x348] sm:$0xff]  ;;  %v6250_v1 = vld [vmem:[%s11577_s2 + $0x160] sm:$0xff] }
 0x311   :  { %7874 = vmatmul.mubr.msk.f32.gmra.mxu0 %vm65_vm0, %v1934_v41  ;;  %7913 = vmatmul.mubr.msk.f32.gmra.mxu1 %vm65_vm0, %v1934_v41  ;;  %v6267_v2 = vld [vmem:[%s11577_s2 + $0x340] sm:$0xff]  ;;  %v6266_v41 = vld [vmem:[%s11577_s2 + $0x338] sm:$0xff] }
 0x312   :  { %7929 = vmatpush3.msra.mxu0 %v1917_v37  ;;  %7968 = vmatpush3.msra.mxu1 %v6161_v51  ;;  %v2356_v37 = vld [vmem:[#allocation3 + $0x12] sm:$0xff] }
 0x313   :  { %7930 = vmatprep.subr.mxu0 %v8937_v0  ;;  %7969 = vmatprep.subr.mxu1 %v8937_v0  ;;  %v6249_v51 = vld [vmem:[%s11577_s2 + $0x158] sm:$0xff] }
 0x314   :  { %7931 = vmatpush3.msra.mxu0 %v1916_v30  ;;  %7970 = vmatpush3.msra.mxu1 %v6160_v24  ;;  %v6248_v30 = vld [vmem:[%s11577_s2 + $0x150] sm:$0xff] }
 0x315   :  { %7876 = vmatprep.mubr.msk.f32.mxu0 %vm8938_vm1, %v8937_v0  ;;  %7915 = vmatprep.mubr.msk.f32.mxu1 %vm8938_vm1, %v8937_v0  ;;  %v6265_v24 = vld [vmem:[%s11577_s2 + $0x330] sm:$0xff] }
 0x316   :  { %7932 = vmatprep.subr.mxu0 %v8937_v0  ;;  %7971 = vmatprep.subr.mxu1 %v8937_v0 }
 0x317   :  { %7877 = vmatmul.mubr.msk.f32.gmra.mxu0 %vm65_vm0, %v1935_v34  ;;  %7916 = vmatmul.mubr.msk.f32.gmra.mxu1 %vm65_vm0, %v1935_v34  ;;  %v6264_v34 = vld [vmem:[%s11577_s2 + $0x328] sm:$0xff] }
 0x318   :  { %7933 = vmatpush3.msra.mxu0 %v1915_v32  ;;  %7972 = vmatpush3.msra.mxu1 %v6159_v25  ;;  %v2357_v32 = vld [vmem:[#allocation3 + $0x1a] sm:$0xff] }
 0x319   :  { %7934 = vmatprep.subr.mxu0 %v8937_v0  ;;  %7973 = vmatprep.subr.mxu1 %v8937_v0  ;;  %v6247_v25 = vld [vmem:[%s11577_s2 + $0x148] sm:$0xff] }
 0x31a   :  { %7935 = vmatpush3.msra.mxu0 %v1914_v40  ;;  %7974 = vmatpush3.msra.mxu1 %v6158_v26  ;;  %v6246_v40 = vld [vmem:[%s11577_s2 + $0x140] sm:$0xff] }
 0x31b   :  { %7879 = vmatprep.mubr.msk.f32.mxu0 %vm8938_vm1, %v8937_v0  ;;  %7918 = vmatprep.mubr.msk.f32.mxu1 %vm8938_vm1, %v8937_v0  ;;  %v6263_v26 = vld [vmem:[%s11577_s2 + $0x320] sm:$0xff] }
 0x31c   :  { %7936 = vmatprep.subr.mxu0 %v8937_v0  ;;  %7975 = vmatprep.subr.mxu1 %v8937_v0 }
 0x31d   :  { %7880 = vmatmul.mubr.msk.f32.gmra.mxu0 %vm65_vm0, %v1936_v42  ;;  %7919 = vmatmul.mubr.msk.f32.gmra.mxu1 %vm65_vm0, %v1936_v42  ;;  %v6262_v42 = vld [vmem:[%s11577_s2 + $0x318] sm:$0xff] }
 0x31e   :  { %7937 = vmatpush3.msra.mxu0 %v1913_v27  ;;  %7976 = vmatpush3.msra.mxu1 %v6157_v36  ;;  %v2358_v27 = vld [vmem:[#allocation3 + $0x22] sm:$0xf]  ;;  %v6245_v36 = vld [vmem:[%s11577_s2 + $0x138] sm:$0xff] }
 0x31f   :  { %7938 = vmatprep.subr.mxu0 %v8937_v0  ;;  %7977 = vmatprep.subr.mxu1 %v8937_v0 }
 0x320   :  { %7939 = vmatpush3.msra.mxu0 %v1912_v33  ;;  %7978 = vmatpush3.msra.mxu1 %v6156_v57  ;;  %v6244_v33 = vld [vmem:[%s11577_s2 + $0x130] sm:$0xff] }
 0x321   :  { %7882 = vmatprep.mubr.msk.f32.mxu0 %vm8938_vm1, %v8937_v0  ;;  %7921 = vmatprep.mubr.msk.f32.mxu1 %vm8938_vm1, %v8937_v0  ;;  %v6261_v57 = vld [vmem:[%s11577_s2 + $0x310] sm:$0xff] }
 0x322   :  { %7940 = vmatprep.subr.mxu0 %v8937_v0  ;;  %7979 = vmatprep.subr.mxu1 %v8937_v0 }
 0x323   :  { %7883 = vmatmul.mubr.msk.f32.gmra.mxu0 %vm65_vm0, %v1937_v60  ;;  %7922 = vmatmul.mubr.msk.f32.gmra.mxu1 %vm65_vm0, %v1937_v60  ;;  %v6242_v60 = vld [vmem:[%s11577_s2 + $0x120] sm:$0xff] }
 0x324   :  { %7941 = vmatpush3.msra.mxu0 %v1911_v45  ;;  %7980 = vmatpush3.msra.mxu1 %v6155_v46  ;;  %v6243_v45 = vld [vmem:[%s11577_s2 + $0x128] sm:$0xff] }
 0x325   :  { %7942 = vmatprep.subr.mxu0 %v8937_v0  ;;  %7981 = vmatprep.subr.mxu1 %v8937_v0  ;;  %v6260_v46 = vld [vmem:[%s11577_s2 + $0x308] sm:$0xff] }
 0x326   :  { %7943 = vmatpush3.msra.mxu0 %v1910_v47  ;;  %7982 = vmatpush3.msra.mxu1 %v6154_v38  ;;  %v6259_v47 = vld [vmem:[%s11577_s2 + $0x300] sm:$0xff]  ;;  %v2590_v38 = vld [vmem:[#allocation3 + $0x3] sm:$0xff] }
 0x327   :  { %7944 = vmatprep.subr.mxu0 %v8937_v0  ;;  %7983 = vmatprep.subr.mxu1 %v8937_v0 }
 0x328   :  { %7945 = vmatpush3.msra.mxu0 %v1909_v48  ;;  %7984 = vmatpush3.msra.mxu1 %v6153_v49  ;;  %v6287_v48 = vld [vmem:[%s11577_s2 + $0x1d8] sm:$0xff] }
 0x329   :  { %7946 = vmatprep.subr.mxu0 %v8937_v0  ;;  %7985 = vmatprep.subr.mxu1 %v8937_v0  ;;  %v6304_v49 = vld [vmem:[%s11577_s2 + $0x3b8] sm:$0xff] }
 0x32a   :  { %7947 = vmatpush3.msra.mxu0 %v1908_v50  ;;  %7948 = vmatprep.mubr.msk.f32.mxu0 %vm8938_vm1, %v8937_v0  ;;  %v6286_v50 = vld [vmem:[%s11577_s2 + $0x1d0] sm:$0xff] }
 0x32b   :  { %7986 = vmatpush3.msra.mxu1 %v6152_v55  ;;  %7987 = vmatprep.mubr.msk.f32.mxu1 %vm8938_vm1, %v8937_v0  ;;  %v6303_v55 = vld [vmem:[%s11577_s2 + $0x3b0] sm:$0xff] }
 0x32c   :  { %7949 = vmatmul.mubr.msk.f32.vlgmr.msra.gmra.mxu0 %vm65_vm0, %v1903_v52  ;;  %7988 = vmatmul.mubr.msk.f32.vlgmr.msra.gmra.mxu1 %vm65_vm0, %v1903_v52  ;;  %v2591_v52 = vld [vmem:[#allocation3 + $0xb] sm:$0xff] }
 0x32d   :  { %8002 = vmatprep.subr.mxu0 %v8937_v0  ;;  %8041 = vmatprep.subr.mxu1 %v8937_v0 }
 0x32e   :  { %8003 = vmatpush3.msra.mxu0 %v6219_v53  ;;  %8042 = vmatpush3.msra.mxu1 %v6236_v39  ;;  %v6285_v53 = vld [vmem:[%s11577_s2 + $0x1c8] sm:$0xff] }
 0x32f   :  { %8004 = vmatprep.subr.mxu0 %v8937_v0  ;;  %8043 = vmatprep.subr.mxu1 %v8937_v0  ;;  %v6302_v39 = vld [vmem:[%s11577_s2 + $0x3a8] sm:$0xff] }
 0x330   :  { %7951 = vmatprep.mubr.msk.f32.mxu0 %vm8938_vm1, %v8937_v0  ;;  %7990 = vmatprep.mubr.msk.f32.mxu1 %vm8938_vm1, %v8937_v0 }
 0x331   :  { %8005 = vmatpush3.msra.mxu0 %v6218_v54  ;;  %8044 = vmatpush3.msra.mxu1 %v6235_v62  ;;  %v6284_v54 = vld [vmem:[%s11577_s2 + $0x1c0] sm:$0xff] }
 0x332   :  { %7952 = vmatmul.mubr.msk.f32.gmra.mxu0 %vm65_vm0, %v1904_v5  ;;  %7991 = vmatmul.mubr.msk.f32.gmra.mxu1 %vm65_vm0, %v1904_v5  ;;  %v6301_v62 = vld [vmem:[%s11577_s2 + $0x3a0] sm:$0xff] }
 0x333   :  { %8006 = vmatprep.subr.mxu0 %v8937_v0  ;;  %8045 = vmatprep.subr.mxu1 %v8937_v0  ;;  %v2592_v5 = vld [vmem:[#allocation3 + $0x13] sm:$0xff] }
 0x334   :  { %8007 = vmatpush3.msra.mxu0 %v6217_v58  ;;  %8046 = vmatpush3.msra.mxu1 %v6234_v59  ;;  %v6283_v58 = vld [vmem:[%s11577_s2 + $0x1b8] sm:$0xff] }
 0x335   :  { %8008 = vmatprep.subr.mxu0 %v8937_v0  ;;  %8047 = vmatprep.subr.mxu1 %v8937_v0  ;;  %v6300_v59 = vld [vmem:[%s11577_s2 + $0x398] sm:$0xff] }
 0x336   :  { %7954 = vmatprep.mubr.msk.f32.mxu0 %vm8938_vm1, %v8937_v0  ;;  %7993 = vmatprep.mubr.msk.f32.mxu1 %vm8938_vm1, %v8937_v0 }
 0x337   :  { %8009 = vmatpush3.msra.mxu0 %v6216_v14  ;;  %8048 = vmatpush3.msra.mxu1 %v6233_v44  ;;  %v6282_v14 = vld [vmem:[%s11577_s2 + $0x1b0] sm:$0xff] }
 0x338   :  { %7955 = vmatmul.mubr.msk.f32.gmra.mxu0 %vm65_vm0, %v1905_v63  ;;  %7994 = vmatmul.mubr.msk.f32.gmra.mxu1 %vm65_vm0, %v1905_v63  ;;  %v6299_v44 = vld [vmem:[%s11577_s2 + $0x390] sm:$0xff]  ;;  %v2593_v63 = vld [vmem:[#allocation3 + $0x1b] sm:$0xff] }
 0x339   :  { %8010 = vmatprep.subr.mxu0 %v8937_v0  ;;  %8049 = vmatprep.subr.mxu1 %v8937_v0 }
 0x33a   :  { %8011 = vmatpush3.msra.mxu0 %v6215_v15  ;;  %8050 = vmatpush3.msra.mxu1 %v6232_v18  ;;  %v6281_v15 = vld [vmem:[%s11577_s2 + $0x1a8] sm:$0xff] }
 0x33b   :  { %8012 = vmatprep.subr.mxu0 %v8937_v0  ;;  %8051 = vmatprep.subr.mxu1 %v8937_v0  ;;  %v6298_v18 = vld [vmem:[%s11577_s2 + $0x388] sm:$0xff] }
 0x33c   :  { %7957 = vmatprep.mubr.msk.f32.mxu0 %vm8938_vm1, %v8937_v0  ;;  %7996 = vmatprep.mubr.msk.f32.mxu1 %vm8938_vm1, %v8937_v0 }
 0x33d   :  { %8013 = vmatpush3.msra.mxu0 %v6214_v21  ;;  %8052 = vmatpush3.msra.mxu1 %v6231_v3  ;;  %v6280_v21 = vld [vmem:[%s11577_s2 + $0x1a0] sm:$0xff] }
 0x33e   :  { %7958 = vmatmul.mubr.msk.f32.gmra.mxu0 %vm65_vm0, %v1906_v56  ;;  %7997 = vmatmul.mubr.msk.f32.gmra.mxu1 %vm65_vm0, %v1906_v56  ;;  %v6297_v3 = vld [vmem:[%s11577_s2 + $0x380] sm:$0xff]  ;;  %v2594_v56 = vld [vmem:[#allocation3 + $0x23] sm:$0xf] }
 0x33f   :  { %8014 = vmatprep.subr.mxu0 %v8937_v0  ;;  %8053 = vmatprep.subr.mxu1 %v8937_v0 }
 0x340   :  { %8015 = vmatpush3.msra.mxu0 %v6213_v61  ;;  %8054 = vmatpush3.msra.mxu1 %v6230_v4  ;;  %v6279_v61 = vld [vmem:[%s11577_s2 + $0x198] sm:$0xff] }
 0x341   :  { %8016 = vmatprep.subr.mxu0 %v8937_v0  ;;  %8055 = vmatprep.subr.mxu1 %v8937_v0  ;;  %v6296_v4 = vld [vmem:[%s11577_s2 + $0x378] sm:$0xff] }
 0x342   :  { %7960 = vmatprep.mubr.msk.f32.mxu0 %vm8938_vm1, %v8937_v0  ;;  %7999 = vmatprep.mubr.msk.f32.mxu1 %vm8938_vm1, %v8937_v0 }
 0x343   :  { %8017 = vmatpush3.msra.mxu0 %v6212_v9  ;;  %8056 = vmatpush3.msra.mxu1 %v6229_v12  ;;  %v6278_v9 = vld [vmem:[%s11577_s2 + $0x190] sm:$0xff] }
 0x344   :  { %7961 = vmatmul.mubr.msk.f32.gmra.mxu0 %vm65_vm0, %v1907_v29  ;;  %8000 = vmatmul.mubr.msk.f32.gmra.mxu1 %vm65_vm0, %v1907_v29  ;;  %v6295_v12 = vld [vmem:[%s11577_s2 + $0x370] sm:$0xff]  ;;  %v6277_v29 = vld [vmem:[%s11577_s2 + $0x188] sm:$0xff] }
 0x345   :  { %8018 = vmatprep.subr.mxu0 %v8937_v0  ;;  %8057 = vmatprep.subr.mxu1 %v8937_v0 }
 0x346   :  { %8019 = vmatpush3.msra.mxu0 %v6211_v6  ;;  %8058 = vmatpush3.msra.mxu1 %v6228_v7  ;;  %v6294_v6 = vld [vmem:[%s11577_s2 + $0x368] sm:$0xff]  ;;  %v6276_v7 = vld [vmem:[%s11577_s2 + $0x180] sm:$0xff] }
 0x347   :  { %8020 = vmatprep.subr.mxu0 %v8937_v0  ;;  %8059 = vmatprep.subr.mxu1 %v8937_v0 }
 0x348   :  { %8021 = vmatpush3.msra.mxu0 %v6210_v16  ;;  %8060 = vmatpush3.msra.mxu1 %v6227_v17  ;;  %v6293_v16 = vld [vmem:[%s11577_s2 + $0x360] sm:$0xff]  ;;  %v2826_v17 = vld [vmem:[#allocation3 + $0x4] sm:$0xff] }
 0x349   :  { %8022 = vmatprep.subr.mxu0 %v8937_v0  ;;  %8061 = vmatprep.subr.mxu1 %v8937_v0 }
 0x34a   :  { %8023 = vmatpush3.msra.mxu0 %v6209_v22  ;;  %8062 = vmatpush3.msra.mxu1 %v6226_v19  ;;  %v2827_v22 = vld [vmem:[#allocation3 + $0xc] sm:$0xff]  ;;  %v2828_v19 = vld [vmem:[#allocation3 + $0x14] sm:$0xff] }
 0x34b   :  { %8024 = vmatprep.subr.mxu0 %v8937_v0  ;;  %8063 = vmatprep.subr.mxu1 %v8937_v0 }
 0x34c   :  { %8025 = vmatpush3.msra.mxu0 %v6208_v20  ;;  %8026 = vmatprep.mubr.msk.f32.mxu0 %vm8938_vm1, %v8937_v0  ;;  %v2829_v20 = vld [vmem:[#allocation3 + $0x1c] sm:$0xff] }
 0x34d   :  { %8064 = vmatpush3.msra.mxu1 %v6225_v8  ;;  %8065 = vmatprep.mubr.msk.f32.mxu1 %vm8938_vm1, %v8937_v0  ;;  %v2830_v8 = vld [vmem:[#allocation3 + $0x24] sm:$0xf] }
 0x34e   :  { %8027 = vmatmul.mubr.msk.f32.vlgmr.msra.gmra.mxu0 %vm65_vm0, %v2354_v13  ;;  %8066 = vmatmul.mubr.msk.f32.vlgmr.msra.gmra.mxu1 %vm65_vm0, %v2354_v13 }
 0x34f   :  { %8080 = vmatprep.subr.mxu0 %v8937_v0  ;;  %8119 = vmatprep.subr.mxu1 %v8937_v0 }
 0x350   :  { %8081 = vmatpush3.msra.mxu0 %v6253_v35  ;;  %8120 = vmatpush3.msra.mxu1 %v6270_v23 }
 0x351   :  { %8082 = vmatprep.subr.mxu0 %v8937_v0  ;;  %8121 = vmatprep.subr.mxu1 %v8937_v0 }
 0x352   :  { %8029 = vmatprep.mubr.msk.f32.mxu0 %vm8938_vm1, %v8937_v0  ;;  %8068 = vmatprep.mubr.msk.f32.mxu1 %vm8938_vm1, %v8937_v0 }
 0x353   :  { %8083 = vmatpush3.msra.mxu0 %v6252_v28  ;;  %8122 = vmatpush3.msra.mxu1 %v6269_v43 }
 0x354   :  { %8030 = vmatmul.mubr.msk.f32.gmra.mxu0 %vm65_vm0, %v2355_v31  ;;  %8069 = vmatmul.mubr.msk.f32.gmra.mxu1 %vm65_vm0, %v2355_v31 }
 0x355   :  { %8084 = vmatprep.subr.mxu0 %v8937_v0  ;;  %8123 = vmatprep.subr.mxu1 %v8937_v0 }
 0x356   :  { %8085 = vmatpush3.msra.mxu0 %v6251_v10  ;;  %8124 = vmatpush3.msra.mxu1 %v6268_v11 }
 0x357   :  { %8086 = vmatprep.subr.mxu0 %v8937_v0  ;;  %8125 = vmatprep.subr.mxu1 %v8937_v0 }
 0x358   :  { %8032 = vmatprep.mubr.msk.f32.mxu0 %vm8938_vm1, %v8937_v0  ;;  %8071 = vmatprep.mubr.msk.f32.mxu1 %vm8938_vm1, %v8937_v0 }
 0x359   :  { %8087 = vmatpush3.msra.mxu0 %v6250_v1  ;;  %8126 = vmatpush3.msra.mxu1 %v6267_v2 }
 0x35a   :  { %8033 = vmatmul.mubr.msk.f32.gmra.mxu0 %vm65_vm0, %v2356_v37  ;;  %8072 = vmatmul.mubr.msk.f32.gmra.mxu1 %vm65_vm0, %v2356_v37 }
 0x35b   :  { %8088 = vmatprep.subr.mxu0 %v8937_v0  ;;  %8127 = vmatprep.subr.mxu1 %v8937_v0 }
 0x35c   :  { %8089 = vmatpush3.msra.mxu0 %v6249_v51  ;;  %8128 = vmatpush3.msra.mxu1 %v6266_v41 }
 0x35d   :  { %8090 = vmatprep.subr.mxu0 %v8937_v0  ;;  %8129 = vmatprep.subr.mxu1 %v8937_v0 }
 0x35e   :  { %8035 = vmatprep.mubr.msk.f32.mxu0 %vm8938_vm1, %v8937_v0  ;;  %8074 = vmatprep.mubr.msk.f32.mxu1 %vm8938_vm1, %v8937_v0 }
 0x35f   :  { %8091 = vmatpush3.msra.mxu0 %v6248_v30  ;;  %8130 = vmatpush3.msra.mxu1 %v6265_v24 }
 0x360   :  { %8036 = vmatmul.mubr.msk.f32.gmra.mxu0 %vm65_vm0, %v2357_v32  ;;  %8075 = vmatmul.mubr.msk.f32.gmra.mxu1 %vm65_vm0, %v2357_v32 }
 0x361   :  { %8092 = vmatprep.subr.mxu0 %v8937_v0  ;;  %8131 = vmatprep.subr.mxu1 %v8937_v0 }
 0x362   :  { %8093 = vmatpush3.msra.mxu0 %v6247_v25  ;;  %8132 = vmatpush3.msra.mxu1 %v6264_v34 }
 0x363   :  { %8094 = vmatprep.subr.mxu0 %v8937_v0  ;;  %8133 = vmatprep.subr.mxu1 %v8937_v0 }
 0x364   :  { %8038 = vmatprep.mubr.msk.f32.mxu0 %vm8938_vm1, %v8937_v0  ;;  %8077 = vmatprep.mubr.msk.f32.mxu1 %vm8938_vm1, %v8937_v0 }
 0x365   :  { %8095 = vmatpush3.msra.mxu0 %v6246_v40  ;;  %8134 = vmatpush3.msra.mxu1 %v6263_v26 }
 0x366   :  { %8039 = vmatmul.mubr.msk.f32.gmra.mxu0 %vm65_vm0, %v2358_v27  ;;  %8078 = vmatmul.mubr.msk.f32.gmra.mxu1 %vm65_vm0, %v2358_v27 }
 0x367   :  { %8096 = vmatprep.subr.mxu0 %v8937_v0  ;;  %8135 = vmatprep.subr.mxu1 %v8937_v0 }
 0x368   :  { %8097 = vmatpush3.msra.mxu0 %v6245_v36  ;;  %8136 = vmatpush3.msra.mxu1 %v6262_v42 }
 0x369   :  { %8098 = vmatprep.subr.mxu0 %v8937_v0  ;;  %8137 = vmatprep.subr.mxu1 %v8937_v0 }
 0x36a   :  { %8099 = vmatpush3.msra.mxu0 %v6244_v33  ;;  %8138 = vmatpush3.msra.mxu1 %v6261_v57 }
 0x36b   :  { %8100 = vmatprep.subr.mxu0 %v8937_v0  ;;  %8139 = vmatprep.subr.mxu1 %v8937_v0 }
 0x36c   :  { %8101 = vmatpush3.msra.mxu0 %v6243_v45  ;;  %8140 = vmatpush3.msra.mxu1 %v6260_v46  ;;  %v3067_v46 = vld [vmem:[%s11582_s7] sm:$0xff] }
 0x36d   :  { %8102 = vmatprep.subr.mxu0 %v8937_v0  ;;  %8141 = vmatprep.subr.mxu1 %v8937_v0 }
 0x36e   :  { %8103 = vmatpush3.msra.mxu0 %v6242_v60  ;;  %8104 = vmatprep.mubr.msk.f32.mxu0 %vm8938_vm1, %v8937_v0  ;;  %v6313_v60 = vld [vmem:[%s11582_s7 + $0x10] sm:$0xff] }
 0x36f   :  { %8142 = vmatpush3.msra.mxu1 %v6259_v47  ;;  %8143 = vmatprep.mubr.msk.f32.mxu1 %vm8938_vm1, %v8937_v0 }
 0x370   :  { %8105 = vmatmul.mubr.msk.f32.vlgmr.msra.gmra.mxu0 %vm65_vm0, %v2590_v38  ;;  %8144 = vmatmul.mubr.msk.f32.vlgmr.msra.gmra.mxu1 %vm65_vm0, %v2590_v38 }
 0x371   :  { %8158 = vmatprep.subr.mxu0 %v8937_v0  ;;  %8197 = vmatprep.subr.mxu1 %v8937_v0 }
 0x372   :  { %8159 = vmatpush3.msra.mxu0 %v6287_v48  ;;  %8198 = vmatpush3.msra.mxu1 %v6304_v49 }
 0x373   :  { %8160 = vmatprep.subr.mxu0 %v8937_v0  ;;  %8199 = vmatprep.subr.mxu1 %v8937_v0 }
 0x374   :  { %8107 = vmatprep.mubr.msk.f32.mxu0 %vm8938_vm1, %v8937_v0  ;;  %8146 = vmatprep.mubr.msk.f32.mxu1 %vm8938_vm1, %v8937_v0 }
 0x375   :  { %8161 = vmatpush3.msra.mxu0 %v6286_v50  ;;  %8200 = vmatpush3.msra.mxu1 %v6303_v55 }
 0x376   :  { %8108 = vmatmul.mubr.msk.f32.gmra.mxu0 %vm65_vm0, %v2591_v52  ;;  %8147 = vmatmul.mubr.msk.f32.gmra.mxu1 %vm65_vm0, %v2591_v52 }
 0x377   :  { %8162 = vmatprep.subr.mxu0 %v8937_v0  ;;  %8201 = vmatprep.subr.mxu1 %v8937_v0 }
 0x378   :  { %8163 = vmatpush3.msra.mxu0 %v6285_v53  ;;  %8202 = vmatpush3.msra.mxu1 %v6302_v39 }
 0x379   :  { %8164 = vmatprep.subr.mxu0 %v8937_v0  ;;  %8203 = vmatprep.subr.mxu1 %v8937_v0 }
 0x37a   :  { %8110 = vmatprep.mubr.msk.f32.mxu0 %vm8938_vm1, %v8937_v0  ;;  %8149 = vmatprep.mubr.msk.f32.mxu1 %vm8938_vm1, %v8937_v0 }
 0x37b   :  { %8165 = vmatpush3.msra.mxu0 %v6284_v54  ;;  %8204 = vmatpush3.msra.mxu1 %v6301_v62 }
 0x37c   :  { %8111 = vmatmul.mubr.msk.f32.gmra.mxu0 %vm65_vm0, %v2592_v5  ;;  %8150 = vmatmul.mubr.msk.f32.gmra.mxu1 %vm65_vm0, %v2592_v5 }
 0x37d   :  { %8166 = vmatprep.subr.mxu0 %v8937_v0  ;;  %8205 = vmatprep.subr.mxu1 %v8937_v0 }
 0x37e   :  { %8167 = vmatpush3.msra.mxu0 %v6283_v58  ;;  %8206 = vmatpush3.msra.mxu1 %v6300_v59 }
 0x37f   :  { %8168 = vmatprep.subr.mxu0 %v8937_v0  ;;  %8207 = vmatprep.subr.mxu1 %v8937_v0 }
 0x380   :  { %8113 = vmatprep.mubr.msk.f32.mxu0 %vm8938_vm1, %v8937_v0  ;;  %8152 = vmatprep.mubr.msk.f32.mxu1 %vm8938_vm1, %v8937_v0 }
 0x381   :  { %8169 = vmatpush3.msra.mxu0 %v6282_v14  ;;  %8208 = vmatpush3.msra.mxu1 %v6299_v44 }
 0x382   :  { %8114 = vmatmul.mubr.msk.f32.gmra.mxu0 %vm65_vm0, %v2593_v63  ;;  %8153 = vmatmul.mubr.msk.f32.gmra.mxu1 %vm65_vm0, %v2593_v63 }
 0x383   :  { %8170 = vmatprep.subr.mxu0 %v8937_v0  ;;  %8209 = vmatprep.subr.mxu1 %v8937_v0 }
 0x384   :  { %8171 = vmatpush3.msra.mxu0 %v6281_v15  ;;  %8210 = vmatpush3.msra.mxu1 %v6298_v18 }
 0x385   :  { %8172 = vmatprep.subr.mxu0 %v8937_v0  ;;  %8211 = vmatprep.subr.mxu1 %v8937_v0 }
 0x386   :  { %8116 = vmatprep.mubr.msk.f32.mxu0 %vm8938_vm1, %v8937_v0  ;;  %8155 = vmatprep.mubr.msk.f32.mxu1 %vm8938_vm1, %v8937_v0 }
 0x387   :  { %8173 = vmatpush3.msra.mxu0 %v6280_v21  ;;  %8212 = vmatpush3.msra.mxu1 %v6297_v3 }
 0x388   :  { %8117 = vmatmul.mubr.msk.f32.gmra.mxu0 %vm65_vm0, %v2594_v56  ;;  %8156 = vmatmul.mubr.msk.f32.gmra.mxu1 %vm65_vm0, %v2594_v56 }
 0x389   :  { %8174 = vmatprep.subr.mxu0 %v8937_v0  ;;  %8213 = vmatprep.subr.mxu1 %v8937_v0 }
 0x38a   :  { %8175 = vmatpush3.msra.mxu0 %v6279_v61  ;;  %8214 = vmatpush3.msra.mxu1 %v6296_v4 }
 0x38b   :  { %8176 = vmatprep.subr.mxu0 %v8937_v0  ;;  %8215 = vmatprep.subr.mxu1 %v8937_v0 }
 0x38c   :  { %8177 = vmatpush3.msra.mxu0 %v6278_v9  ;;  %8216 = vmatpush3.msra.mxu1 %v6295_v12 }
 0x38d   :  { %8178 = vmatprep.subr.mxu0 %v8937_v0  ;;  %8217 = vmatprep.subr.mxu1 %v8937_v0 }
 0x38e   :  { %8179 = vmatpush3.msra.mxu0 %v6277_v29  ;;  %8218 = vmatpush3.msra.mxu1 %v6294_v6 }
 0x38f   :  { %8180 = vmatprep.subr.mxu0 %v8937_v0  ;;  %8219 = vmatprep.subr.mxu1 %v8937_v0 }
 0x390   :  { %8181 = vmatpush3.msra.mxu0 %v6276_v7  ;;  %8182 = vmatprep.mubr.msk.f32.mxu0 %vm8938_vm1, %v8937_v0 }
 0x391   :  { %8220 = vmatpush3.msra.mxu1 %v6293_v16  ;;  %8221 = vmatprep.mubr.msk.f32.mxu1 %vm8938_vm1, %v8937_v0 }
 0x392   :  { %8183 = vmatmul.mubr.msk.f32.vlgmr.msra.gmra.mxu0 %vm65_vm0, %v2826_v17  ;;  %8222 = vmatmul.mubr.msk.f32.vlgmr.msra.gmra.mxu1 %vm65_vm0, %v2826_v17 }
 0x393   :  { %8185 = vmatprep.mubr.msk.f32.mxu0 %vm8938_vm1, %v8937_v0  ;;  %8224 = vmatprep.mubr.msk.f32.mxu1 %vm8938_vm1, %v8937_v0 }
 0x396   :  { %8186 = vmatmul.mubr.msk.f32.gmra.mxu0 %vm65_vm0, %v2827_v22  ;;  %8225 = vmatmul.mubr.msk.f32.gmra.mxu1 %vm65_vm0, %v2827_v22 }
 0x397   :  { %8188 = vmatprep.mubr.msk.f32.mxu0 %vm8938_vm1, %v8937_v0  ;;  %8227 = vmatprep.mubr.msk.f32.mxu1 %vm8938_vm1, %v8937_v0 }
 0x39a   :  { %8189 = vmatmul.mubr.msk.f32.gmra.mxu0 %vm65_vm0, %v2828_v19  ;;  %8228 = vmatmul.mubr.msk.f32.gmra.mxu1 %vm65_vm0, %v2828_v19 }
 0x39b   :  { %8191 = vmatprep.mubr.msk.f32.mxu0 %vm8938_vm1, %v8937_v0  ;;  %8230 = vmatprep.mubr.msk.f32.mxu1 %vm8938_vm1, %v8937_v0 }
 0x39e   :  { %8192 = vmatmul.mubr.msk.f32.gmra.mxu0 %vm65_vm0, %v2829_v20  ;;  %8231 = vmatmul.mubr.msk.f32.gmra.mxu1 %vm65_vm0, %v2829_v20 }
 0x39f   :  { %8194 = vmatprep.mubr.msk.f32.mxu0 %vm8938_vm1, %v8937_v0  ;;  %8233 = vmatprep.mubr.msk.f32.mxu1 %vm8938_vm1, %v8937_v0 }
 0x3a2   :  { %8195 = vmatmul.mubr.msk.f32.gmra.mxu0 %vm65_vm0, %v2830_v8  ;;  %8234 = vmatmul.mubr.msk.f32.gmra.mxu1 %vm65_vm0, %v2830_v8 }
 0x3a3   :  { %8246 = vmatprep.mubr.msk.f32.mxu0 %vm3069_vm7, %v3067_v46  ;;  %8259 = vmatprep.mubr.msk.f32.mxu1 %vm3069_vm7, %v6313_v60 }
 0x3cb   :  { %v2032_v13 = vpop.f32.mrf.mxu0  ;;  %v2135_v35 = vpop.f32.mrf.mxu1 }
 0x3cd   :  { %v7872_v23 = vpop.f32.mrf.mxu0  ;;  %v7911_v28 = vpop.f32.mrf.mxu1 }
 0x3d1   :  { %v2037_v43 = vpop.f32.mrf.mxu0  ;;  %v2140_v31 = vpop.f32.mrf.mxu1 }
 0x3d3   :  { %v7875_v10 = vpop.f32.mrf.mxu0  ;;  %v7914_v11 = vpop.f32.mrf.mxu1 }
 0x3d7   :  { %v2042_v1 = vpop.f32.mrf.mxu0  ;;  %v2145_v2 = vpop.f32.mrf.mxu1 }
 0x3d9   :  { %v7878_v37 = vpop.f32.mrf.mxu0  ;;  %v7917_v51 = vpop.f32.mrf.mxu1 }
 0x3dd   :  { %v2047_v41 = vpop.f32.mrf.mxu0  ;;  %v2150_v30 = vpop.f32.mrf.mxu1 }
 0x3df   :  { %v7881_v24 = vpop.f32.mrf.mxu0  ;;  %v7920_v32 = vpop.f32.mrf.mxu1 }
 0x3e3   :  { %v2052_v25 = vpop.f32.mrf.mxu0  ;;  %v2155_v34 = vpop.f32.mrf.mxu1 }
 0x3e5   :  { %v7884_v40 = vpop.f32.mrf.mxu0  ;;  %v7923_v26 = vpop.f32.mrf.mxu1 }
 0x3ec   :  { %v2240_v27 = vpop.f32.mrf.mxu0  ;;  %v2330_v36 = vpop.f32.mrf.mxu1 }
 0x3ed   :  { %v2241_v42 = vadd.f32 %v2240_v27, %v2032_v13  ;;  %v2331_v33 = vadd.f32 %v2330_v36, %v2135_v35 }
 0x3ee   :  { %v7950_v57 = vpop.f32.mrf.mxu0  ;;  %v7989_v45 = vpop.f32.mrf.mxu1 }
 0x3f2   :  { %v2245_v47 = vpop.f32.mrf.mxu0  ;;  %v2335_v38 = vpop.f32.mrf.mxu1 }
 0x3f3   :  { %v2246_v48 = vadd.f32 %v2245_v47, %v2037_v43  ;;  %v2336_v49 = vadd.f32 %v2335_v38, %v2140_v31 }
 0x3f4   :  { %v7953_v50 = vpop.f32.mrf.mxu0  ;;  %v7992_v55 = vpop.f32.mrf.mxu1 }
 0x3f8   :  { %v2250_v52 = vpop.f32.mrf.mxu0  ;;  %v2340_v53 = vpop.f32.mrf.mxu1 }
 0x3f9   :  { %v2251_v39 = vadd.f32 %v2250_v52, %v2042_v1  ;;  %v2341_v54 = vadd.f32 %v2340_v53, %v2145_v2 }
 0x3fa   :  { %v7956_v62 = vpop.f32.mrf.mxu0  ;;  %v7995_v5 = vpop.f32.mrf.mxu1 }
 0x3fe   :  { %v2255_v58 = vpop.f32.mrf.mxu0  ;;  %v2345_v59 = vpop.f32.mrf.mxu1 }
 0x3ff   :  { %v2256_v14 = vadd.f32 %v2255_v58, %v2047_v41  ;;  %v2346_v44 = vadd.f32 %v2345_v59, %v2150_v30 }
 0x400   :  { %v7959_v63 = vpop.f32.mrf.mxu0  ;;  %v7998_v15 = vpop.f32.mrf.mxu1 }
 0x404   :  { %v2260_v18 = vpop.f32.mrf.mxu0  ;;  %v2350_v21 = vpop.f32.mrf.mxu1 }
 0x405   :  { %v10585_v3 = vadd.f32 %v2260_v18, %v2052_v25  ;;  %v10587_v56 = vadd.f32 %v2350_v21, %v2155_v34 }
 0x406   :  { %v7962_v61 = vpop.f32.mrf.mxu0  ;;  %v8001_v4 = vpop.f32.mrf.mxu1 }
 0x40e   :  { %v2453_v9 = vpop.f32.mrf.mxu0  ;;  %v2556_v12 = vpop.f32.mrf.mxu1 }
 0x40f   :  { %v2580_v29 = vadd.f32 %v2453_v9, %v2241_v42  ;;  %v2585_v6 = vadd.f32 %v2556_v12, %v2331_v33 }
 0x410   :  { %v8028_v7 = vpop.f32.mrf.mxu0  ;;  %v8067_v16 = vpop.f32.mrf.mxu1 }
 0x414   :  { %v2458_v17 = vpop.f32.mrf.mxu0  ;;  %v2561_v22 = vpop.f32.mrf.mxu1 }
 0x415   :  { %v2581_v19 = vadd.f32 %v2458_v17, %v2246_v48  ;;  %v2586_v20 = vadd.f32 %v2561_v22, %v2336_v49 }
 0x416   :  { %v8031_v8 = vpop.f32.mrf.mxu0  ;;  %v8070_v13 = vpop.f32.mrf.mxu1 }
 0x41a   :  { %v2463_v35 = vpop.f32.mrf.mxu0  ;;  %v2566_v23 = vpop.f32.mrf.mxu1 }
 0x41b   :  { %v2582_v28 = vadd.f32 %v2463_v35, %v2251_v39  ;;  %v2587_v43 = vadd.f32 %v2566_v23, %v2341_v54 }
 0x41c   :  { %v8034_v31 = vpop.f32.mrf.mxu0  ;;  %v8073_v10 = vpop.f32.mrf.mxu1 }
 0x420   :  { %v2468_v11 = vpop.f32.mrf.mxu0  ;;  %v2571_v1 = vpop.f32.mrf.mxu1 }
 0x421   :  { %v2583_v2 = vadd.f32 %v2468_v11, %v2256_v14  ;;  %v2588_v37 = vadd.f32 %v2571_v1, %v2346_v44 }
 0x422   :  { %v8037_v51 = vpop.f32.mrf.mxu0  ;;  %v8076_v41 = vpop.f32.mrf.mxu1 }
 0x426   :  { %v2473_v30 = vpop.f32.mrf.mxu0  ;;  %v2576_v24 = vpop.f32.mrf.mxu1 }
 0x427   :  { %v2584_v51 = vadd.f32 %v2473_v30, %v10585_v3  ;;  %v2589_v41 = vadd.f32 %v2576_v24, %v10587_v56  ;;  %v3068_v3 = vld [vmem:[%s11582_s7 + $0x8] sm:$0xff]  ;;  %v6314_v56 = vld [vmem:[%s11582_s7 + $0x18] sm:$0xff] }
 0x428   :  { %v8040_v32 = vpop.f32.mrf.mxu0  ;;  %v8079_v25 = vpop.f32.mrf.mxu1  ;;  %v6342_v30 = vld [vmem:[%s11578_s3 + $0xb8] sm:$0xff] }
 0x429   :  { %v6357_v24 = vld [vmem:[%s11578_s3 + $0x298] sm:$0xff] }
 0x430   :  { %v2689_v34 = vpop.f32.mrf.mxu0  ;;  %v2792_v40 = vpop.f32.mrf.mxu1 }
 0x431   :  { %v2816_v54 = vadd.f32 %v2689_v34, %v2580_v29  ;;  %v2821_v62 = vadd.f32 %v2792_v40, %v2585_v6 }
 0x432   :  { %v8106_v26 = vpop.f32.mrf.mxu0  ;;  %v8145_v27 = vpop.f32.mrf.mxu1 }
 0x436   :  { %v2694_v36 = vpop.f32.mrf.mxu0  ;;  %v2797_v42 = vpop.f32.mrf.mxu1 }
 0x437   :  { %v2817_v15 = vadd.f32 %v2694_v36, %v2581_v19  ;;  %v2822_v18 = vadd.f32 %v2797_v42, %v2586_v20 }
 0x438   :  { %v8109_v33 = vpop.f32.mrf.mxu0  ;;  %v8148_v57 = vpop.f32.mrf.mxu1 }
 0x43c   :  { %v2699_v45 = vpop.f32.mrf.mxu0  ;;  %v2802_v46 = vpop.f32.mrf.mxu1 }
 0x43d   :  { %v2818_v17 = vadd.f32 %v2699_v45, %v2582_v28  ;;  %v2823_v22 = vadd.f32 %v2802_v46, %v2587_v43  ;;  %v6341_v45 = vld [vmem:[%s11578_s3 + $0xb0] sm:$0xff] }
 0x43e   :  { %v8112_v60 = vpop.f32.mrf.mxu0  ;;  %v8151_v47 = vpop.f32.mrf.mxu1  ;;  %v6356_v46 = vld [vmem:[%s11578_s3 + $0x290] sm:$0xff] }
 0x43f   :  { %v6340_v60 = vld [vmem:[%s11578_s3 + $0xa8] sm:$0xff] }
 0x440   :  { %v6355_v47 = vld [vmem:[%s11578_s3 + $0x288] sm:$0xff] }
 0x442   :  { %v2704_v38 = vpop.f32.mrf.mxu0  ;;  %v2807_v48 = vpop.f32.mrf.mxu1 }
 0x443   :  { %v2819_v10 = vadd.f32 %v2704_v38, %v2583_v2  ;;  %v2824_v11 = vadd.f32 %v2807_v48, %v2588_v37  ;;  %v6339_v38 = vld [vmem:[%s11578_s3 + $0xa0] sm:$0xff] }
 0x444   :  { %v8115_v49 = vpop.f32.mrf.mxu0  ;;  %v8154_v50 = vpop.f32.mrf.mxu1  ;;  %v6354_v48 = vld [vmem:[%s11578_s3 + $0x280] sm:$0xff] }
 0x445   :  { %v6338_v49 = vld [vmem:[%s11578_s3 + $0x98] sm:$0xff] }
 0x446   :  { %v6353_v50 = vld [vmem:[%s11578_s3 + $0x278] sm:$0xff] }
 0x448   :  { %v2709_v55 = vpop.f32.mrf.mxu0  ;;  %v2812_v52 = vpop.f32.mrf.mxu1 }
 0x449   :  { %v2820_v34 = vadd.f32 %v2709_v55, %v2584_v51  ;;  %v2825_v40 = vadd.f32 %v2812_v52, %v2589_v41  ;;  %v6337_v55 = vld [vmem:[%s11578_s3 + $0x90] sm:$0xff]  ;;  %v3266_v51 = vld [vmem:[%s11578_s3 + $0x38] sm:$0xff] }
 0x44a   :  { %v8118_v53 = vpop.f32.mrf.mxu0  ;;  %v8157_v39 = vpop.f32.mrf.mxu1  ;;  %v6352_v52 = vld [vmem:[%s11578_s3 + $0x270] sm:$0xff]  ;;  %v6326_v41 = vld [vmem:[%s11578_s3 + $0x218] sm:$0xff] }
 0x44b   :  { %v6336_v53 = vld [vmem:[%s11578_s3 + $0x88] sm:$0xff] }
 0x44c   :  { %v6351_v39 = vld [vmem:[%s11578_s3 + $0x268] sm:$0xff] }
 0x452   :  { %v2925_v5 = vpop.f32.mrf.mxu0  ;;  %v3028_v58 = vpop.f32.mrf.mxu1 }
 0x453   :  { %v3052_v59 = vadd.f32 %v2925_v5, %v2816_v54  ;;  %v3057_v14 = vadd.f32 %v3028_v58, %v2821_v62  ;;  %v6335_v54 = vld [vmem:[%s11578_s3 + $0x80] sm:$0xff]  ;;  %v6334_v5 = vld [vmem:[%s11578_s3 + $0x78] sm:$0xff] }
 0x454   :  { %v8184_v44 = vpop.f32.mrf.mxu0  ;;  %v8223_v63 = vpop.f32.mrf.mxu1  ;;  %v6350_v62 = vld [vmem:[%s11578_s3 + $0x260] sm:$0xff]  ;;  %v6349_v58 = vld [vmem:[%s11578_s3 + $0x258] sm:$0xff] }
 0x455   :  { %v3062_v21 = vmax.f32 %v3052_v59, %v3057_v14  ;;  %v6333_v59 = vld [vmem:[%s11578_s3 + $0x70] sm:$0xff]  ;;  %v6332_v44 = vld [vmem:[%s11578_s3 + $0x68] sm:$0xff] }
 0x456   :  { %v2930_v61 = vpop.f32.mrf.mxu0  ;;  %v3033_v4 = vpop.f32.mrf.mxu1  ;;  %v6348_v14 = vld [vmem:[%s11578_s3 + $0x250] sm:$0xff]  ;;  %v6347_v63 = vld [vmem:[%s11578_s3 + $0x248] sm:$0xff] }
 0x457   :  { %v3053_v9 = vadd.f32 %v2930_v61, %v2817_v15  ;;  %v3058_v12 = vadd.f32 %v3033_v4, %v2822_v18  ;;  %v6331_v15 = vld [vmem:[%s11578_s3 + $0x60] sm:$0xff] }
 0x458   :  { %v8187_v7 = vpop.f32.mrf.mxu0  ;;  %v8226_v16 = vpop.f32.mrf.mxu1  ;;  %v6346_v18 = vld [vmem:[%s11578_s3 + $0x240] sm:$0xff] }
 0x459   :  { %v3063_v8 = vmax.f32 %v3053_v9, %v3058_v12  ;;  %v6318_v4 = vld [vmem:[%s11586_s11] ss:$0 sm:$0xff] }
 0x45a   :  { %v2935_v29 = vpop.f32.mrf.mxu0  ;;  %v3038_v6 = vpop.f32.mrf.mxu1 }
 0x45b   :  { %v3054_v13 = vadd.f32 %v2935_v29, %v2818_v17  ;;  %v3059_v35 = vadd.f32 %v3038_v6, %v2823_v22  ;;  %v3270_v6 = vld [vmem:[%s11578_s3 + $0x58] sm:$0xff] }
 0x45c   :  { %v8190_v23 = vpop.f32.mrf.mxu0  ;;  %v8229_v31 = vpop.f32.mrf.mxu1 }
 0x45d   :  { %v3064_v19 = vmax.f32 %v3054_v13, %v3059_v35  ;;  %v6330_v13 = vld [vmem:[%s11578_s3 + $0x238] sm:$0xff]  ;;  %v3269_v23 = vld [vmem:[%s11578_s3 + $0x50] sm:$0xff] }
 0x45e   :  { %v2940_v20 = vpop.f32.mrf.mxu0  ;;  %v3043_v1 = vpop.f32.mrf.mxu1  ;;  %v6329_v31 = vld [vmem:[%s11578_s3 + $0x230] sm:$0xff] }
 0x45f   :  { %v3055_v32 = vadd.f32 %v2940_v20, %v2819_v10  ;;  %v3060_v25 = vadd.f32 %v3043_v1, %v2824_v11  ;;  %v3268_v10 = vld [vmem:[%s11578_s3 + $0x48] sm:$0xff]  ;;  %v3267_v20 = vld [vmem:[%s11578_s3 + $0x40] sm:$0xff] }
 0x460   :  { %v8193_v28 = vpop.f32.mrf.mxu0  ;;  %v8232_v43 = vpop.f32.mrf.mxu1  ;;  %v6328_v11 = vld [vmem:[%s11578_s3 + $0x228] sm:$0xff]  ;;  %v6327_v1 = vld [vmem:[%s11578_s3 + $0x220] sm:$0xff] }
 0x461   :  { %v3065_v26 = vmax.f32 %v3055_v32, %v3060_v25  ;;  %v3265_v25 = vld [vmem:[%s11578_s3 + $0x30] sm:$0xff]  ;;  %v3264_v43 = vld [vmem:[%s11578_s3 + $0x28] sm:$0xff] }
 0x462   :  { %v2945_v27 = vpop.f32.mrf.mxu0  ;;  %v3048_v36 = vpop.f32.mrf.mxu1  ;;  %v6325_v28 = vld [vmem:[%s11578_s3 + $0x210] sm:$0xff] }
 0x463   :  { %v3056_v42 = vadd.f32 %v2945_v27, %v2820_v34  ;;  %v3061_v33 = vadd.f32 %v3048_v36, %v2825_v40  ;;  %v6324_v34 = vld [vmem:[%s11578_s3 + $0x208] sm:$0xff]  ;;  %v3263_v40 = vld [vmem:[%s11578_s3 + $0x20] sm:$0xff]  ;;  %v3262_v27 = vld [vmem:[%s11578_s3 + $0x18] sm:$0xff] }
 0x464   :  { %v8196_v2 = vpop.f32.mrf.mxu0  ;;  %v8235_v37 = vpop.f32.mrf.mxu1  ;;  %v6322_v36 = vld [vmem:[%s11578_s3 + $0x1f8] sm:$0xff] }
 0x465   :  { %v3066_v57 = vmax.f32 %v3056_v42, %v3061_v33  ;;  %v3261_v42 = vld [vmem:[%s11578_s3 + $0x10] sm:$0xff]  ;;  %v3260_v2 = vld [vmem:[%s11578_s3 + $0x8] sm:$0xff] }
 0x466   :  { %v6321_v33 = vld [vmem:[%s11578_s3 + $0x1f0] sm:$0xff]  ;;  %v6320_v37 = vld [vmem:[%s11578_s3 + $0x1e8] sm:$0xff] }
 0x467   :  { %8236 = vmatprep.subr.msk.mxu0 %vm1684_vm6, %v3066_v57  ;;  %8249 = vmatprep.subr.msk.mxu1 %vm1684_vm6, %v3066_v57 }
 0x468   :  { %8237 = vmatpush3.msk.msra.mxu0 %vm1684_vm6, %v3066_v57  ;;  %8250 = vmatpush3.msk.msra.mxu1 %vm1684_vm6, %v3066_v57  ;;  %v3259_v57 = vld [vmem:[%s11578_s3] sm:$0xff] }
 0x469   :  { %8238 = vmatprep.subr.mxu0 %v3065_v26  ;;  %8251 = vmatprep.subr.mxu1 %v3065_v26 }
 0x46a   :  { %8239 = vmatpush3.msra.mxu0 %v3065_v26  ;;  %8252 = vmatpush3.msra.mxu1 %v3065_v26  ;;  %v6323_v26 = vld [vmem:[%s11578_s3 + $0x200] sm:$0xff] }
 0x46b   :  { %8240 = vmatprep.subr.mxu0 %v3064_v19  ;;  %8253 = vmatprep.subr.mxu1 %v3064_v19 }
 0x46c   :  { %8241 = vmatpush3.msra.mxu0 %v3064_v19  ;;  %8254 = vmatpush3.msra.mxu1 %v3064_v19 }
 0x46d   :  { %8242 = vmatprep.subr.mxu0 %v3063_v8  ;;  %8255 = vmatprep.subr.mxu1 %v3063_v8 }
 0x46e   :  { %8243 = vmatpush3.msra.mxu0 %v3063_v8  ;;  %8256 = vmatpush3.msra.mxu1 %v3063_v8 }
 0x46f   :  { %8244 = vmatprep.subr.mxu0 %v3062_v21  ;;  %8257 = vmatprep.subr.mxu1 %v3062_v21 }
 0x470   :  { %8245 = vmatpush3.msra.mxu0 %v3062_v21  ;;  %8258 = vmatpush3.msra.mxu1 %v3062_v21 }
 0x471   :  { %8247 = vmatmul.mubr.msk.f32.vlgmr.msra.gmra.mxu0 %vm3069_vm7, %v3068_v3  ;;  %8260 = vmatmul.mubr.msk.f32.vlgmr.msra.gmra.mxu1 %vm3069_vm7, %v6314_v56  ;;  %v6319_v3 = vld [vmem:[%s11578_s3 + $0x1e0] sm:$0xff] }
 0x472   :  { %8262 = vmatprep.subr.mxu0 %v8937_v0  ;;  %8295 = vmatprep.subr.mxu1 %v8937_v0 }
 0x473   :  { %8286 = vmatprep.mubr.msk.f32.mxu0 %vm8938_vm1, %v8937_v0  ;;  %8319 = vmatprep.mubr.msk.f32.mxu1 %vm8938_vm1, %v8937_v0 }
 0x474   :  { %8263 = vmatpush3.msra.mxu0 %v6342_v30  ;;  %8296 = vmatpush3.msra.mxu1 %v6357_v24  ;;  %v6378_v30 = vld [vmem:[%s11578_s3 + $0x118] sm:$0xff] }
 0x475   :  { %8264 = vmatprep.subr.mxu0 %v8937_v0  ;;  %8297 = vmatprep.subr.mxu1 %v8937_v0  ;;  %v6393_v24 = vld [vmem:[%s11578_s3 + $0x2f8] sm:$0xff] }
 0x476   :  { %8265 = vmatpush3.msra.mxu0 %v6341_v45  ;;  %8298 = vmatpush3.msra.mxu1 %v6356_v46  ;;  %v6377_v45 = vld [vmem:[%s11578_s3 + $0x110] sm:$0xff] }
 0x477   :  { %8266 = vmatprep.subr.mxu0 %v8937_v0  ;;  %8299 = vmatprep.subr.mxu1 %v8937_v0  ;;  %v6392_v46 = vld [vmem:[%s11578_s3 + $0x2f0] sm:$0xff] }
 0x478   :  { %8267 = vmatpush3.msra.mxu0 %v6340_v60  ;;  %8300 = vmatpush3.msra.mxu1 %v6355_v47  ;;  %v6376_v47 = vld [vmem:[%s11578_s3 + $0x108] sm:$0xff] }
 0x479   :  { %8268 = vmatprep.subr.mxu0 %v8937_v0  ;;  %8301 = vmatprep.subr.mxu1 %v8937_v0 }
 0x47a   :  { %8269 = vmatpush3.msra.mxu0 %v6339_v38  ;;  %8302 = vmatpush3.msra.mxu1 %v6354_v48  ;;  %v6391_v38 = vld [vmem:[%s11578_s3 + $0x2e8] sm:$0xff]  ;;  %v6375_v48 = vld [vmem:[%s11578_s3 + $0x100] sm:$0xff] }
 0x47b   :  { %8270 = vmatprep.subr.mxu0 %v8937_v0  ;;  %8303 = vmatprep.subr.mxu1 %v8937_v0 }
 0x47c   :  { %8271 = vmatpush3.msra.mxu0 %v6338_v49  ;;  %8304 = vmatpush3.msra.mxu1 %v6353_v50  ;;  %v6390_v49 = vld [vmem:[%s11578_s3 + $0x2e0] sm:$0xff] }
 0x47d   :  { %8272 = vmatprep.subr.mxu0 %v8937_v0  ;;  %8305 = vmatprep.subr.mxu1 %v8937_v0 }
 0x47e   :  { %8273 = vmatpush3.msra.mxu0 %v6337_v55  ;;  %8306 = vmatpush3.msra.mxu1 %v6352_v52  ;;  %v6374_v55 = vld [vmem:[%s11578_s3 + $0xf8] sm:$0xff] }
 0x47f   :  { %8274 = vmatprep.subr.mxu0 %v8937_v0  ;;  %8307 = vmatprep.subr.mxu1 %v8937_v0  ;;  %v6389_v52 = vld [vmem:[%s11578_s3 + $0x2d8] sm:$0xff] }
 0x480   :  { %8275 = vmatpush3.msra.mxu0 %v6336_v53  ;;  %8308 = vmatpush3.msra.mxu1 %v6351_v39  ;;  %v6373_v53 = vld [vmem:[%s11578_s3 + $0xf0] sm:$0xff] }
 0x481   :  { %8276 = vmatprep.subr.mxu0 %v8937_v0  ;;  %8309 = vmatprep.subr.mxu1 %v8937_v0  ;;  %v6388_v39 = vld [vmem:[%s11578_s3 + $0x2d0] sm:$0xff] }
 0x482   :  { %8277 = vmatpush3.msra.mxu0 %v6335_v54  ;;  %8310 = vmatpush3.msra.mxu1 %v6350_v62  ;;  %v6372_v54 = vld [vmem:[%s11578_s3 + $0xe8] sm:$0xff] }
 0x483   :  { %8278 = vmatprep.subr.mxu0 %v8937_v0  ;;  %8311 = vmatprep.subr.mxu1 %v8937_v0  ;;  %v6387_v62 = vld [vmem:[%s11578_s3 + $0x2c8] sm:$0xff] }
 0x484   :  { %8279 = vmatpush3.msra.mxu0 %v6334_v5  ;;  %8312 = vmatpush3.msra.mxu1 %v6349_v58  ;;  %v6371_v5 = vld [vmem:[%s11578_s3 + $0xe0] sm:$0xff] }
 0x485   :  { %8280 = vmatprep.subr.mxu0 %v8937_v0  ;;  %8313 = vmatprep.subr.mxu1 %v8937_v0  ;;  %v6386_v58 = vld [vmem:[%s11578_s3 + $0x2c0] sm:$0xff] }
 0x486   :  { %8281 = vmatpush3.msra.mxu0 %v6333_v59  ;;  %8314 = vmatpush3.msra.mxu1 %v6348_v14  ;;  %v6370_v59 = vld [vmem:[%s11578_s3 + $0xd8] sm:$0xff] }
 0x487   :  { %8282 = vmatprep.subr.mxu0 %v8937_v0  ;;  %8315 = vmatprep.subr.mxu1 %v8937_v0  ;;  %v6385_v14 = vld [vmem:[%s11578_s3 + $0x2b8] sm:$0xff] }
 0x488   :  { %8283 = vmatpush3.msra.mxu0 %v6332_v44  ;;  %8316 = vmatpush3.msra.mxu1 %v6347_v63  ;;  %v6369_v44 = vld [vmem:[%s11578_s3 + $0xd0] sm:$0xff] }
 0x489   :  { %8284 = vmatprep.subr.mxu0 %v8937_v0  ;;  %8317 = vmatprep.subr.mxu1 %v8937_v0  ;;  %v6384_v63 = vld [vmem:[%s11578_s3 + $0x2b0] sm:$0xff] }
 0x48a   :  { %8285 = vmatpush3.msra.mxu0 %v6331_v15  ;;  %8318 = vmatpush3.msra.mxu1 %v6346_v18  ;;  %v6368_v15 = vld [vmem:[%s11578_s3 + $0xc8] sm:$0xff] }
 0x48b   :  { %8328 = vmatprep.subr.mxu0 %v8937_v0  ;;  %8361 = vmatprep.subr.mxu1 %v8937_v0  ;;  %v6383_v18 = vld [vmem:[%s11578_s3 + $0x2a8] sm:$0xff] }
 0x531   :  { %v8248_v21 = vpop.f32.mrf.mxu0  ;;  %v8261_v61 = vpop.f32.mrf.mxu1 }
 0x532   :  { %v3239_v9 = vmax.f32 %v8248_v21, %v8261_v61  ;;  %v6367_v21 = vld [vmem:[%s11578_s3 + $0xc0] sm:$0xff] }
 0x533   :  { %v3145_v12 = vpop.f32.mrf.mxu0  ;;  %v3229_v7 = vpop.f32.mrf.mxu1  ;;  %v6382_v61 = vld [vmem:[%s11578_s3 + $0x2a0] sm:$0xff] }
 0x534   :  { %v3248_v16 = vadd.f32 %v6318_v4, %v3239_v9  ;;  %v3238_v17 = vmax.f32 %v3145_v12, %v3229_v7  ;;  %v6408_v9 = vld [vmem:[%s11578_s3 + $0x178] sm:$0xff]  ;;  %v6407_v7 = vld [vmem:[%s11578_s3 + $0x170] sm:$0xff] }
 0x535   :  { %v6423_v12 = vld [vmem:[%s11578_s3 + $0x358] sm:$0xff] }
 0x536   :  { %8876 = vtanh.f32 %v3248_v16  ;;  %v3247_v22 = vadd.f32 %v6318_v4, %v3238_v17  ;;  %v6422_v16 = vld [vmem:[%s11578_s3 + $0x350] sm:$0xff] }
 0x538   :  { %8878 = vtanh.f32 %v3247_v22  ;;  %v6406_v22 = vld [vmem:[%s11578_s3 + $0x168] sm:$0xff] }
 0x543   :  { %v8877_v8 = vpop.eup %8876 }
 0x544   :  { %3255 = vst.msk [vmem:[#allocation4 + $0xe] sm:$0xff] %vm65_vm0, %v8877_v8  ;;  %v6421_v8 = vld [vmem:[%s11578_s3 + $0x348] sm:$0xff] }
 0x545   :  { %v8879_v29 = vpop.eup %8878 }
 0x546   :  { %3254 = vst.msk [vmem:[#allocation4 + $0x2] sm:$0xff] %vm65_vm0, %v8879_v29  ;;  %v6405_v29 = vld [vmem:[%s11578_s3 + $0x160] sm:$0xff] }
 0x54b   :  { %v3286_v32 = vld [vmem:[#allocation4 + $0x11] sm:$0xf] }
 0x54c   :  { %v3258_v50 = vld [vmem:[#allocation4 + $0x10] sm:$0xf] }
 0x54d   :  { %v3284_v35 = vld [vmem:[#allocation4 + $0x1] sm:$0xff]  ;;  %v3285_v19 = vld [vmem:[#allocation4 + $0x9] sm:$0xff] }
 0x54e   :  { %8287 = vmatmul.mubr.msk.f32.vlgmr.msra.gmra.mxu0 %vm65_vm0, %v3284_v35  ;;  %8320 = vmatmul.mubr.msk.f32.vlgmr.msra.gmra.mxu1 %vm65_vm0, %v3284_v35  ;;  %v3256_v56 = vld [vmem:[#allocation4] sm:$0xff]  ;;  %v3257_v60 = vld [vmem:[#allocation4 + $0x8] sm:$0xff] }
 0x54f   :  { %8329 = vmatpush3.msra.mxu0 %v3270_v6  ;;  %8362 = vmatpush3.msra.mxu1 %v6330_v13  ;;  %v3651_v4 = vld [vmem:[#allocation4 + $0x2] sm:$0xff]  ;;  %v3652_v17 = vld [vmem:[#allocation4 + $0xa] sm:$0xff]  ;;  %v3653_v13 = vld [vmem:[#allocation4 + $0x12] sm:$0xf] }
 0x550   :  { %8330 = vmatprep.subr.mxu0 %v8937_v0  ;;  %8363 = vmatprep.subr.mxu1 %v8937_v0  ;;  %v6420_v6 = vld [vmem:[%s11578_s3 + $0x340] sm:$0xff]  ;;  %v6404_v35 = vld [vmem:[%s11578_s3 + $0x158] sm:$0xff] }
 0x551   :  { %8331 = vmatpush3.msra.mxu0 %v3269_v23  ;;  %8364 = vmatpush3.msra.mxu1 %v6329_v31  ;;  %v6419_v23 = vld [vmem:[%s11578_s3 + $0x338] sm:$0xff]  ;;  %v6403_v31 = vld [vmem:[%s11578_s3 + $0x150] sm:$0xff] }
 0x552   :  { %8289 = vmatprep.mubr.msk.f32.mxu0 %vm8938_vm1, %v8937_v0  ;;  %8322 = vmatprep.mubr.msk.f32.mxu1 %vm8938_vm1, %v8937_v0 }
 0x553   :  { %8332 = vmatprep.subr.mxu0 %v8937_v0  ;;  %8365 = vmatprep.subr.mxu1 %v8937_v0 }
 0x554   :  { %8290 = vmatmul.mubr.msk.f32.gmra.mxu0 %vm65_vm0, %v3285_v19  ;;  %8323 = vmatmul.mubr.msk.f32.gmra.mxu1 %vm65_vm0, %v3285_v19  ;;  %v6417_v19 = vld [vmem:[%s11578_s3 + $0x328] sm:$0xff] }
 0x555   :  { %8333 = vmatpush3.msra.mxu0 %v3268_v10  ;;  %8366 = vmatpush3.msra.mxu1 %v6328_v11  ;;  %v6418_v10 = vld [vmem:[%s11578_s3 + $0x330] sm:$0xff]  ;;  %v6402_v11 = vld [vmem:[%s11578_s3 + $0x148] sm:$0xff] }
 0x556   :  { %8334 = vmatprep.subr.mxu0 %v8937_v0  ;;  %8367 = vmatprep.subr.mxu1 %v8937_v0 }
 0x557   :  { %8335 = vmatpush3.msra.mxu0 %v3267_v20  ;;  %8368 = vmatpush3.msra.mxu1 %v6327_v1  ;;  %v6401_v20 = vld [vmem:[%s11578_s3 + $0x140] sm:$0xff] }
 0x558   :  { %8292 = vmatprep.mubr.msk.f32.mxu0 %vm8938_vm1, %v8937_v0  ;;  %8325 = vmatprep.mubr.msk.f32.mxu1 %vm8938_vm1, %v8937_v0  ;;  %v6416_v1 = vld [vmem:[%s11578_s3 + $0x320] sm:$0xff] }
 0x559   :  { %8336 = vmatprep.subr.mxu0 %v8937_v0  ;;  %8369 = vmatprep.subr.mxu1 %v8937_v0 }
 0x55a   :  { %8293 = vmatmul.mubr.msk.f32.gmra.mxu0 %vm65_vm0, %v3286_v32  ;;  %8326 = vmatmul.mubr.msk.f32.gmra.mxu1 %vm65_vm0, %v3286_v32  ;;  %v6399_v32 = vld [vmem:[%s11578_s3 + $0x130] sm:$0xff] }
 0x55b   :  { %8337 = vmatpush3.msra.mxu0 %v3266_v51  ;;  %8370 = vmatpush3.msra.mxu1 %v6326_v41  ;;  %v6400_v51 = vld [vmem:[%s11578_s3 + $0x138] sm:$0xff] }
 0x55c   :  { %8338 = vmatprep.subr.mxu0 %v8937_v0  ;;  %8371 = vmatprep.subr.mxu1 %v8937_v0  ;;  %v6415_v41 = vld [vmem:[%s11578_s3 + $0x318] sm:$0xff] }
 0x55d   :  { %8339 = vmatpush3.msra.mxu0 %v3265_v25  ;;  %8372 = vmatpush3.msra.mxu1 %v6325_v28  ;;  %v6414_v25 = vld [vmem:[%s11578_s3 + $0x310] sm:$0xff]  ;;  %v6398_v28 = vld [vmem:[%s11578_s3 + $0x128] sm:$0xff] }
 0x55e   :  { %8340 = vmatprep.subr.mxu0 %v8937_v0  ;;  %8373 = vmatprep.subr.mxu1 %v8937_v0 }
 0x55f   :  { %8341 = vmatpush3.msra.mxu0 %v3264_v43  ;;  %8374 = vmatpush3.msra.mxu1 %v6324_v34  ;;  %v6413_v43 = vld [vmem:[%s11578_s3 + $0x308] sm:$0xff]  ;;  %v6397_v34 = vld [vmem:[%s11578_s3 + $0x120] sm:$0xff] }
 0x560   :  { %8342 = vmatprep.subr.mxu0 %v8937_v0  ;;  %8375 = vmatprep.subr.mxu1 %v8937_v0 }
 0x561   :  { %8343 = vmatpush3.msra.mxu0 %v3263_v40  ;;  %8376 = vmatpush3.msra.mxu1 %v6323_v26  ;;  %v6412_v40 = vld [vmem:[%s11578_s3 + $0x300] sm:$0xff]  ;;  %v3855_v26 = vld [vmem:[#allocation4 + $0x3] sm:$0xff] }
 0x562   :  { %8344 = vmatprep.subr.mxu0 %v8937_v0  ;;  %8377 = vmatprep.subr.mxu1 %v8937_v0 }
 0x563   :  { %8345 = vmatpush3.msra.mxu0 %v3262_v27  ;;  %8378 = vmatpush3.msra.mxu1 %v6322_v36  ;;  %v6438_v27 = vld [vmem:[%s11578_s3 + $0x1d8] sm:$0xff] }
 0x564   :  { %8346 = vmatprep.subr.mxu0 %v8937_v0  ;;  %8379 = vmatprep.subr.mxu1 %v8937_v0  ;;  %v6453_v36 = vld [vmem:[%s11578_s3 + $0x3b8] sm:$0xff] }
 0x565   :  { %8347 = vmatpush3.msra.mxu0 %v3261_v42  ;;  %8380 = vmatpush3.msra.mxu1 %v6321_v33  ;;  %v6437_v42 = vld [vmem:[%s11578_s3 + $0x1d0] sm:$0xff] }
 0x566   :  { %8348 = vmatprep.subr.mxu0 %v8937_v0  ;;  %8381 = vmatprep.subr.mxu1 %v8937_v0  ;;  %v6452_v33 = vld [vmem:[%s11578_s3 + $0x3b0] sm:$0xff] }
 0x567   :  { %8349 = vmatpush3.msra.mxu0 %v3260_v2  ;;  %8382 = vmatpush3.msra.mxu1 %v6320_v37  ;;  %v3856_v2 = vld [vmem:[#allocation4 + $0xb] sm:$0xff]  ;;  %v6436_v37 = vld [vmem:[%s11578_s3 + $0x1c8] sm:$0xff] }
 0x568   :  { %8350 = vmatprep.subr.mxu0 %v8937_v0  ;;  %8383 = vmatprep.subr.mxu1 %v8937_v0 }
 0x569   :  { %8351 = vmatpush3.msra.mxu0 %v3259_v57  ;;  %8352 = vmatprep.mubr.msk.f32.mxu0 %vm8938_vm1, %v8937_v0  ;;  %v6451_v57 = vld [vmem:[%s11578_s3 + $0x3a8] sm:$0xff] }
 0x56a   :  { %8384 = vmatpush3.msra.mxu1 %v6319_v3  ;;  %8385 = vmatprep.mubr.msk.f32.mxu1 %vm8938_vm1, %v8937_v0  ;;  %v6435_v3 = vld [vmem:[%s11578_s3 + $0x1c0] sm:$0xff] }
 0x56b   :  { %8353 = vmatmul.mubr.msk.f32.vlgmr.msra.gmra.mxu0 %vm65_vm0, %v3256_v56  ;;  %8386 = vmatmul.mubr.msk.f32.vlgmr.msra.gmra.mxu1 %vm65_vm0, %v3256_v56  ;;  %v6450_v56 = vld [vmem:[%s11578_s3 + $0x3a0] sm:$0xff] }
 0x56c   :  { %8394 = vmatprep.subr.mxu0 %v8937_v0  ;;  %8427 = vmatprep.subr.mxu1 %v8937_v0 }
 0x56d   :  { %8395 = vmatpush3.msra.mxu0 %v6378_v30  ;;  %8428 = vmatpush3.msra.mxu1 %v6393_v24  ;;  %v3857_v30 = vld [vmem:[#allocation4 + $0x13] sm:$0xf]  ;;  %v6434_v24 = vld [vmem:[%s11578_s3 + $0x1b8] sm:$0xff] }
 0x56e   :  { %8396 = vmatprep.subr.mxu0 %v8937_v0  ;;  %8429 = vmatprep.subr.mxu1 %v8937_v0 }
 0x56f   :  { %8355 = vmatprep.mubr.msk.f32.mxu0 %vm8938_vm1, %v8937_v0  ;;  %8388 = vmatprep.mubr.msk.f32.mxu1 %vm8938_vm1, %v8937_v0 }
 0x570   :  { %8397 = vmatpush3.msra.mxu0 %v6377_v45  ;;  %8430 = vmatpush3.msra.mxu1 %v6392_v46  ;;  %v6449_v45 = vld [vmem:[%s11578_s3 + $0x398] sm:$0xff]  ;;  %v6433_v46 = vld [vmem:[%s11578_s3 + $0x1b0] sm:$0xff] }
 0x571   :  { %8356 = vmatmul.mubr.msk.f32.gmra.mxu0 %vm65_vm0, %v3257_v60  ;;  %8389 = vmatmul.mubr.msk.f32.gmra.mxu1 %vm65_vm0, %v3257_v60  ;;  %v6448_v60 = vld [vmem:[%s11578_s3 + $0x390] sm:$0xff] }
 0x572   :  { %8398 = vmatprep.subr.mxu0 %v8937_v0  ;;  %8431 = vmatprep.subr.mxu1 %v8937_v0 }
 0x573   :  { %8399 = vmatpush3.msra.mxu0 %v6376_v47  ;;  %8432 = vmatpush3.msra.mxu1 %v6391_v38  ;;  %v6432_v47 = vld [vmem:[%s11578_s3 + $0x1a8] sm:$0xff] }
 0x574   :  { %8400 = vmatprep.subr.mxu0 %v8937_v0  ;;  %8433 = vmatprep.subr.mxu1 %v8937_v0  ;;  %v6447_v38 = vld [vmem:[%s11578_s3 + $0x388] sm:$0xff] }
 0x575   :  { %8358 = vmatprep.mubr.msk.f32.mxu0 %vm8938_vm1, %v8937_v0  ;;  %8391 = vmatprep.mubr.msk.f32.mxu1 %vm8938_vm1, %v8937_v0 }
 0x576   :  { %8401 = vmatpush3.msra.mxu0 %v6375_v48  ;;  %8434 = vmatpush3.msra.mxu1 %v6390_v49  ;;  %v6431_v48 = vld [vmem:[%s11578_s3 + $0x1a0] sm:$0xff] }
 0x577   :  { %8359 = vmatmul.mubr.msk.f32.gmra.mxu0 %vm65_vm0, %v3258_v50  ;;  %8392 = vmatmul.mubr.msk.f32.gmra.mxu1 %vm65_vm0, %v3258_v50  ;;  %v6446_v49 = vld [vmem:[%s11578_s3 + $0x380] sm:$0xff]  ;;  %v6430_v50 = vld [vmem:[%s11578_s3 + $0x198] sm:$0xff] }
 0x578   :  { %8402 = vmatprep.subr.mxu0 %v8937_v0  ;;  %8435 = vmatprep.subr.mxu1 %v8937_v0 }
 0x579   :  { %8403 = vmatpush3.msra.mxu0 %v6374_v55  ;;  %8436 = vmatpush3.msra.mxu1 %v6389_v52  ;;  %v6445_v55 = vld [vmem:[%s11578_s3 + $0x378] sm:$0xff]  ;;  %v6429_v52 = vld [vmem:[%s11578_s3 + $0x190] sm:$0xff] }
 0x57a   :  { %8404 = vmatprep.subr.mxu0 %v8937_v0  ;;  %8437 = vmatprep.subr.mxu1 %v8937_v0 }
 0x57b   :  { %8405 = vmatpush3.msra.mxu0 %v6373_v53  ;;  %8438 = vmatpush3.msra.mxu1 %v6388_v39  ;;  %v6444_v53 = vld [vmem:[%s11578_s3 + $0x370] sm:$0xff]  ;;  %v6428_v39 = vld [vmem:[%s11578_s3 + $0x188] sm:$0xff] }
 0x57c   :  { %8406 = vmatprep.subr.mxu0 %v8937_v0  ;;  %8439 = vmatprep.subr.mxu1 %v8937_v0 }
 0x57d   :  { %8407 = vmatpush3.msra.mxu0 %v6372_v54  ;;  %8440 = vmatpush3.msra.mxu1 %v6387_v62  ;;  %v6443_v54 = vld [vmem:[%s11578_s3 + $0x368] sm:$0xff]  ;;  %v6427_v62 = vld [vmem:[%s11578_s3 + $0x180] sm:$0xff] }
 0x57e   :  { %8408 = vmatprep.subr.mxu0 %v8937_v0  ;;  %8441 = vmatprep.subr.mxu1 %v8937_v0 }
 0x57f   :  { %8409 = vmatpush3.msra.mxu0 %v6371_v5  ;;  %8442 = vmatpush3.msra.mxu1 %v6386_v58  ;;  %v6442_v5 = vld [vmem:[%s11578_s3 + $0x360] sm:$0xff]  ;;  %v4059_v58 = vld [vmem:[#allocation4 + $0x4] sm:$0xff] }
 0x580   :  { %8410 = vmatprep.subr.mxu0 %v8937_v0  ;;  %8443 = vmatprep.subr.mxu1 %v8937_v0 }
 0x581   :  { %8411 = vmatpush3.msra.mxu0 %v6370_v59  ;;  %8444 = vmatpush3.msra.mxu1 %v6385_v14  ;;  %v4060_v59 = vld [vmem:[#allocation4 + $0xc] sm:$0xff]  ;;  %v4061_v14 = vld [vmem:[#allocation4 + $0x14] sm:$0xf] }
 0x582   :  { %8412 = vmatprep.subr.mxu0 %v8937_v0  ;;  %8445 = vmatprep.subr.mxu1 %v8937_v0 }
 0x583   :  { %8413 = vmatpush3.msra.mxu0 %v6369_v44  ;;  %8446 = vmatpush3.msra.mxu1 %v6384_v63 }
 0x584   :  { %8414 = vmatprep.subr.mxu0 %v8937_v0  ;;  %8447 = vmatprep.subr.mxu1 %v8937_v0 }
 0x585   :  { %8415 = vmatpush3.msra.mxu0 %v6368_v15  ;;  %8448 = vmatpush3.msra.mxu1 %v6383_v18 }
 0x586   :  { %8416 = vmatprep.subr.mxu0 %v8937_v0  ;;  %8449 = vmatprep.subr.mxu1 %v8937_v0 }
 0x587   :  { %8417 = vmatpush3.msra.mxu0 %v6367_v21  ;;  %8418 = vmatprep.mubr.msk.f32.mxu0 %vm8938_vm1, %v8937_v0 }
 0x588   :  { %8450 = vmatpush3.msra.mxu1 %v6382_v61  ;;  %8451 = vmatprep.mubr.msk.f32.mxu1 %vm8938_vm1, %v8937_v0 }
 0x589   :  { %8419 = vmatmul.mubr.msk.f32.vlgmr.msra.gmra.mxu0 %vm65_vm0, %v3651_v4  ;;  %8452 = vmatmul.mubr.msk.f32.vlgmr.msra.gmra.mxu1 %vm65_vm0, %v3651_v4 }
 0x58a   :  { %8460 = vmatprep.subr.mxu0 %v8937_v0  ;;  %8493 = vmatprep.subr.mxu1 %v8937_v0 }
 0x58b   :  { %8461 = vmatpush3.msra.mxu0 %v6408_v9  ;;  %8494 = vmatpush3.msra.mxu1 %v6423_v12 }
 0x58c   :  { %8462 = vmatprep.subr.mxu0 %v8937_v0  ;;  %8495 = vmatprep.subr.mxu1 %v8937_v0 }
 0x58d   :  { %8421 = vmatprep.mubr.msk.f32.mxu0 %vm8938_vm1, %v8937_v0  ;;  %8454 = vmatprep.mubr.msk.f32.mxu1 %vm8938_vm1, %v8937_v0 }
 0x58e   :  { %8463 = vmatpush3.msra.mxu0 %v6407_v7  ;;  %8496 = vmatpush3.msra.mxu1 %v6422_v16 }
 0x58f   :  { %8422 = vmatmul.mubr.msk.f32.gmra.mxu0 %vm65_vm0, %v3652_v17  ;;  %8455 = vmatmul.mubr.msk.f32.gmra.mxu1 %vm65_vm0, %v3652_v17 }
 0x590   :  { %8464 = vmatprep.subr.mxu0 %v8937_v0  ;;  %8497 = vmatprep.subr.mxu1 %v8937_v0 }
 0x591   :  { %8465 = vmatpush3.msra.mxu0 %v6406_v22  ;;  %8498 = vmatpush3.msra.mxu1 %v6421_v8 }
 0x592   :  { %8466 = vmatprep.subr.mxu0 %v8937_v0  ;;  %8499 = vmatprep.subr.mxu1 %v8937_v0 }
 0x593   :  { %8424 = vmatprep.mubr.msk.f32.mxu0 %vm8938_vm1, %v8937_v0  ;;  %8457 = vmatprep.mubr.msk.f32.mxu1 %vm8938_vm1, %v8937_v0 }
 0x594   :  { %8467 = vmatpush3.msra.mxu0 %v6405_v29  ;;  %8500 = vmatpush3.msra.mxu1 %v6420_v6 }
 0x595   :  { %8425 = vmatmul.mubr.msk.f32.gmra.mxu0 %vm65_vm0, %v3653_v13  ;;  %8458 = vmatmul.mubr.msk.f32.gmra.mxu1 %vm65_vm0, %v3653_v13 }
 0x596   :  { %8468 = vmatprep.subr.mxu0 %v8937_v0  ;;  %8501 = vmatprep.subr.mxu1 %v8937_v0 }
 0x597   :  { %8469 = vmatpush3.msra.mxu0 %v6404_v35  ;;  %8502 = vmatpush3.msra.mxu1 %v6419_v23 }
 0x598   :  { %8470 = vmatprep.subr.mxu0 %v8937_v0  ;;  %8503 = vmatprep.subr.mxu1 %v8937_v0 }
 0x599   :  { %8471 = vmatpush3.msra.mxu0 %v6403_v31  ;;  %8504 = vmatpush3.msra.mxu1 %v6418_v10 }
 0x59a   :  { %8472 = vmatprep.subr.mxu0 %v8937_v0  ;;  %8505 = vmatprep.subr.mxu1 %v8937_v0 }
 0x59b   :  { %8473 = vmatpush3.msra.mxu0 %v6402_v11  ;;  %8506 = vmatpush3.msra.mxu1 %v6417_v19 }
 0x59c   :  { %8474 = vmatprep.subr.mxu0 %v8937_v0  ;;  %8507 = vmatprep.subr.mxu1 %v8937_v0 }
 0x59d   :  { %8475 = vmatpush3.msra.mxu0 %v6401_v20  ;;  %8508 = vmatpush3.msra.mxu1 %v6416_v1 }
 0x59e   :  { %8476 = vmatprep.subr.mxu0 %v8937_v0  ;;  %8509 = vmatprep.subr.mxu1 %v8937_v0 }
 0x59f   :  { %8477 = vmatpush3.msra.mxu0 %v6400_v51  ;;  %8510 = vmatpush3.msra.mxu1 %v6415_v41 }
 0x5a0   :  { %8478 = vmatprep.subr.mxu0 %v8937_v0  ;;  %8511 = vmatprep.subr.mxu1 %v8937_v0 }
 0x5a1   :  { %8479 = vmatpush3.msra.mxu0 %v6399_v32  ;;  %8512 = vmatpush3.msra.mxu1 %v6414_v25 }
 0x5a2   :  { %8480 = vmatprep.subr.mxu0 %v8937_v0  ;;  %8513 = vmatprep.subr.mxu1 %v8937_v0 }
 0x5a3   :  { %8481 = vmatpush3.msra.mxu0 %v6398_v28  ;;  %8514 = vmatpush3.msra.mxu1 %v6413_v43 }
 0x5a4   :  { %8482 = vmatprep.subr.mxu0 %v8937_v0  ;;  %8515 = vmatprep.subr.mxu1 %v8937_v0 }
 0x5a5   :  { %8483 = vmatpush3.msra.mxu0 %v6397_v34  ;;  %8484 = vmatprep.mubr.msk.f32.mxu0 %vm8938_vm1, %v8937_v0 }
 0x5a6   :  { %8516 = vmatpush3.msra.mxu1 %v6412_v40  ;;  %8517 = vmatprep.mubr.msk.f32.mxu1 %vm8938_vm1, %v8937_v0 }
 0x5a7   :  { %8485 = vmatmul.mubr.msk.f32.vlgmr.msra.gmra.mxu0 %vm65_vm0, %v3855_v26  ;;  %8518 = vmatmul.mubr.msk.f32.vlgmr.msra.gmra.mxu1 %vm65_vm0, %v3855_v26 }
 0x5a8   :  { %8526 = vmatprep.subr.mxu0 %v8937_v0  ;;  %8559 = vmatprep.subr.mxu1 %v8937_v0 }
 0x5a9   :  { %8527 = vmatpush3.msra.mxu0 %v6438_v27  ;;  %8560 = vmatpush3.msra.mxu1 %v6453_v36 }
 0x5aa   :  { %8528 = vmatprep.subr.mxu0 %v8937_v0  ;;  %8561 = vmatprep.subr.mxu1 %v8937_v0 }
 0x5ab   :  { %8487 = vmatprep.mubr.msk.f32.mxu0 %vm8938_vm1, %v8937_v0  ;;  %8520 = vmatprep.mubr.msk.f32.mxu1 %vm8938_vm1, %v8937_v0 }
 0x5ac   :  { %8529 = vmatpush3.msra.mxu0 %v6437_v42  ;;  %8562 = vmatpush3.msra.mxu1 %v6452_v33 }
 0x5ad   :  { %8488 = vmatmul.mubr.msk.f32.gmra.mxu0 %vm65_vm0, %v3856_v2  ;;  %8521 = vmatmul.mubr.msk.f32.gmra.mxu1 %vm65_vm0, %v3856_v2 }
 0x5ae   :  { %8530 = vmatprep.subr.mxu0 %v8937_v0  ;;  %8563 = vmatprep.subr.mxu1 %v8937_v0 }
 0x5af   :  { %8531 = vmatpush3.msra.mxu0 %v6436_v37  ;;  %8564 = vmatpush3.msra.mxu1 %v6451_v57 }
 0x5b0   :  { %8532 = vmatprep.subr.mxu0 %v8937_v0  ;;  %8565 = vmatprep.subr.mxu1 %v8937_v0 }
 0x5b1   :  { %8490 = vmatprep.mubr.msk.f32.mxu0 %vm8938_vm1, %v8937_v0  ;;  %8523 = vmatprep.mubr.msk.f32.mxu1 %vm8938_vm1, %v8937_v0 }
 0x5b2   :  { %8533 = vmatpush3.msra.mxu0 %v6435_v3  ;;  %8566 = vmatpush3.msra.mxu1 %v6450_v56 }
 0x5b3   :  { %8491 = vmatmul.mubr.msk.f32.gmra.mxu0 %vm65_vm0, %v3857_v30  ;;  %8524 = vmatmul.mubr.msk.f32.gmra.mxu1 %vm65_vm0, %v3857_v30 }
 0x5b4   :  { %8534 = vmatprep.subr.mxu0 %v8937_v0  ;;  %8567 = vmatprep.subr.mxu1 %v8937_v0 }
 0x5b5   :  { %8535 = vmatpush3.msra.mxu0 %v6434_v24  ;;  %8568 = vmatpush3.msra.mxu1 %v6449_v45 }
 0x5b6   :  { %8536 = vmatprep.subr.mxu0 %v8937_v0  ;;  %8569 = vmatprep.subr.mxu1 %v8937_v0 }
 0x5b7   :  { %8537 = vmatpush3.msra.mxu0 %v6433_v46  ;;  %8570 = vmatpush3.msra.mxu1 %v6448_v60 }
 0x5b8   :  { %8538 = vmatprep.subr.mxu0 %v8937_v0  ;;  %8571 = vmatprep.subr.mxu1 %v8937_v0 }
 0x5b9   :  { %8539 = vmatpush3.msra.mxu0 %v6432_v47  ;;  %8572 = vmatpush3.msra.mxu1 %v6447_v38 }
 0x5ba   :  { %8540 = vmatprep.subr.mxu0 %v8937_v0  ;;  %8573 = vmatprep.subr.mxu1 %v8937_v0 }
 0x5bb   :  { %8541 = vmatpush3.msra.mxu0 %v6431_v48  ;;  %8574 = vmatpush3.msra.mxu1 %v6446_v49 }
 0x5bc   :  { %8542 = vmatprep.subr.mxu0 %v8937_v0  ;;  %8575 = vmatprep.subr.mxu1 %v8937_v0 }
 0x5bd   :  { %8543 = vmatpush3.msra.mxu0 %v6430_v50  ;;  %8576 = vmatpush3.msra.mxu1 %v6445_v55 }
 0x5be   :  { %8544 = vmatprep.subr.mxu0 %v8937_v0  ;;  %8577 = vmatprep.subr.mxu1 %v8937_v0 }
 0x5bf   :  { %8545 = vmatpush3.msra.mxu0 %v6429_v52  ;;  %8578 = vmatpush3.msra.mxu1 %v6444_v53 }
 0x5c0   :  { %8546 = vmatprep.subr.mxu0 %v8937_v0  ;;  %8579 = vmatprep.subr.mxu1 %v8937_v0 }
 0x5c1   :  { %8547 = vmatpush3.msra.mxu0 %v6428_v39  ;;  %8580 = vmatpush3.msra.mxu1 %v6443_v54 }
 0x5c2   :  { %8548 = vmatprep.subr.mxu0 %v8937_v0  ;;  %8581 = vmatprep.subr.mxu1 %v8937_v0 }
 0x5c3   :  { %8549 = vmatpush3.msra.mxu0 %v6427_v62  ;;  %8550 = vmatprep.mubr.msk.f32.mxu0 %vm8938_vm1, %v8937_v0 }
 0x5c4   :  { %8582 = vmatpush3.msra.mxu1 %v6442_v5  ;;  %8583 = vmatprep.mubr.msk.f32.mxu1 %vm8938_vm1, %v8937_v0 }
 0x5c5   :  { %8551 = vmatmul.mubr.msk.f32.vlgmr.msra.gmra.mxu0 %vm65_vm0, %v4059_v58  ;;  %8584 = vmatmul.mubr.msk.f32.vlgmr.msra.gmra.mxu1 %vm65_vm0, %v4059_v58 }
 0x5c6   :  { %8553 = vmatprep.mubr.msk.f32.mxu0 %vm8938_vm1, %v8937_v0  ;;  %8586 = vmatprep.mubr.msk.f32.mxu1 %vm8938_vm1, %v8937_v0 }
 0x5c7   :  { %8592 = vmatprep.subr.mxu0 %v8937_v0  ;;  %8601 = vmatprep.subr.mxu1 %v8937_v0 }
 0x5c9   :  { %8554 = vmatmul.mubr.msk.f32.gmra.mxu0 %vm65_vm0, %v4060_v59  ;;  %8587 = vmatmul.mubr.msk.f32.gmra.mxu1 %vm65_vm0, %v4060_v59 }
 0x5ca   :  { %8556 = vmatprep.mubr.msk.f32.mxu0 %vm8938_vm1, %v8937_v0  ;;  %8589 = vmatprep.mubr.msk.f32.mxu1 %vm8938_vm1, %v8937_v0 }
 0x5cd   :  { %8557 = vmatmul.mubr.msk.f32.gmra.mxu0 %vm65_vm0, %v4061_v14  ;;  %8590 = vmatmul.mubr.msk.f32.gmra.mxu1 %vm65_vm0, %v4061_v14  ;;  %vm5917_vm0 = vcmask 91136  }
 0x5ce   :  { %8598 = vmatprep.mubr.msk.f32.mxu0 %vm8938_vm1, %v8937_v0  ;;  %8607 = vmatprep.mubr.msk.f32.mxu1 %vm8938_vm1, %v8937_v0 }
 0x60e   :  { %v3375_v44 = vpop.f32.mrf.mxu0  ;;  %v3468_v63 = vpop.f32.mrf.mxu1 }
 0x610   :  { %v8288_v15 = vpop.f32.mrf.mxu0  ;;  %v8321_v18 = vpop.f32.mrf.mxu1 }
 0x614   :  { %v3380_v21 = vpop.f32.mrf.mxu0  ;;  %v3473_v61 = vpop.f32.mrf.mxu1 }
 0x616   :  { %v8291_v4 = vpop.f32.mrf.mxu0  ;;  %v8324_v9 = vpop.f32.mrf.mxu1 }
 0x61a   :  { %v3385_v12 = vpop.f32.mrf.mxu0  ;;  %v3478_v7 = vpop.f32.mrf.mxu1 }
 0x61c   :  { %v8294_v16 = vpop.f32.mrf.mxu0  ;;  %v8327_v17 = vpop.f32.mrf.mxu1 }
 0x62b   :  { %v3557_v22 = vpop.f32.mrf.mxu0  ;;  %v3637_v8 = vpop.f32.mrf.mxu1 }
 0x62c   :  { %v3558_v29 = vadd.f32 %v3557_v22, %v3375_v44  ;;  %v3638_v6 = vadd.f32 %v3637_v8, %v3468_v63 }
 0x62d   :  { %v8354_v13 = vpop.f32.mrf.mxu0  ;;  %v8387_v35 = vpop.f32.mrf.mxu1 }
 0x631   :  { %v3562_v23 = vpop.f32.mrf.mxu0  ;;  %v3642_v31 = vpop.f32.mrf.mxu1 }
 0x632   :  { %v3563_v10 = vadd.f32 %v3562_v23, %v3380_v21  ;;  %v3643_v11 = vadd.f32 %v3642_v31, %v3473_v61 }
 0x633   :  { %v8357_v19 = vpop.f32.mrf.mxu0  ;;  %v8390_v20 = vpop.f32.mrf.mxu1 }
 0x637   :  { %v3567_v1 = vpop.f32.mrf.mxu0  ;;  %v3647_v51 = vpop.f32.mrf.mxu1 }
 0x638   :  { %v3568_v41 = vadd.f32 %v3567_v1, %v3385_v12  ;;  %v3648_v32 = vadd.f32 %v3647_v51, %v3478_v7  ;;  %v4266_v1 = vld [vmem:[%s11583_s8] sm:$0xff]  ;;  %v6459_v51 = vld [vmem:[%s11583_s8 + $0x8] sm:$0xff]  ;;  %s8910_s8 = scalar_lea.vmem %s5928_s10, 64 }
 0x639   :  { %v8360_v25 = vpop.f32.mrf.mxu0  ;;  %v8393_v28 = vpop.f32.mrf.mxu1  ;;  %p8911_p5 = scmp.ne.s32.totalorder %s5928_s10, %s8910_s8  ;;  %p8916_p7 = scmp.lt.s32.totalorder %s8910_s8, %s8910_s8 }
 0x63a   :  { %v6477_v25 = vld [vmem:[%s11579_s4 + $0x70] sm:$0xff] }
 0x63b   :  { %v6487_v28 = vld [vmem:[%s11579_s4 + $0x1b0] sm:$0xff]  ;;  %p8917_p8 = por %p8916_p7, %p8915_p6 }
 0x63d   :  { %p8918_p9 = pnand %p8917_p8, %p8911_p5 }
 0x649   :  { %v3742_v43 = vpop.f32.mrf.mxu0  ;;  %v3835_v34 = vpop.f32.mrf.mxu1 }
 0x64a   :  { %v3849_v40 = vadd.f32 %v3742_v43, %v3558_v29  ;;  %v3852_v26 = vadd.f32 %v3835_v34, %v3638_v6  ;;  %v6476_v43 = vld [vmem:[%s11579_s4 + $0x68] sm:$0xff] }
 0x64b   :  { %v8420_v27 = vpop.f32.mrf.mxu0  ;;  %v8453_v36 = vpop.f32.mrf.mxu1  ;;  %v6486_v34 = vld [vmem:[%s11579_s4 + $0x1a8] sm:$0xff] }
 0x64c   :  { %v6474_v27 = vld [vmem:[%s11579_s4 + $0x58] sm:$0xff] }
 0x64d   :  { %v6484_v36 = vld [vmem:[%s11579_s4 + $0x198] sm:$0xff] }
 0x64f   :  { %v3747_v42 = vpop.f32.mrf.mxu0  ;;  %v3840_v33 = vpop.f32.mrf.mxu1 }
 0x650   :  { %v3850_v58 = vadd.f32 %v3747_v42, %v3563_v10  ;;  %v3853_v59 = vadd.f32 %v3840_v33, %v3643_v11  ;;  %v6473_v42 = vld [vmem:[%s11579_s4 + $0x50] sm:$0xff] }
 0x651   :  { %v8423_v2 = vpop.f32.mrf.mxu0  ;;  %v8456_v37 = vpop.f32.mrf.mxu1  ;;  %v6483_v33 = vld [vmem:[%s11579_s4 + $0x190] sm:$0xff] }
 0x652   :  { %v6472_v2 = vld [vmem:[%s11579_s4 + $0x48] sm:$0xff] }
 0x653   :  { %v6482_v37 = vld [vmem:[%s11579_s4 + $0x188] sm:$0xff] }
 0x655   :  { %v3752_v57 = vpop.f32.mrf.mxu0  ;;  %v3845_v3 = vpop.f32.mrf.mxu1 }
 0x656   :  { %v3851_v12 = vadd.f32 %v3752_v57, %v3568_v41  ;;  %v3854_v7 = vadd.f32 %v3845_v3, %v3648_v32  ;;  %v6478_v41 = vld [vmem:[%s11579_s4 + $0x78] sm:$0xff]  ;;  %v6471_v57 = vld [vmem:[%s11579_s4 + $0x40] sm:$0xff] }
 0x657   :  { %v8426_v56 = vpop.f32.mrf.mxu0  ;;  %v8459_v30 = vpop.f32.mrf.mxu1  ;;  %v6488_v32 = vld [vmem:[%s11579_s4 + $0x1b8] sm:$0xff]  ;;  %v6481_v3 = vld [vmem:[%s11579_s4 + $0x180] sm:$0xff] }
 0x658   :  { %v4446_v56 = vld [vmem:[%s11579_s4 + $0x38] sm:$0xff] }
 0x659   :  { %v6470_v30 = vld [vmem:[%s11579_s4 + $0x178] sm:$0xff] }
 0x667   :  { %v3946_v24 = vpop.f32.mrf.mxu0  ;;  %v4039_v45 = vpop.f32.mrf.mxu1 }
 0x668   :  { %v4053_v39 = vadd.f32 %v3946_v24, %v3849_v40  ;;  %v4056_v54 = vadd.f32 %v4039_v45, %v3852_v26  ;;  %v6475_v40 = vld [vmem:[%s11579_s4 + $0x60] sm:$0xff] }
 0x669   :  { %v8486_v46 = vpop.f32.mrf.mxu0  ;;  %v8519_v60 = vpop.f32.mrf.mxu1  ;;  %v6485_v26 = vld [vmem:[%s11579_s4 + $0x1a0] sm:$0xff] }
 0x66a   :  { %v6462_v46 = vld [vmem:[%s11587_s12] ss:$0 sm:$0xff] }
 0x66d   :  { %v3951_v47 = vpop.f32.mrf.mxu0  ;;  %v4044_v38 = vpop.f32.mrf.mxu1 }
 0x66e   :  { %v4054_v18 = vadd.f32 %v3951_v47, %v3850_v58  ;;  %v4057_v21 = vadd.f32 %v4044_v38, %v3853_v59  ;;  %v6467_v58 = vld [vmem:[%s11579_s4 + $0x160] sm:$0xff]  ;;  %v4442_v59 = vld [vmem:[%s11579_s4 + $0x18] sm:$0xff] }
 0x66f   :  { %v8489_v48 = vpop.f32.mrf.mxu0  ;;  %v8522_v49 = vpop.f32.mrf.mxu1 }
 0x673   :  { %v3956_v50 = vpop.f32.mrf.mxu0  ;;  %v4049_v55 = vpop.f32.mrf.mxu1 }
 0x674   :  { %v4055_v29 = vadd.f32 %v3956_v50, %v3851_v12  ;;  %v4058_v6 = vadd.f32 %v4049_v55, %v3854_v7  ;;  %v6512_v12 = vld [vmem:[%s11579_s4 + $0x1f8] sm:$0xff] }
 0x675   :  { %v8492_v52 = vpop.f32.mrf.mxu0  ;;  %v8525_v53 = vpop.f32.mrf.mxu1 }
 0x676   :  { %v4445_v53 = vld [vmem:[%s11579_s4 + $0x30] sm:$0xff] }
 0x685   :  { %v4150_v62 = vpop.f32.mrf.mxu0  ;;  %v4243_v5 = vpop.f32.mrf.mxu1 }
 0x686   :  { %v4257_v14 = vadd.f32 %v4150_v62, %v4053_v39  ;;  %v4260_v44 = vadd.f32 %v4243_v5, %v4056_v54  ;;  %v6469_v39 = vld [vmem:[%s11579_s4 + $0x170] sm:$0xff]  ;;  %v4444_v54 = vld [vmem:[%s11579_s4 + $0x28] sm:$0xff]  ;;  %v4443_v5 = vld [vmem:[%s11579_s4 + $0x20] sm:$0xff] }
 0x687   :  { %v8552_v63 = vpop.f32.mrf.mxu0  ;;  %v8585_v15 = vpop.f32.mrf.mxu1  ;;  %v6468_v62 = vld [vmem:[%s11579_s4 + $0x168] sm:$0xff] }
 0x688   :  { %v4263_v61 = vmax.f32 %v4257_v14, %v4260_v44  ;;  %v6466_v14 = vld [vmem:[%s11579_s4 + $0x158] sm:$0xff]  ;;  %v4441_v44 = vld [vmem:[%s11579_s4 + $0x10] sm:$0xff]  ;;  %v4440_v15 = vld [vmem:[%s11579_s4 + $0x8] sm:$0xff] }
 0x689   :  { %v4155_v4 = vpop.f32.mrf.mxu0  ;;  %v4248_v9 = vpop.f32.mrf.mxu1  ;;  %v6465_v63 = vld [vmem:[%s11579_s4 + $0x150] sm:$0xff] }
 0x68a   :  { %v4258_v16 = vadd.f32 %v4155_v4, %v4054_v18  ;;  %v4261_v17 = vadd.f32 %v4248_v9, %v4057_v21  ;;  %v6464_v18 = vld [vmem:[%s11579_s4 + $0x148] sm:$0xff]  ;;  %v4439_v21 = vld [vmem:[%s11579_s4] sm:$0xff]  ;;  %v6502_v9 = vld [vmem:[%s11579_s4 + $0xb8] sm:$0xff] }
 0x68b   :  { %v8555_v22 = vpop.f32.mrf.mxu0  ;;  %v8588_v8 = vpop.f32.mrf.mxu1 }
 0x68c   :  { %v4264_v13 = vmax.f32 %v4258_v16, %v4261_v17  ;;  %v6501_v16 = vld [vmem:[%s11579_s4 + $0xb0] sm:$0xff]  ;;  %v6500_v8 = vld [vmem:[%s11579_s4 + $0xa8] sm:$0xff] }
 0x68d   :  { %v4160_v35 = vpop.f32.mrf.mxu0  ;;  %v4253_v23 = vpop.f32.mrf.mxu1  ;;  %v6511_v17 = vld [vmem:[%s11579_s4 + $0x1f0] sm:$0xff] }
 0x68e   :  { %v4259_v31 = vadd.f32 %v4160_v35, %v4055_v29  ;;  %v4262_v10 = vadd.f32 %v4253_v23, %v4058_v6  ;;  %v6510_v29 = vld [vmem:[%s11579_s4 + $0x1e8] sm:$0xff]  ;;  %v6499_v6 = vld [vmem:[%s11579_s4 + $0xa0] sm:$0xff]  ;;  %v6498_v35 = vld [vmem:[%s11579_s4 + $0x98] sm:$0xff] }
 0x68f   :  { %v8558_v11 = vpop.f32.mrf.mxu0  ;;  %v8591_v19 = vpop.f32.mrf.mxu1  ;;  %v6508_v23 = vld [vmem:[%s11579_s4 + $0x1d8] sm:$0xff] }
 0x690   :  { %v4265_v20 = vmax.f32 %v4259_v31, %v4262_v10  ;;  %v6497_v31 = vld [vmem:[%s11579_s4 + $0x90] sm:$0xff]  ;;  %v6496_v11 = vld [vmem:[%s11579_s4 + $0x88] sm:$0xff] }
 0x691   :  { %v6507_v10 = vld [vmem:[%s11579_s4 + $0x1d0] sm:$0xff]  ;;  %v6506_v19 = vld [vmem:[%s11579_s4 + $0x1c8] sm:$0xff] }
 0x692   :  { %8593 = vmatpush3.msk.msra.mxu0 %vm1684_vm6, %v4265_v20  ;;  %8602 = vmatpush3.msk.msra.mxu1 %vm1684_vm6, %v4265_v20  ;;  %v6495_v20 = vld [vmem:[%s11579_s4 + $0x80] sm:$0xff] }
 0x693   :  { %8594 = vmatprep.subr.mxu0 %v8937_v0  ;;  %8603 = vmatprep.subr.mxu1 %v8937_v0 }
 0x694   :  { %8595 = vmatpush3.msra.mxu0 %v4264_v13  ;;  %8604 = vmatpush3.msra.mxu1 %v4264_v13  ;;  %v6509_v13 = vld [vmem:[%s11579_s4 + $0x1e0] sm:$0xff] }
 0x695   :  { %8596 = vmatprep.subr.mxu0 %v8937_v0  ;;  %8605 = vmatprep.subr.mxu1 %v8937_v0 }
 0x696   :  { %8597 = vmatpush3.msra.mxu0 %v4263_v61  ;;  %8606 = vmatpush3.msra.mxu1 %v4263_v61  ;;  %v6463_v61 = vld [vmem:[%s11579_s4 + $0x140] sm:$0xff] }
 0x697   :  { %8599 = vmatmul.mubr.msk.f32.vlgmr.msra.gmra.mxu0 %vm4267_vm8, %v4266_v1  ;;  %8608 = vmatmul.mubr.msk.f32.vlgmr.msra.gmra.mxu1 %vm4267_vm8, %v6459_v51  ;;  %v6505_v1 = vld [vmem:[%s11579_s4 + $0x1c0] sm:$0xff]  ;;  %v6522_v51 = vld [vmem:[%s11579_s4 + $0xf8] sm:$0xff] }
 0x698   :  { %8610 = vmatprep.subr.mxu0 %v6478_v41  ;;  %8629 = vmatprep.subr.mxu1 %v6488_v32 }
 0x699   :  { %8611 = vmatpush3.msra.mxu0 %v6478_v41  ;;  %8630 = vmatpush3.msra.mxu1 %v6488_v32  ;;  %v6532_v41 = vld [vmem:[%s11579_s4 + $0x238] sm:$0xff] }
 0x69a   :  { %8612 = vmatprep.subr.mxu0 %v6477_v25  ;;  %8631 = vmatprep.subr.mxu1 %v6487_v28 }
 0x69b   :  { %8613 = vmatpush3.msra.mxu0 %v6477_v25  ;;  %8632 = vmatpush3.msra.mxu1 %v6487_v28  ;;  %v6521_v28 = vld [vmem:[%s11579_s4 + $0xf0] sm:$0xff] }
 0x69c   :  { %8614 = vmatprep.subr.mxu0 %v6476_v43  ;;  %8633 = vmatprep.subr.mxu1 %v6486_v34 }
 0x69d   :  { %8615 = vmatpush3.msra.mxu0 %v6476_v43  ;;  %8634 = vmatpush3.msra.mxu1 %v6486_v34  ;;  %v6531_v43 = vld [vmem:[%s11579_s4 + $0x230] sm:$0xff]  ;;  %v6520_v34 = vld [vmem:[%s11579_s4 + $0xe8] sm:$0xff] }
 0x69e   :  { %8616 = vmatprep.subr.mxu0 %v6475_v40  ;;  %8635 = vmatprep.subr.mxu1 %v6485_v26 }
 0x69f   :  { %8617 = vmatpush3.msra.mxu0 %v6475_v40  ;;  %8636 = vmatpush3.msra.mxu1 %v6485_v26  ;;  %v6530_v40 = vld [vmem:[%s11579_s4 + $0x228] sm:$0xff]  ;;  %v6519_v26 = vld [vmem:[%s11579_s4 + $0xe0] sm:$0xff] }
 0x6a0   :  { %8618 = vmatprep.subr.mxu0 %v6474_v27  ;;  %8637 = vmatprep.subr.mxu1 %v6484_v36 }
 0x6a1   :  { %8619 = vmatpush3.msra.mxu0 %v6474_v27  ;;  %8638 = vmatpush3.msra.mxu1 %v6484_v36  ;;  %v6529_v27 = vld [vmem:[%s11579_s4 + $0x220] sm:$0xff]  ;;  %v6518_v36 = vld [vmem:[%s11579_s4 + $0xd8] sm:$0xff] }
 0x6a2   :  { %8620 = vmatprep.subr.mxu0 %v6473_v42  ;;  %8639 = vmatprep.subr.mxu1 %v6483_v33 }
 0x6a3   :  { %8621 = vmatpush3.msra.mxu0 %v6473_v42  ;;  %8640 = vmatpush3.msra.mxu1 %v6483_v33  ;;  %v6528_v42 = vld [vmem:[%s11579_s4 + $0x218] sm:$0xff]  ;;  %v6517_v33 = vld [vmem:[%s11579_s4 + $0xd0] sm:$0xff] }
 0x6a4   :  { %8622 = vmatprep.subr.mxu0 %v6472_v2  ;;  %8641 = vmatprep.subr.mxu1 %v6482_v37 }
 0x6a5   :  { %8623 = vmatpush3.msra.mxu0 %v6472_v2  ;;  %8642 = vmatpush3.msra.mxu1 %v6482_v37  ;;  %v6527_v2 = vld [vmem:[%s11579_s4 + $0x210] sm:$0xff]  ;;  %v6516_v37 = vld [vmem:[%s11579_s4 + $0xc8] sm:$0xff] }
 0x6a6   :  { %8624 = vmatprep.subr.mxu0 %v6471_v57  ;;  %8643 = vmatprep.subr.mxu1 %v6481_v3 }
 0x6a7   :  { %8625 = vmatpush3.msra.mxu0 %v6471_v57  ;;  %8644 = vmatpush3.msra.mxu1 %v6481_v3  ;;  %v6526_v57 = vld [vmem:[%s11579_s4 + $0x208] sm:$0xff]  ;;  %v6515_v3 = vld [vmem:[%s11579_s4 + $0xc0] sm:$0xff] }
 0x6a8   :  { %8648 = vmatprep.subr.mxu0 %v4446_v56  ;;  %8667 = vmatprep.subr.mxu1 %v6470_v30 }
 0x757   :  { %v4340_v24 = vpop.f32.mrf.mxu0  ;;  %v4415_v45 = vpop.f32.mrf.mxu1 }
 0x758   :  { %v4419_v60 = vmax.f32 %v4340_v24, %v4415_v45  ;;  %v6552_v24 = vld [vmem:[%s11579_s4 + $0x278] sm:$0xff] }
 0x759   :  { %v8600_v47 = vpop.f32.mrf.mxu0  ;;  %v8609_v38 = vpop.f32.mrf.mxu1 }
 0x75a   :  { %v4427_v48 = vadd.f32 %v6462_v46, %v4419_v60  ;;  %v6541_v60 = vld [vmem:[%s11579_s4 + $0x130] sm:$0xff]  ;;  %v6540_v38 = vld [vmem:[%s11579_s4 + $0x128] sm:$0xff] }
 0x75b   :  { %v6551_v47 = vld [vmem:[%s11579_s4 + $0x270] sm:$0xff] }
 0x75c   :  { %8880 = vtanh.f32 %v4427_v48  ;;  %v6550_v48 = vld [vmem:[%s11579_s4 + $0x268] sm:$0xff] }
 0x769   :  { %v8881_v49 = vpop.eup %8880 }
 0x76a   :  { %8882 = vtanh.f32 %v8881_v49  ;;  %v6539_v49 = vld [vmem:[%s11579_s4 + $0x120] sm:$0xff] }
 0x777   :  { %v8883_v50 = vpop.eup %8882 }
 0x778   :  { %4434 = vst.msk [vmem:[#allocation5 + $0x2] sm:$0xf] %vm4433_vm10, %v8883_v50 }
 0x779   :  { %4436 = vst.msk [vmem:[#allocation5 + $0x6] sm:$0xf0] %vm4435_vm11, %v8883_v50  ;;  %v6549_v50 = vld [vmem:[%s11579_s4 + $0x260] sm:$0xff] }
 0x77f   :  { %v4456_v55 = vld [vmem:[#allocation5 + $0x1] sm:$0xff] }
 0x780   :  { %v4457_v52 = vld [vmem:[#allocation5 + $0x9] sm:$0xf]  ;;  %8626 = vmatprep.mubr.msk.f32.mxu0 %vm4430_vm9, %v4456_v55  ;;  %8645 = vmatprep.mubr.msk.f32.mxu1 %vm4430_vm9, %v4456_v55  ;;  %v4437_v4 = vld [vmem:[#allocation5] sm:$0xff]  ;;  %v6538_v55 = vld [vmem:[%s11579_s4 + $0x118] sm:$0xff] }
 0x781   :  { %8627 = vmatmul.mubr.msk.f32.vlgmr.msra.gmra.mxu0 %vm4430_vm9, %v4457_v52  ;;  %8646 = vmatmul.mubr.msk.f32.vlgmr.msra.gmra.mxu1 %vm4430_vm9, %v4457_v52  ;;  %v4438_v7 = vld [vmem:[#allocation5 + $0x8] sm:$0xf]  ;;  %v6548_v52 = vld [vmem:[%s11579_s4 + $0x258] sm:$0xff] }
 0x782   :  { %8649 = vmatpush3.msra.mxu0 %v4446_v56  ;;  %8668 = vmatpush3.msra.mxu1 %v6470_v30  ;;  %v4788_v22 = vld [vmem:[#allocation5 + $0x2] sm:$0xff]  ;;  %v4789_v32 = vld [vmem:[#allocation5 + $0xa] sm:$0xf]  ;;  %v6525_v56 = vld [vmem:[%s11579_s4 + $0x200] sm:$0xff] }
 0x783   :  { %8650 = vmatprep.subr.mxu0 %v4445_v53  ;;  %8669 = vmatprep.subr.mxu1 %v6469_v39  ;;  %v4968_v25 = vld [vmem:[#allocation5 + $0x3] sm:$0xff]  ;;  %v6542_v30 = vld [vmem:[%s11579_s4 + $0x138] sm:$0xff]  ;;  %v4969_v45 = vld [vmem:[#allocation5 + $0xb] sm:$0xf] }
 0x784   :  { %8651 = vmatpush3.msra.mxu0 %v4445_v53  ;;  %8670 = vmatpush3.msra.mxu1 %v6469_v39  ;;  %v5148_v46 = vld [vmem:[#allocation5 + $0x4] sm:$0xff] }
 0x785   :  { %8652 = vmatprep.subr.mxu0 %v4444_v54  ;;  %8671 = vmatprep.subr.mxu1 %v6468_v62  ;;  %v6537_v53 = vld [vmem:[%s11579_s4 + $0x110] sm:$0xff] }
 0x786   :  { %8653 = vmatpush3.msra.mxu0 %v4444_v54  ;;  %8672 = vmatpush3.msra.mxu1 %v6468_v62  ;;  %v6547_v39 = vld [vmem:[%s11579_s4 + $0x250] sm:$0xff]  ;;  %v6536_v54 = vld [vmem:[%s11579_s4 + $0x108] sm:$0xff] }
 0x787   :  { %8654 = vmatprep.subr.mxu0 %v4443_v5  ;;  %8673 = vmatprep.subr.mxu1 %v6467_v58  ;;  %v6546_v62 = vld [vmem:[%s11579_s4 + $0x248] sm:$0xff] }
 0x788   :  { %8655 = vmatpush3.msra.mxu0 %v4443_v5  ;;  %8674 = vmatpush3.msra.mxu1 %v6467_v58  ;;  %v6535_v5 = vld [vmem:[%s11579_s4 + $0x100] sm:$0xff] }
 0x789   :  { %8656 = vmatprep.subr.mxu0 %v4442_v59  ;;  %8675 = vmatprep.subr.mxu1 %v6466_v14  ;;  %v6545_v58 = vld [vmem:[%s11579_s4 + $0x240] sm:$0xff] }
 0x78a   :  { %8657 = vmatpush3.msra.mxu0 %v4442_v59  ;;  %8676 = vmatpush3.msra.mxu1 %v6466_v14  ;;  %v5149_v59 = vld [vmem:[#allocation5 + $0xc] sm:$0xf] }
 0x78b   :  { %8658 = vmatprep.subr.mxu0 %v4441_v44  ;;  %8677 = vmatprep.subr.mxu1 %v6465_v63 }
 0x78c   :  { %8659 = vmatpush3.msra.mxu0 %v4441_v44  ;;  %8678 = vmatpush3.msra.mxu1 %v6465_v63 }
 0x78d   :  { %8660 = vmatprep.subr.mxu0 %v4440_v15  ;;  %8679 = vmatprep.subr.mxu1 %v6464_v18 }
 0x78e   :  { %8661 = vmatpush3.msra.mxu0 %v4440_v15  ;;  %8680 = vmatpush3.msra.mxu1 %v6464_v18 }
 0x78f   :  { %8662 = vmatprep.subr.mxu0 %v4439_v21  ;;  %8681 = vmatprep.subr.mxu1 %v6463_v61 }
 0x790   :  { %8663 = vmatpush3.msra.mxu0 %v4439_v21  ;;  %8664 = vmatprep.mubr.msk.f32.mxu0 %vm4430_vm9, %v4437_v4 }
 0x791   :  { %8682 = vmatpush3.msra.mxu1 %v6463_v61  ;;  %8683 = vmatprep.mubr.msk.f32.mxu1 %vm4430_vm9, %v4437_v4 }
 0x792   :  { %8665 = vmatmul.mubr.msk.f32.vlgmr.msra.gmra.mxu0 %vm4430_vm9, %v4438_v7  ;;  %8684 = vmatmul.mubr.msk.f32.vlgmr.msra.gmra.mxu1 %vm4430_vm9, %v4438_v7 }
 0x793   :  { %8686 = vmatprep.subr.mxu0 %v6502_v9  ;;  %8705 = vmatprep.subr.mxu1 %v6512_v12 }
 0x794   :  { %8687 = vmatpush3.msra.mxu0 %v6502_v9  ;;  %8706 = vmatpush3.msra.mxu1 %v6512_v12 }
 0x795   :  { %8688 = vmatprep.subr.mxu0 %v6501_v16  ;;  %8702 = vmatprep.mubr.msk.f32.mxu0 %vm4430_vm9, %v4788_v22 }
 0x796   :  { %8707 = vmatprep.subr.mxu1 %v6511_v17  ;;  %8721 = vmatprep.mubr.msk.f32.mxu1 %vm4430_vm9, %v4788_v22 }
 0x797   :  { %8689 = vmatpush3.msra.mxu0 %v6501_v16  ;;  %8708 = vmatpush3.msra.mxu1 %v6511_v17 }
 0x798   :  { %8690 = vmatprep.subr.mxu0 %v6500_v8  ;;  %8709 = vmatprep.subr.mxu1 %v6510_v29 }
 0x799   :  { %8691 = vmatpush3.msra.mxu0 %v6500_v8  ;;  %8710 = vmatpush3.msra.mxu1 %v6510_v29 }
 0x79a   :  { %8692 = vmatprep.subr.mxu0 %v6499_v6  ;;  %8711 = vmatprep.subr.mxu1 %v6509_v13 }
 0x79b   :  { %8693 = vmatpush3.msra.mxu0 %v6499_v6  ;;  %8712 = vmatpush3.msra.mxu1 %v6509_v13 }
 0x79c   :  { %8694 = vmatprep.subr.mxu0 %v6498_v35  ;;  %8713 = vmatprep.subr.mxu1 %v6508_v23 }
 0x79d   :  { %8695 = vmatpush3.msra.mxu0 %v6498_v35  ;;  %8714 = vmatpush3.msra.mxu1 %v6508_v23 }
 0x79e   :  { %8696 = vmatprep.subr.mxu0 %v6497_v31  ;;  %8715 = vmatprep.subr.mxu1 %v6507_v10 }
 0x79f   :  { %8697 = vmatpush3.msra.mxu0 %v6497_v31  ;;  %8716 = vmatpush3.msra.mxu1 %v6507_v10 }
 0x7a0   :  { %8698 = vmatprep.subr.mxu0 %v6496_v11  ;;  %8717 = vmatprep.subr.mxu1 %v6506_v19 }
 0x7a1   :  { %8699 = vmatpush3.msra.mxu0 %v6496_v11  ;;  %8718 = vmatpush3.msra.mxu1 %v6506_v19 }
 0x7a2   :  { %8700 = vmatprep.subr.mxu0 %v6495_v20  ;;  %8719 = vmatprep.subr.mxu1 %v6505_v1 }
 0x7a3   :  { %8701 = vmatpush3.msra.mxu0 %v6495_v20  ;;  %8720 = vmatpush3.msra.mxu1 %v6505_v1 }
 0x7a4   :  { %8703 = vmatmul.mubr.msk.f32.vlgmr.msra.gmra.mxu0 %vm4430_vm9, %v4789_v32  ;;  %8722 = vmatmul.mubr.msk.f32.vlgmr.msra.gmra.mxu1 %vm4430_vm9, %v4789_v32 }
 0x7a5   :  { %8724 = vmatprep.subr.mxu0 %v6522_v51  ;;  %8743 = vmatprep.subr.mxu1 %v6532_v41 }
 0x7a6   :  { %8725 = vmatpush3.msra.mxu0 %v6522_v51  ;;  %8740 = vmatprep.mubr.msk.f32.mxu0 %vm4430_vm9, %v4968_v25 }
 0x7a7   :  { %8744 = vmatpush3.msra.mxu1 %v6532_v41  ;;  %8759 = vmatprep.mubr.msk.f32.mxu1 %vm4430_vm9, %v4968_v25 }
 0x7a8   :  { %8726 = vmatprep.subr.mxu0 %v6521_v28  ;;  %8745 = vmatprep.subr.mxu1 %v6531_v43 }
 0x7a9   :  { %8727 = vmatpush3.msra.mxu0 %v6521_v28  ;;  %8746 = vmatpush3.msra.mxu1 %v6531_v43 }
 0x7aa   :  { %8728 = vmatprep.subr.mxu0 %v6520_v34  ;;  %8747 = vmatprep.subr.mxu1 %v6530_v40 }
 0x7ab   :  { %8729 = vmatpush3.msra.mxu0 %v6520_v34  ;;  %8748 = vmatpush3.msra.mxu1 %v6530_v40 }
 0x7ac   :  { %8730 = vmatprep.subr.mxu0 %v6519_v26  ;;  %8749 = vmatprep.subr.mxu1 %v6529_v27 }
 0x7ad   :  { %8731 = vmatpush3.msra.mxu0 %v6519_v26  ;;  %8750 = vmatpush3.msra.mxu1 %v6529_v27 }
 0x7ae   :  { %8732 = vmatprep.subr.mxu0 %v6518_v36  ;;  %8751 = vmatprep.subr.mxu1 %v6528_v42 }
 0x7af   :  { %8733 = vmatpush3.msra.mxu0 %v6518_v36  ;;  %8752 = vmatpush3.msra.mxu1 %v6528_v42 }
 0x7b0   :  { %8734 = vmatprep.subr.mxu0 %v6517_v33  ;;  %8753 = vmatprep.subr.mxu1 %v6527_v2 }
 0x7b1   :  { %8735 = vmatpush3.msra.mxu0 %v6517_v33  ;;  %8754 = vmatpush3.msra.mxu1 %v6527_v2  ;;  %v5330_v33 = vld [vmem:[%s11584_s9] sm:$0xf]  ;;  %v6557_v2 = vld [vmem:[%s11584_s9 + $0x4] sm:$0xf] }
 0x7b2   :  { %8736 = vmatprep.subr.mxu0 %v6516_v37  ;;  %8755 = vmatprep.subr.mxu1 %v6526_v57 }
 0x7b3   :  { %8737 = vmatpush3.msra.mxu0 %v6516_v37  ;;  %8756 = vmatpush3.msra.mxu1 %v6526_v57  ;;  %v6563_v37 = vld [vmem:[%s11580_s5 + $0x28] sm:$0xf]  ;;  %v6562_v57 = vld [vmem:[%s11580_s5 + $0x20] sm:$0xff] }
 0x7b4   :  { %8738 = vmatprep.subr.mxu0 %v6515_v3  ;;  %8757 = vmatprep.subr.mxu1 %v6525_v56 }
 0x7b5   :  { %8739 = vmatpush3.msra.mxu0 %v6515_v3  ;;  %8758 = vmatpush3.msra.mxu1 %v6525_v56  ;;  %v6561_v3 = vld [vmem:[%s11580_s5 + $0x18] sm:$0xff]  ;;  %v5504_v56 = vld [vmem:[%s11580_s5 + $0x10] sm:$0xf] }
 0x7b6   :  { %8741 = vmatmul.mubr.msk.f32.vlgmr.msra.gmra.mxu0 %vm4430_vm9, %v4969_v45  ;;  %8760 = vmatmul.mubr.msk.f32.vlgmr.msra.gmra.mxu1 %vm4430_vm9, %v4969_v45 }
 0x7b7   :  { %8762 = vmatprep.subr.mxu0 %v6542_v30  ;;  %8781 = vmatprep.subr.mxu1 %v6552_v24 }
 0x7b8   :  { %8763 = vmatpush3.msra.mxu0 %v6542_v30  ;;  %8778 = vmatprep.mubr.msk.f32.mxu0 %vm4430_vm9, %v5148_v46  ;;  %v5503_v30 = vld [vmem:[%s11580_s5 + $0x8] sm:$0xff] }
 0x7b9   :  { %8782 = vmatpush3.msra.mxu1 %v6552_v24  ;;  %8797 = vmatprep.mubr.msk.f32.mxu1 %vm4430_vm9, %v5148_v46  ;;  %v5502_v24 = vld [vmem:[%s11580_s5] sm:$0xff] }
 0x7ba   :  { %8764 = vmatprep.subr.mxu0 %v6541_v60  ;;  %8783 = vmatprep.subr.mxu1 %v6551_v47 }
 0x7bb   :  { %8765 = vmatpush3.msra.mxu0 %v6541_v60  ;;  %8784 = vmatpush3.msra.mxu1 %v6551_v47  ;;  %v6560_v47 = vld [vmem:[%s11588_s13] ss:$0 sm:$0xff] }
 0x7bc   :  { %8766 = vmatprep.subr.mxu0 %v6540_v38  ;;  %8785 = vmatprep.subr.mxu1 %v6550_v48 }
 0x7bd   :  { %8767 = vmatpush3.msra.mxu0 %v6540_v38  ;;  %8786 = vmatpush3.msra.mxu1 %v6550_v48 }
 0x7be   :  { %8768 = vmatprep.subr.mxu0 %v6539_v49  ;;  %8787 = vmatprep.subr.mxu1 %v6549_v50 }
 0x7bf   :  { %8769 = vmatpush3.msra.mxu0 %v6539_v49  ;;  %8788 = vmatpush3.msra.mxu1 %v6549_v50 }
 0x7c0   :  { %8770 = vmatprep.subr.mxu0 %v6538_v55  ;;  %8789 = vmatprep.subr.mxu1 %v6548_v52 }
 0x7c1   :  { %8771 = vmatpush3.msra.mxu0 %v6538_v55  ;;  %8790 = vmatpush3.msra.mxu1 %v6548_v52  ;;  %v6570_v52 = vld [vmem:[%s11580_s5 + $0x40] sm:$0xf] }
 0x7c2   :  { %8772 = vmatprep.subr.mxu0 %v6537_v53  ;;  %8791 = vmatprep.subr.mxu1 %v6547_v39 }
 0x7c3   :  { %8773 = vmatpush3.msra.mxu0 %v6537_v53  ;;  %8792 = vmatpush3.msra.mxu1 %v6547_v39 }
 0x7c4   :  { %8774 = vmatprep.subr.mxu0 %v6536_v54  ;;  %8793 = vmatprep.subr.mxu1 %v6546_v62 }
 0x7c5   :  { %8775 = vmatpush3.msra.mxu0 %v6536_v54  ;;  %8794 = vmatpush3.msra.mxu1 %v6546_v62  ;;  %v6575_v54 = vld [vmem:[%s11580_s5 + $0x58] sm:$0xf] }
 0x7c6   :  { %8776 = vmatprep.subr.mxu0 %v6535_v5  ;;  %8795 = vmatprep.subr.mxu1 %v6545_v58  ;;  %v6569_v62 = vld [vmem:[%s11580_s5 + $0x38] sm:$0xff] }
 0x7c7   :  { %8777 = vmatpush3.msra.mxu0 %v6535_v5  ;;  %8796 = vmatpush3.msra.mxu1 %v6545_v58  ;;  %v6574_v5 = vld [vmem:[%s11580_s5 + $0x50] sm:$0xff] }
 0x7c8   :  { %8779 = vmatmul.mubr.msk.f32.vlgmr.msra.gmra.mxu0 %vm4430_vm9, %v5149_v59  ;;  %8798 = vmatmul.mubr.msk.f32.vlgmr.msra.gmra.mxu1 %vm4430_vm9, %v5149_v59  ;;  %v6568_v58 = vld [vmem:[%s11580_s5 + $0x30] sm:$0xff] }
 0x7c9   :  { %8800 = vmatprep.subr.mxu1 %v8937_v0  ;;  %8804 = vmatprep.mubr.msk.f32.mxu1 %vm8938_vm1, %v8937_v0  ;;  %v6580_v59 = vld [vmem:[%s11580_s5 + $0x70] sm:$0xf] }
 0x7ca   :  { %8814 = vmatprep.subr.mxu0 %v8937_v0  ;;  %8820 = vmatprep.mubr.msk.f32.mxu0 %vm8938_vm1, %v8937_v0 }
 0x7cb   :  { %8815 = vmatpush3.msk.msra.mxu0 %vm1684_vm6, %v6563_v37 }
 0x7cc   :  { %8816 = vmatprep.subr.mxu0 %v8937_v0 }
 0x7cd   :  { %8817 = vmatpush3.msra.mxu0 %v6562_v57 }
 0x7ce   :  { %8818 = vmatprep.subr.mxu0 %v8937_v0 }
 0x7cf   :  { %8819 = vmatpush3.msra.mxu0 %v6561_v3 }
 0x7d0   :  { %8832 = vmatprep.subr.mxu0 %v8937_v0 }
 0x841   :  { %v8628_v14 = vpop.f32.mrf.mxu0  ;;  %v8647_v44 = vpop.f32.mrf.mxu1 }
 0x843   :  { %v4539_v63 = vpop.f32.mrf.mxu0  ;;  %v4623_v15 = vpop.f32.mrf.mxu1 }
 0x852   :  { %v8666_v18 = vpop.f32.mrf.mxu0  ;;  %v8685_v21 = vpop.f32.mrf.mxu1 }
 0x853   :  { %v4710_v8 = vadd.f32 %v8666_v18, %v8628_v14  ;;  %v4785_v29 = vadd.f32 %v8685_v21, %v8647_v44  ;;  %v6573_v14 = vld [vmem:[%s11580_s5 + $0x48] sm:$0xff] }
 0x854   :  { %v4704_v61 = vpop.f32.mrf.mxu0  ;;  %v4779_v4 = vpop.f32.mrf.mxu1 }
 0x855   :  { %v4705_v6 = vadd.f32 %v4704_v61, %v4539_v63  ;;  %v4780_v13 = vadd.f32 %v4779_v4, %v4623_v15  ;;  %v6579_v63 = vld [vmem:[%s11580_s5 + $0x68] sm:$0xff]  ;;  %v6578_v15 = vld [vmem:[%s11580_s5 + $0x60] sm:$0xff] }
 0x864   :  { %v8704_v9 = vpop.f32.mrf.mxu0  ;;  %v8723_v12 = vpop.f32.mrf.mxu1 }
 0x865   :  { %v4965_v35 = vadd.f32 %v8704_v9, %v4710_v8  ;;  %v4967_v23 = vadd.f32 %v8723_v12, %v4785_v29 }
 0x866   :  { %v4871_v7 = vpop.f32.mrf.mxu0  ;;  %v4955_v16 = vpop.f32.mrf.mxu1 }
 0x867   :  { %v4964_v11 = vadd.f32 %v4871_v7, %v4705_v6  ;;  %v4966_v19 = vadd.f32 %v4955_v16, %v4780_v13 }
 0x876   :  { %v8742_v17 = vpop.f32.mrf.mxu0  ;;  %v8761_v22 = vpop.f32.mrf.mxu1 }
 0x877   :  { %v5145_v20 = vadd.f32 %v8742_v17, %v4965_v35  ;;  %v5147_v1 = vadd.f32 %v8761_v22, %v4967_v23 }
 0x878   :  { %v5051_v31 = vpop.f32.mrf.mxu0  ;;  %v5135_v10 = vpop.f32.mrf.mxu1 }
 0x879   :  { %v5144_v32 = vadd.f32 %v5051_v31, %v4964_v11  ;;  %v5146_v25 = vadd.f32 %v5135_v10, %v4966_v19 }
 0x888   :  { %v8780_v51 = vpop.f32.mrf.mxu0  ;;  %v8799_v41 = vpop.f32.mrf.mxu1 }
 0x889   :  { %v5325_v28 = vadd.f32 %v8780_v51, %v5145_v20  ;;  %v5327_v43 = vadd.f32 %v8799_v41, %v5147_v1 }
 0x88a   :  { %v5231_v34 = vpop.f32.mrf.mxu0  ;;  %v5315_v40 = vpop.f32.mrf.mxu1 }
 0x88b   :  { %v5329_v26 = vmax.f32 %v5325_v28, %v5327_v43  ;;  %v5324_v27 = vadd.f32 %v5231_v34, %v5144_v32  ;;  %v5326_v36 = vadd.f32 %v5315_v40, %v5146_v25 }
 0x88d   :  { %v5328_v42 = vmax.f32 %v5324_v27, %v5326_v36  ;;  %8801 = vmatpush3.msk.msra.mxu1 %vm1684_vm6, %v5329_v26 }
 0x88e   :  { %8802 = vmatprep.subr.mxu1 %v8937_v0 }
 0x88f   :  { %8803 = vmatpush3.msra.mxu1 %v5328_v42 }
 0x890   :  { %8807 = vmatprep.subr.mxu1 %v8937_v0  ;;  %8805 = vmatmul.mubr.msk.f32.vlgmr.msra.gmra.mxu1 %vm5331_vm12, %v5330_v33 }
 0x891   :  { %8808 = vmatpush3.msk.msra.mxu1 %vm1684_vm6, %v5329_v26  ;;  %8811 = vmatprep.mubr.msk.f32.mxu1 %vm8938_vm1, %v8937_v0 }
 0x892   :  { %8809 = vmatprep.subr.mxu1 %v8937_v0 }
 0x893   :  { %8810 = vmatpush3.msra.mxu1 %v5328_v42 }
 0x894   :  { %8812 = vmatmul.mubr.msk.f32.vlgmr.msra.gmra.mxu1 %vm5331_vm12, %v6557_v2  ;;  %8823 = vmatprep.subr.mxu1 %v8937_v0 }
 0x895   :  { %8829 = vmatprep.mubr.msk.f32.mxu1 %vm8938_vm1, %v8937_v0  ;;  %8824 = vmatpush3.msk.msra.mxu1 %vm1684_vm6, %v5504_v56 }
 0x896   :  { %8825 = vmatprep.subr.mxu1 %v8937_v0 }
 0x897   :  { %8826 = vmatpush3.msra.mxu1 %v5503_v30 }
 0x898   :  { %8827 = vmatprep.subr.mxu1 %v8937_v0 }
 0x899   :  { %8828 = vmatpush3.msra.mxu1 %v5502_v24 }
 0x89a   :  { %8841 = vmatprep.subr.mxu1 %v8937_v0 }
 0x950   :  { %v5404_v45 = vpop.f32.mrf.mxu1 }
 0x952   :  { %v8806_v46 = vpop.f32.mrf.mxu1 }
 0x954   :  { %v5479_v60 = vpop.f32.mrf.mxu1 }
 0x955   :  { %v5483_v38 = vmax.f32 %v5404_v45, %v5479_v60 }
 0x956   :  { %v8813_v48 = vpop.f32.mrf.mxu1 }
 0x957   :  { %v5491_v49 = vadd.f32 %v6560_v47, %v5483_v38 }
 0x959   :  { %8884 = vtanh.f32 %v5491_v49 }
 0x966   :  { %v8885_v50 = vpop.eup %8884 }
 0x967   :  { %8886 = vtanh.f32 %v8885_v50 }
 0x974   :  { %v8887_v55 = vpop.eup %8886 }
 0x975   :  { %5498 = vst.msk [vmem:[#allocation6 + $0x2] sm:$0x3] %vm5497_vm14, %v8887_v55 }
 0x976   :  { %5500 = vst.msk [vmem:[#allocation6 + $0x6] sm:$0xc] %vm5499_vm15, %v8887_v55 }
 0x97c   :  { %v5501_v39 = vld [vmem:[#allocation6] sm:$0xff] }
 0x97d   :  { %v5505_v53 = vld [vmem:[#allocation6 + $0x1] sm:$0xff]  ;;  %8830 = vmatmul.mubr.msk.f32.vlgmr.msra.gmra.mxu1 %vm4267_vm8, %v5501_v39 }
 0x97e   :  { %8821 = vmatmul.mubr.msk.f32.vlgmr.msra.gmra.mxu0 %vm4267_vm8, %v5505_v53  ;;  %8842 = vmatpush3.msk.msra.mxu1 %vm1684_vm6, %v6575_v54  ;;  %v5662_v44 = vld [vmem:[#allocation6 + $0x2] sm:$0xff] }
 0x97f   :  { %8833 = vmatpush3.msk.msra.mxu0 %vm1684_vm6, %v6570_v52  ;;  %8838 = vmatprep.mubr.msk.f32.mxu0 %vm8938_vm1, %v8937_v0  ;;  %v5744_v18 = vld [vmem:[#allocation6 + $0x3] sm:$0xff] }
 0x980   :  { %8834 = vmatprep.subr.mxu0 %v8937_v0  ;;  %8843 = vmatprep.subr.mxu1 %v8937_v0  ;;  %v5826_v21 = vld [vmem:[#allocation6 + $0x4] sm:$0xff] }
 0x981   :  { %8835 = vmatpush3.msra.mxu0 %v6569_v62  ;;  %8844 = vmatpush3.msra.mxu1 %v6574_v5 }
 0x982   :  { %8836 = vmatprep.subr.mxu0 %v8937_v0  ;;  %8845 = vmatprep.subr.mxu1 %v8937_v0 }
 0x983   :  { %8837 = vmatpush3.msra.mxu0 %v6568_v58  ;;  %8846 = vmatpush3.msra.mxu1 %v6573_v14 }
 0x984   :  { %8850 = vmatprep.subr.mxu0 %v8937_v0  ;;  %8839 = vmatmul.mubr.msk.f32.vlgmr.msra.gmra.mxu0 %vm4267_vm8, %v5662_v44 }
 0x985   :  { %8851 = vmatpush3.msk.msra.mxu0 %vm1684_vm6, %v6580_v59  ;;  %8847 = vmatprep.mubr.msk.f32.mxu1 %vm8938_vm1, %v8937_v0 }
 0x986   :  { %8852 = vmatprep.subr.mxu0 %v8937_v0  ;;  %8856 = vmatprep.mubr.msk.f32.mxu0 %vm8938_vm1, %v8937_v0  ;;  %vm5920_vm1 = vcmask 97286  }
 0x987   :  { %8853 = vmatpush3.msra.mxu0 %v6579_v63  ;;  %8848 = vmatmul.mubr.msk.f32.vlgmr.msra.gmra.mxu1 %vm4267_vm8, %v5744_v18 }
 0x988   :  { %8854 = vmatprep.subr.mxu0 %v8937_v0  ;;  %v6583_v0 = vld [vmem:[%s11589_s14] ss:$0 sm:$0xff] }
 0x989   :  { %8855 = vmatpush3.msra.mxu0 %v6578_v15 }
 0x98a   :  { %8857 = vmatmul.mubr.msk.f32.vlgmr.msra.gmra.mxu0 %vm4267_vm8, %v5826_v21 }
 0xa3d   :  { %v5658_v4 = vpop.f32.mrf.mxu1 }
 0xa3e   :  { %v5582_v61 = vpop.f32.mrf.mxu0 }
 0xa3f   :  { %v8831_v12 = vpop.f32.mrf.mxu1  ;;  %v5659_v7 = vadd.f32 %v5658_v4, %v5582_v61 }
 0xa40   :  { %v8822_v9 = vpop.f32.mrf.mxu0 }
 0xa44   :  { %v5739_v16 = vpop.f32.mrf.mxu0 }
 0xa45   :  { %v5743_v17 = vadd.f32 %v5739_v16, %v5659_v7 }
 0xa46   :  { %v8840_v22 = vpop.f32.mrf.mxu0 }
 0xa47   :  { %v5821_v8 = vpop.f32.mrf.mxu1 }
 0xa48   :  { %v5825_v29 = vadd.f32 %v5821_v8, %v5743_v17 }
 0xa49   :  { %v8849_v13 = vpop.f32.mrf.mxu1 }
 0xa4a   :  { %v5903_v6 = vpop.f32.mrf.mxu0 }
 0xa4b   :  { %v5907_v35 = vadd.f32 %v5903_v6, %v5825_v29 }
 0xa4c   :  { %v8858_v23 = vpop.f32.mrf.mxu0 }
 0xa4d   :  { %v5915_v31 = vadd.f32 %v6583_v0, %v5907_v35 }
 0xa4f   :  { %8888 = vtanh.f32 %v5915_v31 }
 0xa5c   :  { %v8889_v10 = vpop.eup %8888 }
 0xa5d   :  { %5918 = vst.msk [vmem:[#allocation10] sm:$0x3] %vm5917_vm0, %v8889_v10 }
 0xa5e   :  { %5921 = vst.msk [vmem:[#allocation10 - $0x4] sm:$0xc0] %vm5920_vm1, %v8889_v10 }
 0xa5f   :  { %8921 = shalt.err (!%p8918_p9)
}
 0xa60   :  { %s8942_s14 = smov 2  }
 0xa61   :  { %5933 = dma.vmem_to_hbm [thread:$0]  %s5928_s10, 64, %s11590_s15, [#allocation9], %s8939_s0, %s8939_s0, %s8942_s14  }
 0xa62   :  { %8932 = dma.done.wait [#allocation9], 64  }
 0xa63   :  { %8933 = vsyncadd [#allocation9], 4294967232 }
 0xa64   :  { %5937 = vsyncpa [#allocation8], 1 }
 0xa65   :  { %5938 = vsyncpa [#allocation9], 1 }

</bundles_post_ra>
